<compile_context>
chip_gen: v7x
topology: tpu7x:2x2x1
jax: 0.10.0
libtpu: 0.0.40
codegen_flags: <defaults>
</compile_context>

<pallas_src>
import numpy as np
import jax
import jax.numpy as jnp
from jax.experimental import pallas as pl
from jax.experimental.pallas import tpu as pltpu

# ----------------- config (mirrors PSNetwork.__init__, sgbasis model) -------------
N_FREQS   = 4                        # brdf.net.n_freqs_xyz
DIM_EMB   = 3 * (1 + 2 * N_FREQS)    # 27 -> embedder output dim
N_TRIG    = 6 * N_FREQS              # 24 sin/cos rows (identity rows stored last)
W_ALBEDO  = 64                       # brdf.net.mlp_width
D_ALBEDO  = 4                        # brdf.net.mlp_depth   (kernel hard-codes 4)
SKIP_A    = 2                        # brdf.net.mlp_skip_at (kernel hard-codes 2)
NBASIS    = 9                        # train.nbasis (specular_rgb=False)
W_ROUGH   = 64                       # brdf.sgnet.mlp_width
D_ROUGH   = 4                        # brdf.sgnet.mlp_depth
SKIP_R    = 2                        # brdf.sgnet.mlp_skip_at
LIGHT_INT = 4.0                      # brdf.light_intensity
W_FUSED   = W_ALBEDO + W_ROUGH       # 128 fused hidden width
D_HEAD    = 3 + NBASIS               # 12 fused head rows

MAX_TN    = 2048                     # row tile (per-tile VMEM ~4 MiB; sweepable)
VMEM_LIM  = 48 * 1024 * 1024         # scoped-VMEM cap (v7x-safe: < 64 MiB physical)

# kernel-side embedding row order: [sin/cos rows (24), identity rows (3)];
# reference (torch) order is [x(3), sin f0(3), cos f0(3), sin f1, ...].
_EMB_REORDER = np.concatenate([np.arange(3, DIM_EMB), np.arange(3)]).astype(np.int32)


def _round_up(x, m):
    return ((x + m - 1) // m) * m


# ----------------- deterministic parameter construction ---------------------------
def _linear_dims(din, dout, W, depth, skip_at):
    # nn.ModuleList([Linear(din,W)] + [Linear(W+din if i in skip_at else W, W)
    #                                  for i in range(depth-1)] + [Linear(W,dout)])
    in_dims = [din] + [W + (din if i in skip_at else 0) for i in range(depth - 1)] + [W]
    out_dims = [W] * depth + [dout]
    return list(zip(in_dims, out_dims))


def init_mlp(key, din, dout, W, depth, skip_at):
    """Weights stored as (in, out) so y = x @ W + b (math-equivalent to torch's
    y = x @ W.T + b with (out, in) storage)."""
    Ws, bs = [], []
    for fi, fo in _linear_dims(din, dout, W, depth, skip_at):
        key, k1, k2 = jax.random.split(key, 3)
        lim = 1.0 / np.sqrt(fi)
        Ws.append(jax.random.uniform(k1, (fi, fo), jnp.float32, -lim, lim))
        bs.append(jax.random.uniform(k2, (1, fo), jnp.float32, -lim, lim))
    return Ws, bs


# ----------------- host-side kernel parameter packing ------------------------------
def _emb_selector():
    """(27,3) per-row frequency selector A and (27,1) phase so that
    pre = A @ pts + ph ;  emb = where(row < 24, sin(pre), pre)
    reproduces the NeRF embedder in the reordered [sin/cos..., x] row layout."""
    A  = np.zeros((DIM_EMB, 3), np.float32)
    ph = np.zeros((DIM_EMB, 1), np.float32)
    for k in range(N_FREQS):
        for c in range(3):
            A[6 * k + c, c] = 2.0 ** k            # sin(2^k * x_c)
            A[6 * k + 3 + c, c] = 2.0 ** k        # cos(2^k * x_c) = sin(... + pi/2)
            ph[6 * k + 3 + c, 0] = np.pi / 2.0
    for c in range(3):
        A[N_TRIG + c, c] = 1.0                    # identity rows (sin NOT applied)
    return jnp.asarray(A), jnp.asarray(ph)


def _pack_params(albedo_params, rough_params):
    """Reference (in,out) f32 weights -> kernel format: channel-first (out,in) bf16
    matrices, both branch MLPs fused via block-diagonal weights (one 128-wide MLP),
    fused 12-row head, f32 biases shaped (out,1) for channel-first broadcasting."""
    aW, ab = albedo_params
    rW, rb = rough_params
    bf = jnp.bfloat16
    r = _EMB_REORDER
    A, ph = _emb_selector()

    def cf(w):              # (in, out) -> channel-first (out, in)
        return w.T

    def bd(a, b):           # block-diagonal stack of two channel-first matrices
        za = jnp.zeros((a.shape[0], b.shape[1]), a.dtype)
        zb = jnp.zeros((b.shape[0], a.shape[1]), b.dtype)
        return jnp.concatenate([jnp.concatenate([a, za], 1),
                                jnp.concatenate([zb, b], 1)], 0)

    def bcat(x, y):         # fused bias (out_a+out_b, 1)
        return jnp.concatenate([x, y], axis=1).T

    # layer 0: shared embedding input -> plain column-concat (no zeros needed)
    w0 = jnp.concatenate([aW[0][r], rW[0][r]], axis=1).T.astype(bf)        # (128, 27)
    b0 = bcat(ab[0], rb[0])                                                # (128, 1)
    # layers 1, 2: block-diagonal 128-wide matmuls
    w1 = bd(cf(aW[1]), cf(rW[1])).astype(bf)                               # (128, 128)
    b1 = bcat(ab[1], rb[1])
    w2 = bd(cf(aW[2]), cf(rW[2])).astype(bf)                               # (128, 128)
    b2 = bcat(ab[2], rb[2])
    # layer 3 (skip): split-weight form of cat([y, emb]) @ W3, fused across branches
    w3h = bd(cf(aW[3][:W_ALBEDO]), cf(rW[3][:W_ROUGH])).astype(bf)         # (128, 128)
    w3e = jnp.concatenate([cf(aW[3][W_ALBEDO:][r]),
                           cf(rW[3][W_ROUGH:][r])], axis=0).astype(bf)     # (128, 27)
    b3 = bcat(ab[3], rb[3])
    # fused head: rows 0..2 albedo (sigmoid), rows 3..11 sg weights (relu)
    w4 = bd(cf(aW[4]), cf(rW[4])).astype(bf)                               # (12, 128)
    b4 = bcat(ab[4], rb[4])                                                # (12, 1)

    return [A, ph, w0, b0, w1, b1, w2, b2, w3h, w3e, b3, w4, b4]


# ----------------- Pallas kernel ----------------------------------------------------
def make_kernel(n_lights):
    def kernel(lgt_ref, pts_ref, nrm_ref, msk_ref,
               aemb_ref, ph_ref, w0_ref, b0_ref, w1_ref, b1_ref,
               w2_ref, b2_ref, w3h_ref, w3e_ref, b3_ref, w4_ref, b4_ref,
               rgb_ref, alb_ref, wgt_ref):
        f32, bf16 = jnp.float32, jnp.bfloat16

        # ---- NeRF embedding, channel-first, one vectorized sin over (27, TN) ------
        pts = pts_ref[...]                                   # (3, TN) f32
        A = aemb_ref[...]                                    # (27, 3) selector
        pre = (A[:, 0:1] * pts[0:1, :] + A[:, 1:2] * pts[1:2, :]
               + A[:, 2:3] * pts[2:3, :] + ph_ref[...])      # (27, TN) exact f32
        row = jax.lax.broadcasted_iota(jnp.int32, (DIM_EMB, 1), 0)
        emb = jnp.where(row < N_TRIG, jnp.sin(pre), pre)     # sin/cos rows vs identity
        emb_bf = emb.astype(bf16)

        def cf_dot(w_ref, x_bf):                             # (out,in)@(in,TN) -> f32
            return jnp.dot(w_ref[...], x_bf, preferred_element_type=f32)

        # ---- fused 128-wide MLP (block-diagonal weights = both branches at once) --
        h = jnp.maximum(cf_dot(w0_ref, emb_bf) + b0_ref[...], 0.0)        # (128, TN)
        h = jnp.maximum(cf_dot(w1_ref, h.astype(bf16)) + b1_ref[...], 0.0)
        h = jnp.maximum(cf_dot(w2_ref, h.astype(bf16)) + b2_ref[...], 0.0)
        # skip layer: split-weight form of cat([y, emb], -1) @ W3
        h = jnp.maximum(cf_dot(w3h_ref, h.astype(bf16)) + cf_dot(w3e_ref, emb_bf)
                        + b3_ref[...], 0.0)
        out = cf_dot(w4_ref, h.astype(bf16)) + b4_ref[...]                # (12, TN)

        albedo  = jax.nn.sigmoid(out[:3])                                 # (3, TN)
        weights = jnp.maximum(out[3:3 + NBASIS], 0.0)                     # (9, TN)

        # emulate `tensor[surface_mask] = ...` scatter with where (fill 1 / 0)
        msk = msk_ref[...] > 0.5                                          # (1, TN)
        alb_ref[...] = jnp.where(msk, albedo, 1.0)
        wgt_ref[...] = jnp.where(msk, weights, 0.0)

        # ---- per-light diffuse shading; lane-dense (L, 3, TN) output --------------
        # TODO(synk): SGBasis specular lobe source not provided; diffuse-only brdf.
        nrm = nrm_ref[...]                                                # (3, TN)
        lgt = lgt_ref[...]                                                # (L, 3)
        cos_all = (lgt[:, 0:1] * nrm[0:1, :] + lgt[:, 1:2] * nrm[1:2, :]
                   + lgt[:, 2:3] * nrm[2:3, :])                           # (L, TN) VPU
        for l in range(n_lights):
            rgb_l = jnp.clip(albedo * (LIGHT_INT * cos_all[l:l + 1, :]), 0.0, 1.0)
            rgb_ref[l] = jnp.where(msk, rgb_l, 1.0)                       # (3, TN)

    return kernel


def ps_forward_pallas(pts, normals, mask_f, lights, albedo_params, rough_params):
    N = pts.shape[0]
    L = lights.shape[0]

    TN = min(MAX_TN, _round_up(N, 128))
    n_pad = _round_up(N, TN)
    pad = n_pad - N
    if pad:
        pts = jnp.pad(pts, ((0, pad), (0, 0)))
        normals = jnp.pad(normals, ((0, pad), (0, 0)))
        mask_f = jnp.pad(mask_f, ((0, pad), (0, 0)))     # padded rows -> non-surface
    pts_cf = pts.T                                        # (3, n_pad) channel-first
    nrm_cf = normals.T                                    # (3, n_pad)
    msk_cf = mask_f.T                                     # (1, n_pad)

    params = _pack_params(albedo_params, rough_params)

    def full2d(a):
        return pl.BlockSpec(a.shape, lambda i: (0, 0))

    in_specs = ([full2d(lights),                                      # lights (L, 3)
                 pl.BlockSpec((3, TN), lambda i: (0, i)),             # pts, channel-first
                 pl.BlockSpec((3, TN), lambda i: (0, i)),             # normals, ch-first
                 pl.BlockSpec((1, TN), lambda i: (0, i))] +           # surface mask
                [full2d(p) for p in params])
    out_specs = (pl.BlockSpec((L, 3, TN), lambda i: (0, 0, i)),       # rgb, lane-dense
                 pl.BlockSpec((3, TN), lambda i: (0, i)),             # albedo
                 pl.BlockSpec((NBASIS, TN), lambda i: (0, i)))        # sg weights
    out_shape = (jax.ShapeDtypeStruct((L, 3, n_pad), jnp.float32),
                 jax.ShapeDtypeStruct((3, n_pad), jnp.float32),
                 jax.ShapeDtypeStruct((NBASIS, n_pad), jnp.float32))

    rgb, alb, wgt = pl.pallas_call(
        make_kernel(L),
        grid_spec=pltpu.PrefetchScalarGridSpec(
            num_scalar_prefetch=0,
            grid=(n_pad // TN,),
            in_specs=in_specs,
            out_specs=out_specs),
        out_shape=out_shape,
        compiler_params=pltpu.CompilerParams(
            dimension_semantics=("parallel",),        # megacore sharding on v7x
            vmem_limit_bytes=VMEM_LIM),
    )(lights, pts_cf, nrm_cf, msk_cf, *params)

    # back to torch layouts: rgb (L, N, 3), albedo (N, 3), weights (N, nbasis)
    rgb_out = jnp.transpose(rgb, (0, 2, 1))[:, :N]
    alb_out = alb.T[:N]
    wgt_out = wgt.T[:N]
    return rgb_out, alb_out, wgt_out


# ----------------- pure-JAX reference (for correctness check) ----------------------
def _embed(x, n_freqs):
    feats = [x]
    for k in range(n_freqs):
        f = 2.0 ** k
        feats.append(jnp.sin(x * f))
        feats.append(jnp.cos(x * f))
    return jnp.concatenate(feats, axis=-1)


def _mlp(x_emb, Ws, bs, skip_at, final_act):
    y = x_emb
    n = len(Ws)
    for li in range(n):
        y = jnp.dot(y, Ws[li], preferred_element_type=jnp.float32) + bs[li]
        y = final_act(y) if li == n - 1 else jnp.maximum(y, 0.0)
        if li in skip_at:                       # torch.cat([y, x], -1)
            y = jnp.concatenate([y, x_emb], axis=-1)
    return y


def ps_forward_ref(pts, normals, mask_f, lights, albedo_params, rough_params):
    emb = _embed(pts, N_FREQS)
    albedo = _mlp(emb, *albedo_params, (SKIP_A,), jax.nn.sigmoid)
    weights = jnp.maximum(_mlp(emb, *rough_params, (SKIP_R,), lambda t: t), 0.0)
    cos = normals @ lights.T
    rgb = jnp.clip(albedo[:, None, :] * (LIGHT_INT * cos)[:, :, None], 0.0, 1.0)
    m = mask_f > 0.5
    rgb = jnp.where(m[:, :, None], rgb, 1.0)
    albedo = jnp.where(m, albedo, 1.0)
    weights = jnp.where(m, weights, 0.0)
    return jnp.transpose(rgb, (1, 0, 2)), albedo, weights


# ----------------- main -------------------------------------------------------------
if __name__ == "__main__":
    N = 300          # num_pixels (deliberately not a multiple of 128 -> padding path)
    L = 2            # number of lights (lnum)

    key = jax.random.PRNGKey(0)
    k_pts, k_nrm, k_msk, k_lgt, k_alb, k_rgh = jax.random.split(key, 6)

    pts = jax.random.normal(k_pts, (N, 3), jnp.float32)
    nrm = jax.random.normal(k_nrm, (N, 3), jnp.float32)
    nrm = nrm / jnp.linalg.norm(nrm, axis=-1, keepdims=True)
    mask_f = (jax.random.uniform(k_msk, (N, 1)) > 0.25).astype(jnp.float32)
    lights = jax.random.normal(k_lgt, (L, 3), jnp.float32)
    lights = lights / jnp.linalg.norm(lights, axis=-1, keepdims=True)

    albedo_params = init_mlp(k_alb, DIM_EMB, 3, W_ALBEDO, D_ALBEDO, [SKIP_A])
    rough_params = init_mlp(k_rgh, DIM_EMB, NBASIS, W_ROUGH, D_ROUGH, [SKIP_R])

    out = ps_forward_pallas(pts, nrm, mask_f, lights, albedo_params, rough_params)
    out = jax.block_until_ready(out)
    ref = ps_forward_ref(pts, nrm, mask_f, lights, albedo_params, rough_params)

    # tolerance covers the intentional bf16 MXU path vs the f32 reference
    for got, want in zip(out, ref):
        np.testing.assert_allclose(np.asarray(got), np.asarray(want),
                                   rtol=2e-2, atol=2e-2)

    print("KERNEL_OK")
</pallas_src>

<mosaic_0001>
module attributes {stable_mosaic.version = 11 : i64} {
  func.func @kernel(%arg0: i32, %arg1: memref<2x3xf32, #tpu.memory_space<vmem>>, %arg2: memref<3x384xf32, #tpu.memory_space<vmem>>, %arg3: memref<3x384xf32, #tpu.memory_space<vmem>>, %arg4: memref<1x384xf32, #tpu.memory_space<vmem>>, %arg5: memref<27x3xf32, #tpu.memory_space<vmem>>, %arg6: memref<27x1xf32, #tpu.memory_space<vmem>>, %arg7: memref<128x27xbf16, #tpu.memory_space<vmem>>, %arg8: memref<128x1xf32, #tpu.memory_space<vmem>>, %arg9: memref<128x128xbf16, #tpu.memory_space<vmem>>, %arg10: memref<128x1xf32, #tpu.memory_space<vmem>>, %arg11: memref<128x128xbf16, #tpu.memory_space<vmem>>, %arg12: memref<128x1xf32, #tpu.memory_space<vmem>>, %arg13: memref<128x128xbf16, #tpu.memory_space<vmem>>, %arg14: memref<128x27xbf16, #tpu.memory_space<vmem>>, %arg15: memref<128x1xf32, #tpu.memory_space<vmem>>, %arg16: memref<12x128xbf16, #tpu.memory_space<vmem>>, %arg17: memref<12x1xf32, #tpu.memory_space<vmem>>, %arg18: memref<2x3x384xf32, #tpu.memory_space<vmem>>, %arg19: memref<3x384xf32, #tpu.memory_space<vmem>>, %arg20: memref<9x384xf32, #tpu.memory_space<vmem>>) attributes {dimension_semantics = [#tpu.dimension_semantics<parallel>], iteration_bounds = array<i64: 1>, scalar_prefetch = 0 : i64, scratch_operands = 0 : i64, tpu.core_type = #tpu.core_type<tc>, window_params = [{pipeline_mode = #tpu.pipeline_mode<synchronous>, transform_indices = @transform_0, window_bounds = array<i64: 2, 3>}, {transform_indices = @transform_1, window_bounds = array<i64: 3, 384>}, {transform_indices = @transform_2, window_bounds = array<i64: 3, 384>}, {transform_indices = @transform_3, window_bounds = array<i64: 1, 384>}, {pipeline_mode = #tpu.pipeline_mode<synchronous>, transform_indices = @transform_4, window_bounds = array<i64: 27, 3>}, {pipeline_mode = #tpu.pipeline_mode<synchronous>, transform_indices = @transform_5, window_bounds = array<i64: 27, 1>}, {pipeline_mode = #tpu.pipeline_mode<synchronous>, transform_indices = @transform_6, window_bounds = array<i64: 128, 27>}, {pipeline_mode = #tpu.pipeline_mode<synchronous>, transform_indices = @transform_7, window_bounds = array<i64: 128, 1>}, {pipeline_mode = #tpu.pipeline_mode<synchronous>, transform_indices = @transform_8, window_bounds = array<i64: 128, 128>}, {pipeline_mode = #tpu.pipeline_mode<synchronous>, transform_indices = @transform_9, window_bounds = array<i64: 128, 1>}, {pipeline_mode = #tpu.pipeline_mode<synchronous>, transform_indices = @transform_10, window_bounds = array<i64: 128, 128>}, {pipeline_mode = #tpu.pipeline_mode<synchronous>, transform_indices = @transform_11, window_bounds = array<i64: 128, 1>}, {pipeline_mode = #tpu.pipeline_mode<synchronous>, transform_indices = @transform_12, window_bounds = array<i64: 128, 128>}, {pipeline_mode = #tpu.pipeline_mode<synchronous>, transform_indices = @transform_13, window_bounds = array<i64: 128, 27>}, {pipeline_mode = #tpu.pipeline_mode<synchronous>, transform_indices = @transform_14, window_bounds = array<i64: 128, 1>}, {pipeline_mode = #tpu.pipeline_mode<synchronous>, transform_indices = @transform_15, window_bounds = array<i64: 12, 128>}, {pipeline_mode = #tpu.pipeline_mode<synchronous>, transform_indices = @transform_16, window_bounds = array<i64: 12, 1>}, {transform_indices = @transform_17, window_bounds = array<i64: 2, 3, 384>}, {transform_indices = @transform_18, window_bounds = array<i64: 3, 384>}, {transform_indices = @transform_19, window_bounds = array<i64: 9, 384>}]} {
    %c0 = arith.constant 0 : index
    %c0_0 = arith.constant 0 : index
    %0 = vector.load %arg2[%c0, %c0_0] : memref<3x384xf32, #tpu.memory_space<vmem>>, vector<3x384xf32>
    %c0_1 = arith.constant 0 : index
    %c0_2 = arith.constant 0 : index
    %1 = vector.load %arg5[%c0_1, %c0_2] : memref<27x3xf32, #tpu.memory_space<vmem>>, vector<27x3xf32>
    %2 = vector.extract_strided_slice %1 {offsets = [0, 0], sizes = [27, 1], strides = [1, 1]} : vector<27x3xf32> to vector<27x1xf32>
    %3 = vector.extract_strided_slice %0 {offsets = [0, 0], sizes = [1, 384], strides = [1, 1]} : vector<3x384xf32> to vector<1x384xf32>
    %4 = vector.broadcast %2 : vector<27x1xf32> to vector<27x384xf32>
    %5 = vector.broadcast %3 : vector<1x384xf32> to vector<27x384xf32>
    %6 = arith.mulf %4, %5 : vector<27x384xf32>
    %7 = vector.extract_strided_slice %1 {offsets = [0, 1], sizes = [27, 1], strides = [1, 1]} : vector<27x3xf32> to vector<27x1xf32>
    %8 = vector.extract_strided_slice %0 {offsets = [1, 0], sizes = [1, 384], strides = [1, 1]} : vector<3x384xf32> to vector<1x384xf32>
    %9 = vector.broadcast %7 : vector<27x1xf32> to vector<27x384xf32>
    %10 = vector.broadcast %8 : vector<1x384xf32> to vector<27x384xf32>
    %11 = arith.mulf %9, %10 : vector<27x384xf32>
    %12 = arith.addf %6, %11 : vector<27x384xf32>
    %13 = vector.extract_strided_slice %1 {offsets = [0, 2], sizes = [27, 1], strides = [1, 1]} : vector<27x3xf32> to vector<27x1xf32>
    %14 = vector.extract_strided_slice %0 {offsets = [2, 0], sizes = [1, 384], strides = [1, 1]} : vector<3x384xf32> to vector<1x384xf32>
    %15 = vector.broadcast %13 : vector<27x1xf32> to vector<27x384xf32>
    %16 = vector.broadcast %14 : vector<1x384xf32> to vector<27x384xf32>
    %17 = arith.mulf %15, %16 : vector<27x384xf32>
    %18 = arith.addf %12, %17 : vector<27x384xf32>
    %c0_3 = arith.constant 0 : index
    %c0_4 = arith.constant 0 : index
    %19 = vector.load %arg6[%c0_3, %c0_4] : memref<27x1xf32, #tpu.memory_space<vmem>>, vector<27x1xf32>
    %20 = vector.broadcast %19 : vector<27x1xf32> to vector<27x384xf32>
    %21 = arith.addf %18, %20 : vector<27x384xf32>
    %22 = tpu.iota {dimensions = array<i32: 0>} : vector<27x1xi32>
    %c24_i32 = arith.constant 24 : i32
    %23 = vector.broadcast %c24_i32 : i32 to vector<27x1xi32>
    %24 = arith.cmpi slt, %22, %23 : vector<27x1xi32>
    %25 = math.sin %21 : vector<27x384xf32>
    %26 = vector.shape_cast %24 : vector<27x1xi1> to vector<27x1xi1>
    %27 = vector.broadcast %26 : vector<27x1xi1> to vector<27x384xi1>
    %28 = arith.select %27, %25, %21 : vector<27x384xi1>, vector<27x384xf32>
    %29 = arith.truncf %28 : vector<27x384xf32> to vector<27x384xbf16>
    %c0_5 = arith.constant 0 : index
    %c0_6 = arith.constant 0 : index
    %30 = vector.load %arg7[%c0_5, %c0_6] : memref<128x27xbf16, #tpu.memory_space<vmem>>, vector<128x27xbf16>
    %cst = arith.constant dense<0.000000e+00> : vector<128x384xf32>
    %31 = tpu.matmul %30, %29, %cst {dimension_numbers = #tpu.dot_dimension_numbers<[1], [0], [0], [1], [0, 0, 1, 1], [], []>} : vector<128x27xbf16>, vector<27x384xbf16>, vector<128x384xf32> -> vector<128x384xf32>
    %c0_7 = arith.constant 0 : index
    %c0_8 = arith.constant 0 : index
    %32 = vector.load %arg8[%c0_7, %c0_8] : memref<128x1xf32, #tpu.memory_space<vmem>>, vector<128x1xf32>
    %33 = vector.broadcast %32 : vector<128x1xf32> to vector<128x384xf32>
    %34 = arith.addf %31, %33 : vector<128x384xf32>
    %cst_9 = arith.constant 0.000000e+00 : f32
    %35 = vector.broadcast %cst_9 : f32 to vector<128x384xf32>
    %36 = arith.maximumf %34, %35 : vector<128x384xf32>
    %37 = arith.truncf %36 : vector<128x384xf32> to vector<128x384xbf16>
    %c0_10 = arith.constant 0 : index
    %c0_11 = arith.constant 0 : index
    %38 = vector.load %arg9[%c0_10, %c0_11] : memref<128x128xbf16, #tpu.memory_space<vmem>>, vector<128x128xbf16>
    %cst_12 = arith.constant dense<0.000000e+00> : vector<128x384xf32>
    %39 = tpu.matmul %38, %37, %cst_12 {dimension_numbers = #tpu.dot_dimension_numbers<[1], [0], [0], [1], [0, 0, 1, 1], [], []>} : vector<128x128xbf16>, vector<128x384xbf16>, vector<128x384xf32> -> vector<128x384xf32>
    %c0_13 = arith.constant 0 : index
    %c0_14 = arith.constant 0 : index
    %40 = vector.load %arg10[%c0_13, %c0_14] : memref<128x1xf32, #tpu.memory_space<vmem>>, vector<128x1xf32>
    %41 = vector.broadcast %40 : vector<128x1xf32> to vector<128x384xf32>
    %42 = arith.addf %39, %41 : vector<128x384xf32>
    %cst_15 = arith.constant 0.000000e+00 : f32
    %43 = vector.broadcast %cst_15 : f32 to vector<128x384xf32>
    %44 = arith.maximumf %42, %43 : vector<128x384xf32>
    %45 = arith.truncf %44 : vector<128x384xf32> to vector<128x384xbf16>
    %c0_16 = arith.constant 0 : index
    %c0_17 = arith.constant 0 : index
    %46 = vector.load %arg11[%c0_16, %c0_17] : memref<128x128xbf16, #tpu.memory_space<vmem>>, vector<128x128xbf16>
    %cst_18 = arith.constant dense<0.000000e+00> : vector<128x384xf32>
    %47 = tpu.matmul %46, %45, %cst_18 {dimension_numbers = #tpu.dot_dimension_numbers<[1], [0], [0], [1], [0, 0, 1, 1], [], []>} : vector<128x128xbf16>, vector<128x384xbf16>, vector<128x384xf32> -> vector<128x384xf32>
    %c0_19 = arith.constant 0 : index
    %c0_20 = arith.constant 0 : index
    %48 = vector.load %arg12[%c0_19, %c0_20] : memref<128x1xf32, #tpu.memory_space<vmem>>, vector<128x1xf32>
    %49 = vector.broadcast %48 : vector<128x1xf32> to vector<128x384xf32>
    %50 = arith.addf %47, %49 : vector<128x384xf32>
    %cst_21 = arith.constant 0.000000e+00 : f32
    %51 = vector.broadcast %cst_21 : f32 to vector<128x384xf32>
    %52 = arith.maximumf %50, %51 : vector<128x384xf32>
    %53 = arith.truncf %52 : vector<128x384xf32> to vector<128x384xbf16>
    %c0_22 = arith.constant 0 : index
    %c0_23 = arith.constant 0 : index
    %54 = vector.load %arg13[%c0_22, %c0_23] : memref<128x128xbf16, #tpu.memory_space<vmem>>, vector<128x128xbf16>
    %cst_24 = arith.constant dense<0.000000e+00> : vector<128x384xf32>
    %55 = tpu.matmul %54, %53, %cst_24 {dimension_numbers = #tpu.dot_dimension_numbers<[1], [0], [0], [1], [0, 0, 1, 1], [], []>} : vector<128x128xbf16>, vector<128x384xbf16>, vector<128x384xf32> -> vector<128x384xf32>
    %c0_25 = arith.constant 0 : index
    %c0_26 = arith.constant 0 : index
    %56 = vector.load %arg14[%c0_25, %c0_26] : memref<128x27xbf16, #tpu.memory_space<vmem>>, vector<128x27xbf16>
    %cst_27 = arith.constant dense<0.000000e+00> : vector<128x384xf32>
    %57 = tpu.matmul %56, %29, %cst_27 {dimension_numbers = #tpu.dot_dimension_numbers<[1], [0], [0], [1], [0, 0, 1, 1], [], []>} : vector<128x27xbf16>, vector<27x384xbf16>, vector<128x384xf32> -> vector<128x384xf32>
    %58 = arith.addf %55, %57 : vector<128x384xf32>
    %c0_28 = arith.constant 0 : index
    %c0_29 = arith.constant 0 : index
    %59 = vector.load %arg15[%c0_28, %c0_29] : memref<128x1xf32, #tpu.memory_space<vmem>>, vector<128x1xf32>
    %60 = vector.broadcast %59 : vector<128x1xf32> to vector<128x384xf32>
    %61 = arith.addf %58, %60 : vector<128x384xf32>
    %cst_30 = arith.constant 0.000000e+00 : f32
    %62 = vector.broadcast %cst_30 : f32 to vector<128x384xf32>
    %63 = arith.maximumf %61, %62 : vector<128x384xf32>
    %64 = arith.truncf %63 : vector<128x384xf32> to vector<128x384xbf16>
    %c0_31 = arith.constant 0 : index
    %c0_32 = arith.constant 0 : index
    %65 = vector.load %arg16[%c0_31, %c0_32] : memref<12x128xbf16, #tpu.memory_space<vmem>>, vector<12x128xbf16>
    %cst_33 = arith.constant dense<0.000000e+00> : vector<12x384xf32>
    %66 = tpu.matmul %65, %64, %cst_33 {dimension_numbers = #tpu.dot_dimension_numbers<[1], [0], [0], [1], [0, 0, 1, 1], [], []>} : vector<12x128xbf16>, vector<128x384xbf16>, vector<12x384xf32> -> vector<12x384xf32>
    %c0_34 = arith.constant 0 : index
    %c0_35 = arith.constant 0 : index
    %67 = vector.load %arg17[%c0_34, %c0_35] : memref<12x1xf32, #tpu.memory_space<vmem>>, vector<12x1xf32>
    %68 = vector.broadcast %67 : vector<12x1xf32> to vector<12x384xf32>
    %69 = arith.addf %66, %68 : vector<12x384xf32>
    %70 = vector.extract_strided_slice %69 {offsets = [0, 0], sizes = [3, 384], strides = [1, 1]} : vector<12x384xf32> to vector<3x384xf32>
    %71 = arith.negf %70 : vector<3x384xf32>
    %72 = math.exp %71 : vector<3x384xf32>
    %cst_36 = arith.constant 1.000000e+00 : f32
    %73 = vector.broadcast %cst_36 : f32 to vector<3x384xf32>
    %74 = arith.addf %73, %72 : vector<3x384xf32>
    %75 = arith.divf %73, %74 : vector<3x384xf32>
    %76 = vector.extract_strided_slice %69 {offsets = [3, 0], sizes = [9, 384], strides = [1, 1]} : vector<12x384xf32> to vector<9x384xf32>
    %cst_37 = arith.constant 0.000000e+00 : f32
    %77 = vector.broadcast %cst_37 : f32 to vector<9x384xf32>
    %78 = arith.maximumf %76, %77 : vector<9x384xf32>
    %c0_38 = arith.constant 0 : index
    %c0_39 = arith.constant 0 : index
    %79 = vector.load %arg4[%c0_38, %c0_39] : memref<1x384xf32, #tpu.memory_space<vmem>>, vector<1x384xf32>
    %cst_40 = arith.constant 5.000000e-01 : f32
    %80 = vector.broadcast %cst_40 : f32 to vector<1x384xf32>
    %81 = arith.cmpf ogt, %79, %80 : vector<1x384xf32>
    %cst_41 = arith.constant 1.000000e+00 : f32
    %82 = vector.shape_cast %81 : vector<1x384xi1> to vector<1x384xi1>
    %83 = vector.broadcast %82 : vector<1x384xi1> to vector<3x384xi1>
    %84 = vector.broadcast %cst_41 : f32 to vector<3x384xf32>
    %85 = arith.select %83, %75, %84 : vector<3x384xi1>, vector<3x384xf32>
    %c0_42 = arith.constant 0 : index
    %c0_43 = arith.constant 0 : index
    %86 = vector.load %arg19[%c0_42, %c0_43] : memref<3x384xf32, #tpu.memory_space<vmem>>, vector<3x384xf32>
    tpu.vector_store %arg19[%c0_42, %c0_43], %85 {strides = array<i32>} : memref<3x384xf32, #tpu.memory_space<vmem>>, vector<3x384xf32>,
    %cst_44 = arith.constant 0.000000e+00 : f32
    %87 = vector.shape_cast %81 : vector<1x384xi1> to vector<1x384xi1>
    %88 = vector.broadcast %87 : vector<1x384xi1> to vector<9x384xi1>
    %89 = vector.broadcast %cst_44 : f32 to vector<9x384xf32>
    %90 = arith.select %88, %78, %89 : vector<9x384xi1>, vector<9x384xf32>
    %c0_45 = arith.constant 0 : index
    %c0_46 = arith.constant 0 : index
    %91 = vector.load %arg20[%c0_45, %c0_46] : memref<9x384xf32, #tpu.memory_space<vmem>>, vector<9x384xf32>
    tpu.vector_store %arg20[%c0_45, %c0_46], %90 {strides = array<i32>} : memref<9x384xf32, #tpu.memory_space<vmem>>, vector<9x384xf32>,
    %c0_47 = arith.constant 0 : index
    %c0_48 = arith.constant 0 : index
    %92 = vector.load %arg3[%c0_47, %c0_48] : memref<3x384xf32, #tpu.memory_space<vmem>>, vector<3x384xf32>
    %c0_49 = arith.constant 0 : index
    %c0_50 = arith.constant 0 : index
    %93 = vector.load %arg1[%c0_49, %c0_50] : memref<2x3xf32, #tpu.memory_space<vmem>>, vector<2x3xf32>
    %94 = vector.extract_strided_slice %93 {offsets = [0, 0], sizes = [2, 1], strides = [1, 1]} : vector<2x3xf32> to vector<2x1xf32>
    %95 = vector.extract_strided_slice %92 {offsets = [0, 0], sizes = [1, 384], strides = [1, 1]} : vector<3x384xf32> to vector<1x384xf32>
    %96 = vector.broadcast %94 : vector<2x1xf32> to vector<2x384xf32>
    %97 = vector.broadcast %95 : vector<1x384xf32> to vector<2x384xf32>
    %98 = arith.mulf %96, %97 : vector<2x384xf32>
    %99 = vector.extract_strided_slice %93 {offsets = [0, 1], sizes = [2, 1], strides = [1, 1]} : vector<2x3xf32> to vector<2x1xf32>
    %100 = vector.extract_strided_slice %92 {offsets = [1, 0], sizes = [1, 384], strides = [1, 1]} : vector<3x384xf32> to vector<1x384xf32>
    %101 = vector.broadcast %99 : vector<2x1xf32> to vector<2x384xf32>
    %102 = vector.broadcast %100 : vector<1x384xf32> to vector<2x384xf32>
    %103 = arith.mulf %101, %102 : vector<2x384xf32>
    %104 = arith.addf %98, %103 : vector<2x384xf32>
    %105 = vector.extract_strided_slice %93 {offsets = [0, 2], sizes = [2, 1], strides = [1, 1]} : vector<2x3xf32> to vector<2x1xf32>
    %106 = vector.extract_strided_slice %92 {offsets = [2, 0], sizes = [1, 384], strides = [1, 1]} : vector<3x384xf32> to vector<1x384xf32>
    %107 = vector.broadcast %105 : vector<2x1xf32> to vector<2x384xf32>
    %108 = vector.broadcast %106 : vector<1x384xf32> to vector<2x384xf32>
    %109 = arith.mulf %107, %108 : vector<2x384xf32>
    %110 = arith.addf %104, %109 : vector<2x384xf32>
    %111 = vector.extract_strided_slice %110 {offsets = [0, 0], sizes = [1, 384], strides = [1, 1]} : vector<2x384xf32> to vector<1x384xf32>
    %cst_51 = arith.constant 4.000000e+00 : f32
    %112 = vector.broadcast %cst_51 : f32 to vector<1x384xf32>
    %113 = arith.mulf %112, %111 : vector<1x384xf32>
    %114 = vector.broadcast %113 : vector<1x384xf32> to vector<3x384xf32>
    %115 = arith.mulf %75, %114 : vector<3x384xf32>
    %cst_52 = arith.constant 0.000000e+00 : f32
    %cst_53 = arith.constant 1.000000e+00 : f32
    %116 = vector.broadcast %cst_52 : f32 to vector<3x384xf32>
    %117 = arith.maximumf %116, %115 : vector<3x384xf32>
    %118 = vector.broadcast %cst_53 : f32 to vector<3x384xf32>
    %119 = arith.minimumf %118, %117 : vector<3x384xf32>
    %cst_54 = arith.constant 1.000000e+00 : f32
    %120 = vector.shape_cast %81 : vector<1x384xi1> to vector<1x384xi1>
    %121 = vector.broadcast %120 : vector<1x384xi1> to vector<3x384xi1>
    %122 = vector.broadcast %cst_54 : f32 to vector<3x384xf32>
    %123 = arith.select %121, %119, %122 : vector<3x384xi1>, vector<3x384xf32>
    %c0_55 = arith.constant 0 : index
    %c0_56 = arith.constant 0 : index
    %c0_57 = arith.constant 0 : index
    %124 = vector.load %arg18[%c0_55, %c0_56, %c0_57] : memref<2x3x384xf32, #tpu.memory_space<vmem>>, vector<1x3x384xf32>
    %125 = vector.shape_cast %124 : vector<1x3x384xf32> to vector<3x384xf32>
    %126 = vector.shape_cast %123 : vector<3x384xf32> to vector<1x3x384xf32>
    tpu.vector_store %arg18[%c0_55, %c0_56, %c0_57], %126 {strides = array<i32>} : memref<2x3x384xf32, #tpu.memory_space<vmem>>, vector<1x3x384xf32>,
    %127 = vector.extract_strided_slice %110 {offsets = [1, 0], sizes = [1, 384], strides = [1, 1]} : vector<2x384xf32> to vector<1x384xf32>
    %cst_58 = arith.constant 4.000000e+00 : f32
    %128 = vector.broadcast %cst_58 : f32 to vector<1x384xf32>
    %129 = arith.mulf %128, %127 : vector<1x384xf32>
    %130 = vector.broadcast %129 : vector<1x384xf32> to vector<3x384xf32>
    %131 = arith.mulf %75, %130 : vector<3x384xf32>
    %cst_59 = arith.constant 0.000000e+00 : f32
    %cst_60 = arith.constant 1.000000e+00 : f32
    %132 = vector.broadcast %cst_59 : f32 to vector<3x384xf32>
    %133 = arith.maximumf %132, %131 : vector<3x384xf32>
    %134 = vector.broadcast %cst_60 : f32 to vector<3x384xf32>
    %135 = arith.minimumf %134, %133 : vector<3x384xf32>
    %cst_61 = arith.constant 1.000000e+00 : f32
    %136 = vector.shape_cast %81 : vector<1x384xi1> to vector<1x384xi1>
    %137 = vector.broadcast %136 : vector<1x384xi1> to vector<3x384xi1>
    %138 = vector.broadcast %cst_61 : f32 to vector<3x384xf32>
    %139 = arith.select %137, %135, %138 : vector<3x384xi1>, vector<3x384xf32>
    %c1 = arith.constant 1 : index
    %c0_62 = arith.constant 0 : index
    %c0_63 = arith.constant 0 : index
    %140 = vector.load %arg18[%c1, %c0_62, %c0_63] : memref<2x3x384xf32, #tpu.memory_space<vmem>>, vector<1x3x384xf32>
    %141 = vector.shape_cast %140 : vector<1x3x384xf32> to vector<3x384xf32>
    %142 = vector.shape_cast %139 : vector<3x384xf32> to vector<1x3x384xf32>
    tpu.vector_store %arg18[%c1, %c0_62, %c0_63], %142 {strides = array<i32>} : memref<2x3x384xf32, #tpu.memory_space<vmem>>, vector<1x3x384xf32>,
    return
  }
  func.func @transform_0(%arg0: i32) -> (i32, i32) {
    %c0_i32 = arith.constant 0 : i32
    %c0_i32_0 = arith.constant 0 : i32
    %c0_i32_1 = arith.constant 0 : i32
    return %c0_i32, %c0_i32_0 : i32, i32
  }
  func.func @transform_1(%arg0: i32) -> (i32, i32) {
    %c0_i32 = arith.constant 0 : i32
    %c0_i32_0 = arith.constant 0 : i32
    return %c0_i32, %arg0 : i32, i32
  }
  func.func @transform_2(%arg0: i32) -> (i32, i32) {
    %c0_i32 = arith.constant 0 : i32
    %c0_i32_0 = arith.constant 0 : i32
    return %c0_i32, %arg0 : i32, i32
  }
  func.func @transform_3(%arg0: i32) -> (i32, i32) {
    %c0_i32 = arith.constant 0 : i32
    %c0_i32_0 = arith.constant 0 : i32
    return %c0_i32, %arg0 : i32, i32
  }
  func.func @transform_4(%arg0: i32) -> (i32, i32) {
    %c0_i32 = arith.constant 0 : i32
    %c0_i32_0 = arith.constant 0 : i32
    %c0_i32_1 = arith.constant 0 : i32
    return %c0_i32, %c0_i32_0 : i32, i32
  }
  func.func @transform_5(%arg0: i32) -> (i32, i32) {
    %c0_i32 = arith.constant 0 : i32
    %c0_i32_0 = arith.constant 0 : i32
    %c0_i32_1 = arith.constant 0 : i32
    return %c0_i32, %c0_i32_0 : i32, i32
  }
  func.func @transform_6(%arg0: i32) -> (i32, i32) {
    %c0_i32 = arith.constant 0 : i32
    %c0_i32_0 = arith.constant 0 : i32
    %c0_i32_1 = arith.constant 0 : i32
    return %c0_i32, %c0_i32_0 : i32, i32
  }
  func.func @transform_7(%arg0: i32) -> (i32, i32) {
    %c0_i32 = arith.constant 0 : i32
    %c0_i32_0 = arith.constant 0 : i32
    %c0_i32_1 = arith.constant 0 : i32
    return %c0_i32, %c0_i32_0 : i32, i32
  }
  func.func @transform_8(%arg0: i32) -> (i32, i32) {
    %c0_i32 = arith.constant 0 : i32
    %c0_i32_0 = arith.constant 0 : i32
    %c0_i32_1 = arith.constant 0 : i32
    return %c0_i32, %c0_i32_0 : i32, i32
  }
  func.func @transform_9(%arg0: i32) -> (i32, i32) {
    %c0_i32 = arith.constant 0 : i32
    %c0_i32_0 = arith.constant 0 : i32
    %c0_i32_1 = arith.constant 0 : i32
    return %c0_i32, %c0_i32_0 : i32, i32
  }
  func.func @transform_10(%arg0: i32) -> (i32, i32) {
    %c0_i32 = arith.constant 0 : i32
    %c0_i32_0 = arith.constant 0 : i32
    %c0_i32_1 = arith.constant 0 : i32
    return %c0_i32, %c0_i32_0 : i32, i32
  }
  func.func @transform_11(%arg0: i32) -> (i32, i32) {
    %c0_i32 = arith.constant 0 : i32
    %c0_i32_0 = arith.constant 0 : i32
    %c0_i32_1 = arith.constant 0 : i32
    return %c0_i32, %c0_i32_0 : i32, i32
  }
  func.func @transform_12(%arg0: i32) -> (i32, i32) {
    %c0_i32 = arith.constant 0 : i32
    %c0_i32_0 = arith.constant 0 : i32
    %c0_i32_1 = arith.constant 0 : i32
    return %c0_i32, %c0_i32_0 : i32, i32
  }
  func.func @transform_13(%arg0: i32) -> (i32, i32) {
    %c0_i32 = arith.constant 0 : i32
    %c0_i32_0 = arith.constant 0 : i32
    %c0_i32_1 = arith.constant 0 : i32
    return %c0_i32, %c0_i32_0 : i32, i32
  }
  func.func @transform_14(%arg0: i32) -> (i32, i32) {
    %c0_i32 = arith.constant 0 : i32
    %c0_i32_0 = arith.constant 0 : i32
    %c0_i32_1 = arith.constant 0 : i32
    return %c0_i32, %c0_i32_0 : i32, i32
  }
  func.func @transform_15(%arg0: i32) -> (i32, i32) {
    %c0_i32 = arith.constant 0 : i32
    %c0_i32_0 = arith.constant 0 : i32
    %c0_i32_1 = arith.constant 0 : i32
    return %c0_i32, %c0_i32_0 : i32, i32
  }
  func.func @transform_16(%arg0: i32) -> (i32, i32) {
    %c0_i32 = arith.constant 0 : i32
    %c0_i32_0 = arith.constant 0 : i32
    %c0_i32_1 = arith.constant 0 : i32
    return %c0_i32, %c0_i32_0 : i32, i32
  }
  func.func @transform_17(%arg0: i32) -> (i32, i32, i32) {
    %c0_i32 = arith.constant 0 : i32
    %c0_i32_0 = arith.constant 0 : i32
    %c0_i32_1 = arith.constant 0 : i32
    return %c0_i32, %c0_i32_0, %arg0 : i32, i32, i32
  }
  func.func @transform_18(%arg0: i32) -> (i32, i32) {
    %c0_i32 = arith.constant 0 : i32
    %c0_i32_0 = arith.constant 0 : i32
    return %c0_i32, %arg0 : i32, i32
  }
  func.func @transform_19(%arg0: i32) -> (i32, i32) {
    %c0_i32 = arith.constant 0 : i32
    %c0_i32_0 = arith.constant 0 : i32
    return %c0_i32, %arg0 : i32, i32
  }
}

</mosaic_0001>

<bundles_post_ra>
// kernel: tpu_custom_call.1
= control target key start
LH: loop header
LB: loop body
LE: loop exit
PB: predicated region body
PF: predicated region fallthrough
CT: control target
= control target key end

     0   :  { %s7059_s0 = inlined_call_operand.vmem [shape: f32[2,3], index: 0, kind: input, shape index: {}]   ;;  %s7060_s1 = inlined_call_operand.vmem [shape: f32[3,384], index: 1, kind: input, shape index: {}]   ;;  %s7061_s2 = inlined_call_operand.vmem [shape: f32[3,384], index: 2, kind: input, shape index: {}]   ;;  %s7062_s3 = inlined_call_operand.vmem [shape: f32[1,384], index: 3, kind: input, shape index: {}]   ;;  %s7063_s4 = inlined_call_operand.vmem [shape: f32[27,3], index: 4, kind: input, shape index: {}]   ;;  %s7064_s5 = inlined_call_operand.vmem [shape: f32[27,1], index: 5, kind: input, shape index: {}]   ;;  %s7065_s6 = inlined_call_operand.vmem [shape: bf16[128,27], index: 6, kind: input, shape index: {}]   ;;  %s7066_s7 = inlined_call_operand.vmem [shape: f32[128,1], index: 7, kind: input, shape index: {}]   ;;  %s7067_s8 = inlined_call_operand.vmem [shape: bf16[128,128], index: 8, kind: input, shape index: {}]   ;;  %s7068_s9 = inlined_call_operand.vmem [shape: f32[128,1], index: 9, kind: input, shape index: {}]   ;;  %s7069_s10 = inlined_call_operand.vmem [shape: bf16[128,128], index: 10, kind: input, shape index: {}]   ;;  %s7070_s11 = inlined_call_operand.vmem [shape: f32[128,1], index: 11, kind: input, shape index: {}]   ;;  %s7071_s12 = inlined_call_operand.vmem [shape: bf16[128,128], index: 12, kind: input, shape index: {}]   ;;  %s7072_s13 = inlined_call_operand.vmem [shape: bf16[128,27], index: 13, kind: input, shape index: {}]   ;;  %s7073_s14 = inlined_call_operand.vmem [shape: f32[128,1], index: 14, kind: input, shape index: {}]   ;;  %s7074_s15 = inlined_call_operand.vmem [shape: bf16[12,128], index: 15, kind: input, shape index: {}]   ;;  %s7075_s16 = inlined_call_operand.vmem [shape: f32[12,1], index: 16, kind: input, shape index: {}]   ;;  %s7076_s17 = inlined_call_operand.vmem [shape: f32[2,3,384], index: 17, kind: output, shape index: {0}]   ;;  %s7077_s18 = inlined_call_operand.hbm [shape: f32[3,384], index: 18, kind: output, shape index: {1}]   ;;  %s7078_s19 = inlined_call_operand.hbm [shape: f32[9,384], index: 19, kind: output, shape index: {2}]  }
   0x1   :  { %7144 = sst [smem:[#allocation34_spill]] %s7059_s0 }
   0x2   :  { %7145 = sst [smem:[#allocation35_spill]] %s7060_s1 }
   0x3   :  { %7146 = sst [smem:[#allocation36_spill]] %s7061_s2 }
   0x4   :  { %7147 = sst [smem:[#allocation37_spill]] %s7062_s3 }
   0x5   :  { %25 = vsyncpa [#allocation3], 0  ;;  %v64_v0 = vld [vmem:[%s7063_s4] sm:$0xff]  ;;  %v4727_v1 = vmov 2   ;;  %v4728_v2 = vmov 1   ;;  %v65_v3 = vld [vmem:[%s7063_s4 + $0x8] sm:$0xff] }
   0x6   :  { %4578 = vset.pattern.permute.xlu0 %v4727_v1  ;;  %4577 = vset.pattern.permute.xlu1 %v4728_v2  ;;  %v7085_v4 = vmov 0   ;;  %v66_v5 = vld [vmem:[%s7063_s4 + $0x10] sm:$0xff]  ;;  %v263_v6 = vld [vmem:[%s7064_s5] sm:$0xff]  ;;  %v67_v7 = vld [vmem:[%s7063_s4 + $0x18] sm:$0x7] }
   0x7   :  { %197 = vperm.xlu0 %4578, %v64_v0   ;;  %130 = vperm.xlu1 %4577, %v64_v0   ;;  %v264_v8 = vld [vmem:[%s7064_s5 + $0x8] sm:$0xff]  ;;  %v265_v9 = vld [vmem:[%s7064_s5 + $0x10] sm:$0xff]  ;;  %v1602_v11 = vld [vmem:[%s7066_s7 + $0x20] sm:$0xff] }
   0x8   :  { %1804 = vmatprep.mubr.bf16.mxu0 %v7085_v4  ;;  %v1599_v10 = vld [vmem:[%s7066_s7 + $0x8] sm:$0xff]  ;;  %v266_v12 = vld [vmem:[%s7064_s5 + $0x18] sm:$0x7]  ;;  %v1604_v13 = vld [vmem:[%s7066_s7 + $0x30] sm:$0xff] }
   0x9   :  { %v1598_v14 = vld [vmem:[%s7066_s7] sm:$0xff]  ;;  %v1600_v16 = vld [vmem:[%s7066_s7 + $0x10] sm:$0xff]  ;;  %v1601_v18 = vld [vmem:[%s7066_s7 + $0x18] sm:$0xff] }
   0xa   :  { %v1606_v15 = vld [vmem:[%s7066_s7 + $0x40] sm:$0xff]  ;;  %v1608_v17 = vld [vmem:[%s7066_s7 + $0x50] sm:$0xff] }
   0xb   :  { %4579 = vset.pattern.permute.xlu0 %v7085_v4  ;;  %134 = vperm.xlu1 %4577, %v65_v3   ;;  %v1610_v19 = vld [vmem:[%s7066_s7 + $0x60] sm:$0xff] }
   0xc   :  { %70 = vperm.xlu0 %4579, %v64_v0  }
   0xf   :  { %138 = vperm.xlu1 %4577, %v66_v5  }
  0x10   :  { %75 = vperm.xlu0 %4579, %v65_v3  }
  0x13   :  { %4580 = vset.pattern.permute.xlu1 %v4727_v1 }
  0x14   :  { %80 = vperm.xlu0 %4579, %v66_v5   ;;  %201 = vperm.xlu1 %4580, %v65_v3  }
  0x18   :  { %269 = vperm.xlu0 %4579, %v263_v6   ;;  %205 = vperm.xlu1 %4580, %v66_v5  }
  0x1c   :  { %85 = vperm.xlu0 %4579, %v67_v7   ;;  %4581 = vset.pattern.permute.xlu1 %v7085_v4 }
  0x1d   :  { %274 = vperm.xlu1 %4581, %v264_v8  }
  0x20   :  { %4583 = vset.pattern.permute.xlu0 %v4727_v1 }
  0x21   :  { %279 = vperm.xlu1 %4581, %v265_v9   ;;  %209 = vperm.xlu0 %4583, %v67_v7  }
  0x25   :  { %4582 = vset.pattern.permute.xlu1 %v4728_v2  ;;  %4585 = vset.pattern.permute.xlu0 %v7085_v4 }
  0x26   :  { %142 = vperm.xlu1 %4582, %v67_v7   ;;  %1621 = vperm.xlu0 %4585, %v1599_v10  }
  0x2a   :  { %4584 = vset.pattern.permute.xlu1 %v7085_v4  ;;  %1636 = vperm.xlu0 %4585, %v1602_v11  }
  0x2b   :  { %284 = vperm.xlu1 %4584, %v266_v12  }
  0x2e   :  { %1646 = vperm.xlu0 %4585, %v1604_v13  }
  0x2f   :  { %1616 = vperm.xlu1 %4584, %v1598_v14  }
  0x32   :  { %1656 = vperm.xlu0 %4585, %v1606_v15  }
  0x33   :  { %1626 = vperm.xlu1 %4584, %v1600_v16  }
  0x36   :  { %1666 = vperm.xlu0 %4585, %v1608_v17  }
  0x37   :  { %1631 = vperm.xlu1 %4584, %v1601_v18  }
  0x38   :  { %26 = vsyncpa [#allocation5], 0  ;;  %v1603_v20 = vld [vmem:[%s7066_s7 + $0x28] sm:$0xff]  ;;  %v1612_v21 = vld [vmem:[%s7066_s7 + $0x70] sm:$0xff]  ;;  %v90_v53 = vlaneseq  ;;  %s7152_s22 = sld [smem:[#allocation35_spill]]  ;;  %s7162_s1 = sld [smem:[#allocation34_spill]] }
  0x39   :  { %v1605_v22 = vld [vmem:[%s7066_s7 + $0x38] sm:$0xff]  ;;  %v2070_v23 = vld [vmem:[%s7068_s9] sm:$0xff]  ;;  %v1607_v24 = vld [vmem:[%s7066_s7 + $0x48] sm:$0xff]  ;;  %s7231_s4 = sld [smem:[#allocation37_spill]]  ;;  %s7233_s20 = sld [smem:[#allocation36_spill]] }
  0x3a   :  { %1676 = vperm.xlu0 %4585, %v1610_v19   ;;  %v2072_v25 = vld [vmem:[%s7068_s9 + $0x10] sm:$0xff]  ;;  %v1609_v26 = vld [vmem:[%s7066_s7 + $0x58] sm:$0xff]  ;;  %v2074_v27 = vld [vmem:[%s7068_s9 + $0x20] sm:$0xff]  ;;  %v5009_v56 = vshrl.u32 %v90_v53, 7 }
  0x3b   :  { %1641 = vperm.xlu1 %4584, %v1603_v20   ;;  %v1611_v28 = vld [vmem:[%s7066_s7 + $0x68] sm:$0xff]  ;;  %v2076_v29 = vld [vmem:[%s7068_s9 + $0x30] sm:$0xff]  ;;  %v1613_v30 = vld [vmem:[%s7066_s7 + $0x78] sm:$0xff] }
  0x3c   :  { %v2078_v31 = vld [vmem:[%s7068_s9 + $0x40] sm:$0xff]  ;;  %v2071_v32 = vld [vmem:[%s7068_s9 + $0x8] sm:$0xff]  ;;  %v2080_v33 = vld [vmem:[%s7068_s9 + $0x50] sm:$0xff]  ;;  %7148 = vst [vmem:[#allocation8_spill] sm:$0xff] %v5009_v56  ;;  %v5018_v59 = vsub.s32 1, %v5009_v56  ;;  %v5021_v60 = vsub.s32 2, %v5009_v56 }
  0x3d   :  { %v2073_v34 = vld [vmem:[%s7068_s9 + $0x18] sm:$0xff]  ;;  %v2082_v35 = vld [vmem:[%s7068_s9 + $0x60] sm:$0xff]  ;;  %v2075_v36 = vld [vmem:[%s7068_s9 + $0x28] sm:$0xff]  ;;  %v5024_v61 = vsub.s32 0, %v5009_v56  ;;  %v7083_v17 = vsub.s32 5, %v5009_v56  ;;  %v7082_v20 = vsub.s32 4, %v5009_v56 }
  0x3e   :  { %1686 = vperm.xlu0 %4585, %v1612_v21   ;;  %v2084_v37 = vld [vmem:[%s7068_s9 + $0x70] sm:$0xff]  ;;  %v2077_v38 = vld [vmem:[%s7068_s9 + $0x38] sm:$0xff]  ;;  %v2512_v39 = vld [vmem:[%s7070_s11] sm:$0xff]  ;;  %7149 = vst [vmem:[#allocation9_spill] sm:$0xff] %v5018_v59 }
  0x3f   :  { %1651 = vperm.xlu1 %4584, %v1605_v22   ;;  %v2079_v40 = vld [vmem:[%s7068_s9 + $0x48] sm:$0xff]  ;;  %v2514_v41 = vld [vmem:[%s7070_s11 + $0x10] sm:$0xff]  ;;  %v2081_v42 = vld [vmem:[%s7068_s9 + $0x58] sm:$0xff]  ;;  %7150 = vst [vmem:[#allocation10_spill] sm:$0xff] %v5021_v60 }
  0x40   :  { %v2516_v43 = vld [vmem:[%s7070_s11 + $0x20] sm:$0xff]  ;;  %v2083_v44 = vld [vmem:[%s7068_s9 + $0x68] sm:$0xff]  ;;  %v2518_v45 = vld [vmem:[%s7070_s11 + $0x30] sm:$0xff]  ;;  %7151 = vst [vmem:[#allocation11_spill] sm:$0xff] %v5024_v61 }
  0x41   :  { %v2085_v46 = vld [vmem:[%s7068_s9 + $0x78] sm:$0xff]  ;;  %v2520_v47 = vld [vmem:[%s7070_s11 + $0x40] sm:$0xff]  ;;  %v2513_v48 = vld [vmem:[%s7070_s11 + $0x8] sm:$0xff] }
  0x42   :  { %2088 = vperm.xlu0 %4585, %v2070_v23   ;;  %v2522_v49 = vld [vmem:[%s7070_s11 + $0x50] sm:$0xff]  ;;  %v2515_v50 = vld [vmem:[%s7070_s11 + $0x18] sm:$0xff]  ;;  %v2524_v51 = vld [vmem:[%s7070_s11 + $0x60] sm:$0xff] }
  0x43   :  { %1661 = vperm.xlu1 %4584, %v1607_v24   ;;  %v2517_v52 = vld [vmem:[%s7070_s11 + $0x28] sm:$0xff]  ;;  %v2526_v54 = vld [vmem:[%s7070_s11 + $0x70] sm:$0xff]  ;;  %v2519_v55 = vld [vmem:[%s7070_s11 + $0x38] sm:$0xff] }
  0x44   :  { %v3502_v57 = vld [vmem:[%s7073_s14] sm:$0xff]  ;;  %v2521_v58 = vld [vmem:[%s7070_s11 + $0x48] sm:$0xff]  ;;  %v3504_v63 = vld [vmem:[%s7073_s14 + $0x10] sm:$0xff] }
  0x45   :  { %v62_v62 = vld [vmem:[%s7152_s22] sm:$0x77]  ;;  %v2523_v5 = vld [vmem:[%s7070_s11 + $0x58] sm:$0xff]  ;;  %v63_v7 = vld [vmem:[%s7152_s22 + $0x8] sm:$0x7] }
  0x46   :  { %2098 = vperm.xlu0 %4585, %v2072_v25   ;;  %v148_v0 = vrot.slane %v62_v62, %v5018_v59  ;;  %v215_v3 = vrot.slane %v62_v62, %v5021_v60  ;;  %v93_v6 = vrot.slane %v62_v62, %v5024_v61  ;;  %v101_v10 = vrot.slane %v63_v7, %v5024_v61  ;;  %v3506_v11 = vld [vmem:[%s7073_s14 + $0x20] sm:$0xff]  ;;  %v2525_v16 = vld [vmem:[%s7070_s11 + $0x68] sm:$0xff]  ;;  %v3508_v23 = vld [vmem:[%s7073_s14 + $0x30] sm:$0xff] }
  0x47   :  { %1671 = vperm.xlu1 %4584, %v1609_v26   ;;  %v156_v12 = vrot.slane %v63_v7, %v5018_v59  ;;  %v223_v18 = vrot.slane %v63_v7, %v5021_v60 }
  0x48   :  { %v5051_v13 = vrot.slane %v148_v0, %v5018_v59  ;;  %v5054_v14 = vrot.slane %v215_v3, %v5021_v60  ;;  %v5057_v15 = vrot.slane %v93_v6, %v5024_v61  ;;  %v5068_v21 = vrot.slane %v101_v10, %v5024_v61  ;;  %v3514_v10 = vld [vmem:[%s7073_s14 + $0x60] sm:$0xff] }
  0x49   :  { %v5076_v24 = vrot.slane %v156_v12, %v5018_v59 }
  0x4a   :  { %2108 = vperm.xlu0 %4585, %v2074_v27   ;;  %7153 = vst [vmem:[#allocation12_spill] sm:$0xff] %v5051_v13  ;;  %7154 = vst [vmem:[#allocation13_spill] sm:$0xff] %v5054_v14 }
  0x4b   :  { %1681 = vperm.xlu1 %4584, %v1611_v28   ;;  %7155 = vst [vmem:[#allocation14_spill] sm:$0xff] %v5057_v15  ;;  %v2527_v28 = vld [vmem:[%s7070_s11 + $0x78] sm:$0xff] }
  0x4e   :  { %2118 = vperm.xlu0 %4585, %v2076_v29   ;;  %v152_v29 = vrot.slane %v62_v62, %v7083_v17 }
  0x4f   :  { %1691 = vperm.xlu1 %4584, %v1613_v30   ;;  %v5090_v30 = vrot.slane %v223_v18, %v5021_v60  ;;  %v3507_v18 = vld [vmem:[%s7073_s14 + $0x28] sm:$0xff] }
  0x51   :  { %7156 = vst [vmem:[#allocation15_spill] sm:$0xff] %v5090_v30 }
  0x52   :  { %2128 = vperm.xlu0 %4585, %v2078_v31   ;;  %v97_v31 = vrot.slane %v62_v62, %v7082_v20 }
  0x53   :  { %2093 = vperm.xlu1 %4584, %v2071_v32  }
  0x56   :  { %2138 = vperm.xlu0 %4585, %v2080_v33  }
  0x57   :  { %2103 = vperm.xlu1 %4584, %v2073_v34  }
  0x5a   :  { %2148 = vperm.xlu0 %4585, %v2082_v35   ;;  %v7081_v35 = vsub.s32 6, %v5009_v56 }
  0x5b   :  { %2113 = vperm.xlu1 %4584, %v2075_v36  }
  0x5e   :  { %2158 = vperm.xlu0 %4585, %v2084_v37   ;;  %v3510_v37 = vld [vmem:[%s7073_s14 + $0x40] sm:$0xff] }
  0x5f   :  { %2123 = vperm.xlu1 %4584, %v2077_v38  }
  0x62   :  { %2530 = vperm.xlu0 %4585, %v2512_v39  }
  0x63   :  { %2133 = vperm.xlu1 %4584, %v2079_v40  }
  0x66   :  { %2540 = vperm.xlu0 %4585, %v2514_v41   ;;  %v3503_v41 = vld [vmem:[%s7073_s14 + $0x8] sm:$0xff] }
  0x67   :  { %2143 = vperm.xlu1 %4584, %v2081_v42  }
  0x6a   :  { %2550 = vperm.xlu0 %4585, %v2516_v43   ;;  %v5114_v43 = vrot.slane %v152_v29, %v5018_v59 }
  0x6b   :  { %2153 = vperm.xlu1 %4584, %v2083_v44  }
  0x6c   :  { %7157 = vst [vmem:[#allocation16_spill] sm:$0xff] %v5114_v43 }
  0x6e   :  { %2560 = vperm.xlu0 %4585, %v2518_v45   ;;  %v5119_v45 = vrot.slane %v97_v31, %v5024_v61  ;;  %v3509_v31 = vld [vmem:[%s7073_s14 + $0x38] sm:$0xff] }
  0x6f   :  { %2163 = vperm.xlu1 %4584, %v2085_v46  }
  0x70   :  { %7158 = vst [vmem:[#allocation17_spill] sm:$0xff] %v5119_v45 }
  0x72   :  { %2570 = vperm.xlu0 %4585, %v2520_v47  }
  0x73   :  { %2535 = vperm.xlu1 %4584, %v2513_v48   ;;  %v219_v48 = vrot.slane %v62_v62, %v7081_v35 }
  0x76   :  { %2580 = vperm.xlu0 %4585, %v2522_v49  }
  0x77   :  { %2545 = vperm.xlu1 %4584, %v2515_v50  }
  0x7a   :  { %2590 = vperm.xlu0 %4585, %v2524_v51  }
  0x7b   :  { %2555 = vperm.xlu1 %4584, %v2517_v52   ;;  %v3512_v52 = vld [vmem:[%s7073_s14 + $0x50] sm:$0xff] }
  0x7e   :  { %2600 = vperm.xlu0 %4585, %v2526_v54  }
  0x7f   :  { %2565 = vperm.xlu1 %4584, %v2519_v55  }
  0x82   :  { %3520 = vperm.xlu0 %4585, %v3502_v57  }
  0x83   :  { %2575 = vperm.xlu1 %4584, %v2521_v58   ;;  %v3505_v58 = vld [vmem:[%s7073_s14 + $0x18] sm:$0xff] }
  0x86   :  { %v5041_v8 = vpop.permute.xlu1 %130  ;;  %v5043_v9 = vpop.permute.xlu0 %197  ;;  %3530 = vperm.xlu0 %4585, %v3504_v63  }
  0x87   :  { %2585 = vperm.xlu1 %4584, %v2523_v5   ;;  %v172_v25 = vmul.f32 %v5051_v13, %v5041_v8  ;;  %v239_v26 = vmul.f32 %v5054_v14, %v5043_v9  ;;  %v174_v38 = vmul.f32 %v5076_v24, %v5041_v8  ;;  %v241_v44 = vmul.f32 %v5090_v30, %v5043_v9 }
  0x88   :  { %v5144_v5 = vrot.slane %v219_v48, %v5021_v60  ;;  %v7178_v60 = vmov 683565275  }
  0x8a   :  { %v5064_v19 = vpop.permute.xlu1 %134  ;;  %3540 = vperm.xlu0 %4585, %v3506_v11   ;;  %7159 = vst [vmem:[#allocation18_spill] sm:$0xff] %v5144_v5 }
  0x8b   :  { %v5070_v22 = vpop.permute.xlu0 %70  ;;  %2595 = vperm.xlu1 %4584, %v2525_v16   ;;  %v175_v39 = vmul.f32 %v5051_v13, %v5064_v19  ;;  %v177_v48 = vmul.f32 %v5076_v24, %v5064_v19 }
  0x8c   :  { %v117_v27 = vmul.f32 %v5057_v15, %v5070_v22  ;;  %v119_v32 = vmul.f32 %v5068_v21, %v5070_v22 }
  0x8e   :  { %v184_v33 = vadd.f32 %v172_v25, %v117_v27  ;;  %v5096_v34 = vpop.permute.xlu1 %138  ;;  %3550 = vperm.xlu0 %4585, %v3508_v23   ;;  %v186_v46 = vadd.f32 %v174_v38, %v119_v32  ;;  %v3720_v38 = vld [vmem:[%s7075_s16] sm:$0xff] }
  0x8f   :  { %v5099_v36 = vpop.permute.xlu0 %75  ;;  %2605 = vperm.xlu1 %4584, %v2527_v28   ;;  %v178_v49 = vmul.f32 %v5051_v13, %v5096_v34  ;;  %v179_v53 = vmul.f32 %v5114_v43, %v5096_v34  ;;  %v3516_v28 = vld [vmem:[%s7073_s14 + $0x70] sm:$0xff] }
  0x90   :  { %v120_v40 = vmul.f32 %v5057_v15, %v5099_v36  ;;  %v251_v42 = vadd.f32 %v239_v26, %v184_v33  ;;  %v253_v0 = vadd.f32 %v241_v44, %v186_v46  ;;  %v122_v46 = vmul.f32 %v5068_v21, %v5099_v36 }
  0x92   :  { %v187_v47 = vadd.f32 %v175_v39, %v120_v40  ;;  %3560 = vperm.xlu0 %4585, %v3510_v37   ;;  %v3511_v39 = vld [vmem:[%s7073_s14 + $0x48] sm:$0xff] }
  0x93   :  { %v5125_v50 = vpop.permute.xlu0 %80  ;;  %3525 = vperm.xlu1 %4584, %v3503_v41   ;;  %v5127_v51 = vpop.permute.xlu1 %201  ;;  %v3513_v41 = vld [vmem:[%s7073_s14 + $0x58] sm:$0xff] }
  0x94   :  { %v123_v54 = vmul.f32 %v5057_v15, %v5125_v50  ;;  %v124_v55 = vmul.f32 %v5119_v45, %v5125_v50  ;;  %v242_v57 = vmul.f32 %v5054_v14, %v5127_v51 }
  0x96   :  { %v190_v62 = vadd.f32 %v178_v49, %v123_v54  ;;  %v191_v63 = vadd.f32 %v179_v53, %v124_v55  ;;  %v254_v3 = vadd.f32 %v242_v57, %v187_v47  ;;  %3570 = vperm.xlu0 %4585, %v3512_v52   ;;  %v244_v49 = vmul.f32 %v5090_v30, %v5127_v51  ;;  %v3515_v53 = vld [vmem:[%s7073_s14 + $0x68] sm:$0xff] }
  0x97   :  { %v5146_v6 = vpop.permute.xlu0 %269  ;;  %3535 = vperm.xlu1 %4584, %v3505_v58   ;;  %v5148_v7 = vpop.permute.xlu1 %205  ;;  %v189_v54 = vadd.f32 %v177_v48, %v122_v46  ;;  %v7099_v58 = vmov 683565275   ;;  %v7088_v48 = vmov 1326507024  }
  0x98   :  { %v5154_v11 = vadd.f32 %v5146_v6, %v251_v42  ;;  %v5157_v12 = vadd.f32 %v5146_v6, %v253_v0  ;;  %v245_v16 = vmul.f32 %v5054_v14, %v5148_v7  ;;  %v246_v23 = vmul.f32 %v5144_v5, %v5148_v7  ;;  %v5194_v42 = vld [vmem:[%s7162_s1] sm:$0x3] }
  0x9a   :  { %7160 = vst [vmem:[#allocation19_spill] sm:$0xff] %v5154_v11  ;;  %3580 = vperm.xlu0 %4585, %v3514_v10   ;;  %v519_v25 = vand.u32 2139095040, %v5157_v12  ;;  %v5167_v26 = vadd.f32 %v245_v16, %v190_v62  ;;  %v5169_v27 = vadd.f32 %v246_v23, %v191_v63  ;;  %v7084_v47 = vand.u32 2147483647, %v5157_v12  ;;  %v3517_v10 = vld [vmem:[%s7073_s14 + $0x78] sm:$0xff] }
  0x9b   :  { %3545 = vperm.xlu1 %4584, %v3507_v18   ;;  %v7095_v63 = vmov 2475754826   ;;  %v7093_v18 = vmov 2131351028  }
  0x9c   :  { %v5174_v29 = vpop.permute.xlu1 %274  ;;  %v520_v32 = vshrl.u32 %v519_v25, 23  ;;  %v523_v55 = vand.u32 8388607, %v7084_v47 }
  0x9d   :  { %v5180_v33 = vadd.f32 %v5174_v29, %v254_v3  ;;  %v256_v3 = vadd.f32 %v244_v49, %v189_v54 }
  0x9e   :  { %3590 = vperm.xlu0 %4585, %v3516_v28   ;;  %v4126_v37 = vadd.s32 4294967169, %v520_v32  ;;  %v7097_v28 = vmov 2102212464   ;;  %v524_v32 = vor.u32 8388608, %v523_v55 }
  0x9f   :  { %7161 = vst [vmem:[#allocation20_spill] sm:$0xff] %v5180_v33  ;;  %3555 = vperm.xlu1 %4584, %v3509_v31  }
  0xa0   :  { %v526_v40 = vadd.s32 1, %v4126_v37 }
  0xa2   :  { %3724 = vperm.xlu0 %4585, %v3720_v38   ;;  %vm527_vm0 = vcmp.gt.s32.totalorder %v526_v40, 0 }
  0xa3   :  { %3565 = vperm.xlu1 %4584, %v3511_v39   ;;  %v528_v44 = vsel %vm527_vm0, %v526_v40, 0  ;;  %v7090_v39 = vmov 920167782  }
  0xa4   :  { %v530_v52 = vand.u32 31, %v528_v44 }
  0xa6   :  { %4586 = vset.pattern.permute.xlu0 %v4728_v2  ;;  %v531_v57 = vsub.s32 32, %v530_v52  ;;  %v529_v2 = vshrl.u32 %v528_v44, 5  ;;  %v533_v62 = vshll.u32 %v7099_v58, %v530_v52  ;;  %v536_v16 = vshll.u32 %v7095_v63, %v530_v52 }
  0xa7   :  { %3575 = vperm.xlu1 %4584, %v3513_v41   ;;  %3947 = vperm.xlu0 %4586, %v5194_v42   ;;  %v539_v25 = vshll.u32 %v7093_v18, %v530_v52  ;;  %v542_v38 = vshll.u32 %v7097_v28, %v530_v52  ;;  %v545_v46 = vshll.u32 %v7090_v39, %v530_v52 }
  0xa8   :  { %v534_v0 = vshrl.u32 %v7095_v63, %v531_v57  ;;  %v537_v23 = vshrl.u32 %v7093_v18, %v531_v57  ;;  %v540_v31 = vshrl.u32 %v7097_v28, %v531_v57  ;;  %v543_v40 = vshrl.u32 %v7090_v39, %v531_v57 }
  0xa9   :  { %v546_v49 = vshrl.u32 %v7088_v48, %v531_v57  ;;  %vm548_vm1 = vcmp.lt.s32.totalorder %v529_v2, 1  ;;  %vm551_vm2 = vcmp.lt.s32.totalorder %v529_v2, 4  ;;  %vm550_vm3 = vcmp.lt.s32.totalorder %v529_v2, 3 }
  0xaa   :  { %v535_v37 = vor.u32 %v534_v0, %v533_v62  ;;  %v538_v41 = vor.u32 %v537_v23, %v536_v16  ;;  %v541_v44 = vor.u32 %v540_v31, %v539_v25  ;;  %v5225_v62 = vadd.f32 %v5174_v29, %v256_v3 }
  0xab   :  { %3585 = vperm.xlu1 %4584, %v3515_v53   ;;  %4589 = vset.pattern.permute.xlu0 %v4727_v1  ;;  %v544_v53 = vor.u32 %v543_v40, %v542_v38  ;;  %v547_v54 = vor.u32 %v546_v49, %v545_v46  ;;  %v532_v0 = vshrl.u32 %v7099_v58, %v531_v57  ;;  %vm549_vm4 = vcmp.lt.s32.totalorder %v529_v2, 2 }
  0xac   :  { %v553_v35 = vsel %vm551_vm2, %v541_v44, 2102212464  ;;  %v556_v55 = vsel %vm548_vm1, %v535_v37, %v538_v41  ;;  %v560_v23 = vsel %vm548_vm1, %v538_v41, %v541_v44  ;;  %v564_v31 = vshll.u32 %v524_v32, 8 }
  0xad   :  { %v557_v16 = vsel %vm551_vm2, %v544_v53, 920167782  ;;  %v561_v25 = vsel %vm551_vm2, %v547_v54, 1326507024  ;;  %v554_v38 = vsel %vm550_vm3, %v538_v41, %v553_v35  ;;  %v831_v57 = vand.u32 2139095040, %v5225_v62 }
  0xae   :  { %v558_v52 = vsel %vm550_vm3, %v541_v44, %v557_v16  ;;  %v562_v46 = vsel %vm550_vm3, %v544_v53, %v561_v25  ;;  %v118_v2 = vmul.f32 %v5119_v45, %v5070_v22  ;;  %v173_v35 = vmul.f32 %v5114_v43, %v5041_v8 }
  0xaf   :  { %3595 = vperm.xlu1 %4584, %v3517_v10   ;;  %v552_v10 = vsel %vm548_vm1, %v532_v0, %v535_v37  ;;  %v559_v40 = vsel %vm549_vm4, %v556_v55, %v558_v52  ;;  %v563_v49 = vsel %vm549_vm4, %v560_v23, %v562_v46  ;;  %v832_v41 = vshrl.u32 %v831_v57, 23  ;;  %v5251_v0 = vpop.permute.xlu1 %279 }
  0xb0   :  { %v5229_v20 = vmul.u32.u64.low %v564_v31, %v559_v40  ;;  %v5230_v17 = vmul.u32.u64.high %v564_v31, %v559_v40, %v5229_v20  ;;  %v5234_v3 = vmul.u32.u64.low %v564_v31, %v563_v49  ;;  %v5235_v47 = vmul.u32.u64.high %v564_v31, %v563_v49, %v5234_v3 }
  0xb1   :  { %v555_v32 = vsel %vm549_vm4, %v552_v10, %v554_v38  ;;  %v240_v53 = vmul.f32 %v5144_v5, %v5043_v9  ;;  %v185_v54 = vadd.f32 %v173_v35, %v118_v2  ;;  %v121_v16 = vmul.f32 %v5119_v45, %v5099_v36 }
  0xb2   :  { %v574_v37 = vadd.s32 1, %v5230_v17  ;;  %v571_v44 = vmul.u32 %v564_v31, %v555_v32  ;;  %vm573_vm5 = vc.u32 %v5235_v47, %v5229_v20  ;;  %v176_v9 = vmul.f32 %v5114_v43, %v5064_v19 }
  0xb3   :  { %3911 = vperm.xlu1 %4584, %v5194_v42   ;;  %v252_v23 = vadd.f32 %v240_v53, %v185_v54  ;;  %v5268_v36 = vadd.f32 %v5251_v0, %v5167_v26  ;;  %v180_v38 = vmul.f32 %v5076_v24, %v5096_v34  ;;  %v311_v57 = vand.u32 2139095040, %v5154_v11 }
  0xb4   :  { %v575_v22 = vsel %vm573_vm5, %v574_v37, %v5230_v17  ;;  %v125_v17 = vmul.f32 %v5068_v21, %v5125_v50  ;;  %v188_v50 = vadd.f32 %v176_v9, %v121_v16  ;;  %v247_v3 = vmul.f32 %v5090_v30, %v5148_v7 }
  0xb5   :  { %v576_v55 = vadd.s32 %v575_v22, %v571_v44  ;;  %v5262_v31 = vadd.f32 %v5146_v6, %v252_v23  ;;  %7164 = vst [vmem:[#allocation22_spill] sm:$0xff] %v5268_v36  ;;  %v243_v6 = vmul.f32 %v5144_v5, %v5127_v51  ;;  %v935_v34 = vand.u32 2139095040, %v5268_v36 }
  0xb6   :  { %v192_v49 = vadd.f32 %v180_v38, %v125_v17 }
  0xb7   :  { %4587 = vset.pattern.permute.xlu1 %v4727_v1  ;;  %v7087_v1 = vand.u32 2147483647, %v5225_v62  ;;  %v577_v8 = vadd.s32 536870912, %v576_v55  ;;  %v415_v26 = vand.u32 2139095040, %v5262_v31  ;;  %v936_v9 = vshrl.u32 %v935_v34, 23 }
  0xb8   :  { %3984 = vperm.xlu1 %4587, %v5194_v42   ;;  %v4138_v42 = vadd.s32 4294967169, %v832_v41  ;;  %v312_v34 = vshrl.u32 %v311_v57, 23 }
  0xb9   :  { %v5259_v25 = vshrl.u32 %v577_v8, 30  ;;  %v835_v10 = vand.u32 8388607, %v7087_v1 }
  0xba   :  { %v838_v52 = vadd.s32 1, %v4138_v42 }
  0xbb   :  { %7163 = vst [vmem:[#allocation21_spill] sm:$0xff] %v5259_v25  ;;  %v579_v19 = vshll.u32 %v5259_v25, 30  ;;  %v836_v2 = vor.u32 8388608, %v835_v10 }
  0xbc   :  { %4588 = vset.pattern.permute.xlu1 %v7085_v4  ;;  %vm839_vm6 = vcmp.gt.s32.totalorder %v838_v52, 0 }
  0xbd   :  { %v840_v40 = vsel %vm839_vm6, %v838_v52, 0  ;;  %v5280_v35 = vsub.s32 %v576_v55, %v579_v19  ;;  %v876_v38 = vshll.u32 %v836_v2, 8 }
  0xbe   :  { %v842_v46 = vand.u32 31, %v840_v40  ;;  %v841_v37 = vshrl.u32 %v840_v40, 5 }
  0xbf   :  { %v582_v19 = vsub.s32 0, %v5280_v35 }
  0xc0   :  { %v843_v32 = vsub.s32 32, %v842_v46  ;;  %v845_v41 = vshll.u32 %v7099_v58, %v842_v46  ;;  %v848_v44 = vshll.u32 %v7095_v63, %v842_v46  ;;  %v851_v54 = vshll.u32 %v7093_v18, %v842_v46 }
  0xc1   :  { %v854_v22 = vshll.u32 %v7097_v28, %v842_v46  ;;  %v857_v55 = vshll.u32 %v7090_v39, %v842_v46  ;;  %vm860_vm7 = vcmp.lt.s32.totalorder %v841_v37, 1  ;;  %vm863_vm8 = vcmp.lt.s32.totalorder %v841_v37, 4 }
  0xc2   :  { %v846_v51 = vshrl.u32 %v7095_v63, %v843_v32  ;;  %v849_v53 = vshrl.u32 %v7093_v18, %v843_v32  ;;  %v852_v7 = vshrl.u32 %v7097_v28, %v843_v32  ;;  %v855_v42 = vshrl.u32 %v7090_v39, %v843_v32 }
  0xc3   :  { %v858_v8 = vshrl.u32 %v7088_v48, %v843_v32  ;;  %vm861_vm9 = vcmp.lt.s32.totalorder %v841_v37, 2  ;;  %vm862_vm10 = vcmp.lt.s32.totalorder %v841_v37, 3  ;;  %v4127_v57 = vmin.u32 %v582_v19, %v5280_v35 }
  0xc4   :  { %v847_v16 = vor.u32 %v846_v51, %v845_v41  ;;  %v850_v23 = vor.u32 %v849_v53, %v848_v44  ;;  %v853_v52 = vor.u32 %v852_v7, %v851_v54  ;;  %v856_v17 = vor.u32 %v855_v42, %v854_v22 }
  0xc5   :  { %v859_v10 = vor.u32 %v858_v8, %v857_v55  ;;  %v4142_v51 = vadd.s32 4294967169, %v936_v9  ;;  %v844_v53 = vshrl.u32 %v7099_v58, %v843_v32  ;;  %v416_v7 = vshrl.u32 %v415_v26, 23 }
  0xc6   :  { %v868_v40 = vsel %vm860_vm7, %v847_v16, %v850_v23  ;;  %v872_v4 = vsel %vm860_vm7, %v850_v23, %v853_v52  ;;  %v869_v46 = vsel %vm863_vm8, %v856_v17, 920167782  ;;  %v865_v48 = vsel %vm863_vm8, %v853_v52, 2102212464 }
  0xc7   :  { %v873_v1 = vsel %vm863_vm8, %v859_v10, 1326507024  ;;  %v870_v41 = vsel %vm862_vm10, %v853_v52, %v869_v46  ;;  %v942_v55 = vadd.s32 1, %v4142_v51  ;;  %v864_v8 = vsel %vm860_vm7, %v844_v53, %v847_v16 }
  0xc8   :  { %v874_v44 = vsel %vm862_vm10, %v856_v17, %v873_v1  ;;  %v871_v2 = vsel %vm861_vm9, %v868_v40, %v870_v41  ;;  %v866_v39 = vsel %vm862_vm10, %v850_v23, %v865_v48  ;;  %v5304_v52 = vadd.f32 %v5251_v0, %v5169_v27 }
  0xc9   :  { %v875_v54 = vsel %vm861_vm9, %v872_v4, %v874_v44  ;;  %v7092_v1 = vand.u32 2147483647, %v5268_v36  ;;  %v5308_v32 = vmul.u32.u64.low %v876_v38, %v871_v2  ;;  %v5309_v9 = vmul.u32.u64.high %v876_v38, %v871_v2, %v5308_v32 }
  0xca   :  { %v5298_v22 = vmul.u32.u64.low %v876_v38, %v875_v54  ;;  %v5299_v42 = vmul.u32.u64.high %v876_v38, %v875_v54, %v5298_v22  ;;  %7165 = vst [vmem:[#allocation23_spill] sm:$0xff] %v5304_v52  ;;  %vm943_vm11 = vcmp.gt.s32.totalorder %v942_v55, 0  ;;  %v255_v4 = vadd.f32 %v243_v6, %v188_v50 }
  0xcb   :  { %v944_v26 = vsel %vm943_vm11, %v942_v55, 0  ;;  %v4118_v17 = vadd.s32 4294967169, %v312_v34  ;;  %v867_v10 = vsel %vm861_vm9, %v864_v8, %v866_v39  ;;  %v5313_v16 = vadd.f32 %v247_v3, %v192_v49 }
  0xcc   :  { %v946_v48 = vand.u32 31, %v944_v26  ;;  %v4122_v23 = vadd.s32 4294967169, %v416_v7  ;;  %v5316_v27 = vadd.f32 %v5174_v29, %v255_v4  ;;  %vm885_vm12 = vc.u32 %v5299_v42, %v5308_v32 }
  0xcd   :  { %v939_v19 = vand.u32 8388607, %v7092_v1  ;;  %v584_v40 = vclz %v4127_v57  ;;  %v886_v50 = vadd.s32 1, %v5309_v9  ;;  %v1039_v37 = vand.u32 2139095040, %v5304_v52 }
  0xce   :  { %7166 = vst [vmem:[#allocation24_spill] sm:$0xff] %v5316_v27  ;;  %v947_v6 = vsub.s32 32, %v946_v48  ;;  %v883_v39 = vmul.u32 %v876_v38, %v867_v10  ;;  %v5324_v49 = vshrl.u32 %v944_v26, 5  ;;  %v949_v3 = vshll.u32 %v7099_v58, %v946_v48 }
  0xcf   :  { %v952_v29 = vshll.u32 %v7095_v63, %v946_v48  ;;  %v887_v46 = vsel %vm885_vm12, %v886_v50, %v5309_v9  ;;  %v955_v51 = vshll.u32 %v7093_v18, %v946_v48  ;;  %v958_v2 = vshll.u32 %v7097_v28, %v946_v48 }
  0xd0   :  { %v950_v41 = vshrl.u32 %v7095_v63, %v947_v6  ;;  %v953_v44 = vshrl.u32 %v7093_v18, %v947_v6  ;;  %v888_v34 = vadd.s32 %v887_v46, %v883_v39  ;;  %v956_v53 = vshrl.u32 %v7097_v28, %v947_v6 }
  0xd1   :  { %v7167_v38 = vmov 920167782   ;;  %v7168_v8 = vmov 1326507024   ;;  %v1040_v10 = vshrl.u32 %v1039_v37, 23  ;;  %v318_v50 = vadd.s32 1, %v4118_v17 }
  0xd2   :  { %v959_v54 = vshrl.u32 %v7167_v38, %v947_v6  ;;  %v951_v7 = vor.u32 %v950_v41, %v949_v3  ;;  %v954_v22 = vor.u32 %v953_v44, %v952_v29  ;;  %v961_v55 = vshll.u32 %v7167_v38, %v946_v48 }
  0xd3   :  { %v962_v57 = vshrl.u32 %v7168_v8, %v947_v6  ;;  %v889_v9 = vadd.s32 536870912, %v888_v34  ;;  %v957_v4 = vor.u32 %v956_v53, %v955_v51  ;;  %v422_v1 = vadd.s32 1, %v4122_v23 }
  0xd4   :  { %v960_v26 = vor.u32 %v959_v54, %v958_v2  ;;  %v940_v18 = vor.u32 8388608, %v939_v19  ;;  %v623_v46 = vand.u32 2139095040, %v5180_v33  ;;  %vm964_vm13 = vcmp.lt.s32.totalorder %v5324_v49, 1  ;;  %v5362_v2 = vpop.permute.xlu0 %85 }
  0xd5   :  { %v963_v39 = vor.u32 %v962_v57, %v961_v55  ;;  %v5338_v63 = vshrl.u32 %v889_v9, 30  ;;  %vm967_vm14 = vcmp.lt.s32.totalorder %v5324_v49, 4  ;;  %v4128_v3 = vadd.s32 4294967294, %v584_v40  ;;  %7170 = vst [vmem:[#allocation26_spill] sm:$0xff] %v5362_v2 }
  0xd6   :  { %vm966_vm15 = vcmp.lt.s32.totalorder %v5324_v49, 3  ;;  %v972_v48 = vsel %vm964_vm13, %v951_v7, %v954_v22  ;;  %v973_v17 = vsel %vm967_vm14, %v960_v26, 920167782  ;;  %vm965_vm0 = vcmp.lt.s32.totalorder %v5324_v49, 2 }
  0xd7   :  { %7169 = vst [vmem:[#allocation25_spill] sm:$0xff] %v5338_v63  ;;  %v974_v23 = vsel %vm966_vm15, %v957_v4, %v973_v17  ;;  %v976_v19 = vsel %vm964_vm13, %v954_v22, %v957_v4  ;;  %v4146_v37 = vadd.s32 4294967169, %v1040_v10  ;;  %v891_v29 = vshll.u32 %v5338_v63, 30 }
  0xd8   :  { %v975_v40 = vsel %vm965_vm0, %v972_v48, %v974_v23  ;;  %v977_v41 = vsel %vm967_vm14, %v963_v39, 1326507024  ;;  %v5357_v44 = vshll.u32 %v940_v18, 8  ;;  %vm319_vm1 = vcmp.gt.s32.totalorder %v318_v50, 0 }
  0xd9   :  { %vm423_vm2 = vcmp.gt.s32.totalorder %v422_v1, 0  ;;  %v727_v51 = vand.u32 2139095040, %v5316_v27  ;;  %v978_v53 = vsel %vm966_vm15, %v960_v26, %v977_v41  ;;  %v969_v54 = vsel %vm967_vm14, %v957_v4, 2102212464 }
  0xda   :  { %v979_v55 = vsel %vm965_vm0, %v976_v19, %v978_v53  ;;  %v5369_v57 = vmul.u32.u64.low %v5357_v44, %v975_v40  ;;  %v5370_v9 = vmul.u32.u64.high %v5357_v44, %v975_v40, %v5369_v57  ;;  %v948_v18 = vshrl.u32 %v7099_v58, %v947_v6 }
  0xdb   :  { %v5375_v10 = vmul.u32.u64.low %v5357_v44, %v979_v55  ;;  %v5376_v39 = vmul.u32.u64.high %v5357_v44, %v979_v55, %v5375_v10  ;;  %v1046_v26 = vadd.s32 1, %v4146_v37  ;;  %v320_v48 = vsel %vm319_vm1, %v318_v50, 0 }
  0xdc   :  { %7171 = vst [vmem:[#allocation27_spill] sm:$0xff] %v5369_v57  ;;  %vm4129_vm3 = vcmp.lt.s32.totalorder %v4128_v3, 0  ;;  %v5378_v17 = vsub.s32 %v888_v34, %v891_v29  ;;  %v5382_v4 = vadd.f32 %v5251_v0, %v5313_v16  ;;  %v5386_v23 = vmul.f32 %v5068_v21, %v5362_v2 }
  0xdd   :  { %v968_v6 = vsel %vm964_vm13, %v948_v18, %v951_v7  ;;  %v970_v19 = vsel %vm966_vm15, %v954_v22, %v969_v54  ;;  %vm1047_vm4 = vcmp.gt.s32.totalorder %v1046_v26, 0  ;;  %v424_v50 = vsel %vm423_vm2, %v422_v1, 0 }
  0xde   :  { %7172 = vst [vmem:[#allocation28_spill] sm:$0xff] %v5382_v4  ;;  %7173 = vst [vmem:[#allocation29_spill] sm:$0xff] %v5386_v23  ;;  %v624_v37 = vshrl.u32 %v623_v46, 23  ;;  %v728_v34 = vshrl.u32 %v727_v51, 23  ;;  %v1048_v29 = vsel %vm1047_vm4, %v1046_v26, 0  ;;  %v5393_v40 = vand.u32 31, %v320_v48 }
  0xdf   :  { %v5395_v0 = vsel %vm4129_vm3, 0, %v4128_v3  ;;  %v7105_v16 = vand.u32 2147483647, %v5304_v52  ;;  %v894_v41 = vsub.s32 0, %v5378_v17  ;;  %v971_v7 = vsel %vm965_vm0, %v968_v6, %v970_v19 }
  0xe0   :  { %7174 = vst [vmem:[#allocation30_spill] sm:$0xff] %v5393_v40  ;;  %v1050_v22 = vand.u32 31, %v1048_v29  ;;  %v1143_v53 = vand.u32 2139095040, %v5382_v4  ;;  %v5403_v1 = vshrl.u32 %v320_v48, 5  ;;  %v5405_v46 = vshrl.u32 %v424_v50, 5 }
  0xe1   :  { %v5407_v51 = vand.u32 31, %v424_v50  ;;  %v990_v3 = vadd.s32 1, %v5370_v9  ;;  %v4130_v54 = vadd.s32 4294967169, %v624_v37  ;;  %v4134_v55 = vadd.s32 4294967169, %v728_v34 }
  0xe2   :  { %vm989_vm5 = vc.u32 %v5376_v39, %v5369_v57  ;;  %v5412_v18 = vsub.s32 32, %v1050_v22  ;;  %v5415_v49 = vsub.s32 32, %v5393_v40  ;;  %v592_v10 = vsub.s32 4294967266, %v5395_v0 }
  0xe3   :  { %v987_v26 = vmul.u32 %v5357_v44, %v971_v7  ;;  %v1043_v48 = vand.u32 8388607, %v7105_v16  ;;  %v4139_v6 = vmin.u32 %v894_v41, %v5378_v17  ;;  %v7176_v19 = vmov 2475754826  }
  0xe4   :  { %7175 = vst [vmem:[#allocation31_spill] sm:$0xff] %v5415_v49  ;;  %v1054_v50 = vshrl.u32 %v7176_v19, %v5412_v18  ;;  %v7177_v37 = vmov 2131351028   ;;  %v1144_v21 = vshrl.u32 %v1143_v53, 23  ;;  %v991_v28 = vsel %vm989_vm5, %v990_v3, %v5370_v9 }
  0xe5   :  { %v1057_v34 = vshrl.u32 %v7177_v37, %v5412_v18  ;;  %v5427_v58 = vshrl.u32 %v1048_v29, 5  ;;  %v1053_v56 = vshll.u32 %v7178_v60, %v1050_v22  ;;  %v1056_v44 = vshll.u32 %v7176_v19, %v1050_v22 }
  0xe6   :  { %v1059_v7 = vshll.u32 %v7177_v37, %v1050_v22  ;;  %v7179_v16 = vmov 2102212464   ;;  %v1063_v61 = vshrl.u32 %v7167_v38, %v5412_v18  ;;  %v1065_v9 = vshll.u32 %v7167_v38, %v1050_v22 }
  0xe7   :  { %v1060_v41 = vshrl.u32 %v7179_v16, %v5412_v18  ;;  %v1062_v59 = vshll.u32 %v7179_v16, %v1050_v22  ;;  %v1055_v14 = vor.u32 %v1054_v50, %v1053_v56  ;;  %v1058_v53 = vor.u32 %v1057_v34, %v1056_v44 }
  0xe8   :  { %v1066_v29 = vshrl.u32 %v7168_v8, %v5412_v18  ;;  %v5442_v3 = vshll.u32 %v7179_v16, %v5393_v40  ;;  %v5444_v5 = vadd.s32 %v991_v28, %v987_v26  ;;  %v5448_v43 = vshll.u32 %v7167_v38, %v5393_v40 }
  0xe9   :  { %v1061_v45 = vor.u32 %v1060_v41, %v1059_v7  ;;  %v1064_v13 = vor.u32 %v1063_v61, %v1062_v59  ;;  %v630_v15 = vadd.s32 1, %v4130_v54  ;;  %vm1071_vm6 = vcmp.lt.s32.totalorder %v5427_v58, 4 }
  0xea   :  { %v1067_v56 = vor.u32 %v1066_v29, %v1065_v9  ;;  %v593_v22 = vadd.s32 127, %v592_v10  ;;  %v896_v50 = vclz %v4139_v6  ;;  %vm1068_vm7 = vcmp.lt.s32.totalorder %v5427_v58, 1 }
  0xeb   :  { %v1077_v34 = vsel %vm1071_vm6, %v1064_v13, 920167782  ;;  %v1044_v44 = vor.u32 8388608, %v1043_v48  ;;  %vm1070_vm8 = vcmp.lt.s32.totalorder %v5427_v58, 3  ;;  %v1076_v59 = vsel %vm1068_vm7, %v1055_v14, %v1058_v53 }
  0xec   :  { %v4150_v61 = vadd.s32 4294967169, %v1144_v21  ;;  %v993_v28 = vadd.s32 536870912, %v5444_v5  ;;  %v1078_v54 = vsel %vm1070_vm8, %v1061_v45, %v1077_v34  ;;  %v1080_v10 = vsel %vm1068_vm7, %v1058_v53, %v1061_v45 }
  0xed   :  { %v1081_v26 = vsel %vm1071_vm6, %v1067_v56, 1326507024  ;;  %v5465_v6 = vsub.s32 32, %v5407_v51  ;;  %v5469_v48 = vshll.u32 %v7179_v16, %v5407_v51  ;;  %vm1069_vm9 = vcmp.lt.s32.totalorder %v5427_v58, 2 }
  0xee   :  { %v1082_v21 = vsel %vm1070_vm8, %v1064_v13, %v1081_v26  ;;  %v734_v7 = vadd.s32 1, %v4134_v55  ;;  %v4140_v41 = vadd.s32 4294967294, %v896_v50  ;;  %v1079_v9 = vsel %vm1069_vm9, %v1076_v59, %v1078_v54 }
  0xef   :  { %v1083_v29 = vsel %vm1069_vm9, %v1080_v10, %v1082_v21  ;;  %v588_v56 = vsub.s32 32, %v5395_v0  ;;  %v594_v34 = vshll.u32 %v593_v22, 23  ;;  %vm631_vm10 = vcmp.gt.s32.totalorder %v630_v15, 0 }
  0xf0   :  { %v5479_v2 = vshll.u32 %v1044_v44, 8  ;;  %v5483_v36 = vshll.u32 %v7167_v38, %v5407_v51  ;;  %v572_v13 = vadd.s32 %v5229_v20, %v5235_v47  ;;  %v5487_v55 = vshrl.u32 %v993_v28, 30 }
  0xf1   :  { %v1150_v50 = vadd.s32 1, %v4150_v61  ;;  %v5500_v44 = vshrl.u32 %v7167_v38, %v5415_v49  ;;  %v5502_v26 = vsel %vm631_vm10, %v630_v15, 0  ;;  %vm4141_vm11 = vcmp.lt.s32.totalorder %v4140_v41, 0 }
  0xf2   :  { %7180 = vst [vmem:[#allocation32_spill] sm:$0xff] %v5487_v55  ;;  %v5490_v59 = vmul.u32.u64.low %v5479_v2, %v1083_v29  ;;  %v5491_v54 = vmul.u32.u64.high %v5479_v2, %v1083_v29, %v5490_v59  ;;  %v5494_v10 = vmul.u32.u64.low %v5479_v2, %v1079_v9  ;;  %v5495_v22 = vmul.u32.u64.high %v5479_v2, %v1079_v9, %v5494_v10 }
  0xf3   :  { %vm1151_vm12 = vcmp.gt.s32.totalorder %v1150_v50, 0  ;;  %v590_v20 = vshrl.u32 %v572_v13, %v588_v56  ;;  %v5504_v47 = vor.u32 4788187, %v594_v34  ;;  %vm735_vm13 = vcmp.gt.s32.totalorder %v734_v7, 0 }
  0xf4   :  { %v1073_v61 = vsel %vm1071_vm6, %v1061_v45, 2102212464  ;;  %v995_v28 = vshll.u32 %v5487_v55, 30  ;;  %v1052_v21 = vshrl.u32 %v7178_v60, %v5412_v18  ;;  %v1152_v29 = vsel %vm1151_vm12, %v1150_v50, 0 }
  0xf5   :  { %v5514_v15 = vshrl.u32 %v7168_v8, %v5415_v49  ;;  %v5518_v56 = vshrl.u32 %v7167_v38, %v5465_v6  ;;  %v589_v34 = vshll.u32 %v5280_v35, %v5395_v0  ;;  %v5522_v45 = vsel %vm4141_vm11, 0, %v4140_v41 }
  0xf6   :  { %v5526_v13 = vshrl.u32 %v7168_v8, %v5465_v6  ;;  %v1072_v18 = vsel %vm1068_vm7, %v1052_v21, %v1055_v14  ;;  %v1074_v50 = vsel %vm1070_vm8, %v1058_v53, %v1073_v61  ;;  %v1154_v59 = vand.u32 31, %v1152_v29 }
  0xf7   :  { %v5532_v9 = vor.u32 %v590_v20, %v589_v34  ;;  %v596_v55 = vand.u32 2147483647, %v5504_v47  ;;  %v5536_v52 = vand.u32 31, %v5502_v26  ;;  %v5539_v35 = vsel %vm735_vm13, %v734_v7, 0 }
  0xf8   :  { %v904_v0 = vsub.s32 4294967266, %v5522_v45  ;;  %v5543_v41 = vsub.s32 %v5444_v5, %v995_v28  ;;  %v7181_v14 = vand.u32 2147483647, %v5382_v4  ;;  %v1155_v53 = vsub.s32 32, %v1154_v59 }
  0xf9   :  { %v1075_v20 = vsel %vm1069_vm9, %v1072_v18, %v1074_v50  ;;  %vm1093_vm14 = vc.u32 %v5491_v54, %v5494_v10  ;;  %v1094_v47 = vadd.s32 1, %v5495_v22  ;;  %v1153_v61 = vshrl.u32 %v1152_v29, 5 }
  0xfa   :  { %v1147_v21 = vand.u32 8388607, %v7181_v14  ;;  %v1157_v7 = vshll.u32 %v7178_v60, %v1154_v59  ;;  %v1158_v34 = vshrl.u32 %v7176_v19, %v1155_v53  ;;  %v1160_v5 = vshll.u32 %v7176_v19, %v1154_v59 }
  0xfb   :  { %v1161_v28 = vshrl.u32 %v7177_v37, %v1155_v53  ;;  %v1163_v14 = vshll.u32 %v7177_v37, %v1154_v59  ;;  %v1164_v33 = vshrl.u32 %v7179_v16, %v1155_v53  ;;  %v1166_v58 = vshll.u32 %v7179_v16, %v1154_v59 }
  0xfc   :  { %v1167_v18 = vshrl.u32 %v7167_v38, %v1155_v53  ;;  %v900_v50 = vsub.s32 32, %v5522_v45  ;;  %v1148_v40 = vor.u32 8388608, %v1147_v21  ;;  %v1159_v29 = vor.u32 %v1158_v34, %v1157_v7 }
  0xfd   :  { %v1162_v49 = vor.u32 %v1161_v28, %v1160_v5  ;;  %v1165_v11 = vor.u32 %v1164_v33, %v1163_v14  ;;  %v1169_v25 = vshll.u32 %v7167_v38, %v1154_v59  ;;  %v1170_v30 = vshrl.u32 %v7168_v8, %v1155_v53 }
  0xfe   :  { %v1168_v63 = vor.u32 %v1167_v18, %v1166_v58  ;;  %v905_v4 = vadd.s32 127, %v904_v0  ;;  %v998_v27 = vsub.s32 0, %v5543_v41  ;;  %v1091_v23 = vmul.u32 %v5479_v2, %v1075_v20 }
  0xff   :  { %v1095_v57 = vsel %vm1093_vm14, %v1094_v47, %v5495_v22  ;;  %v1156_v21 = vshrl.u32 %v7178_v60, %v1155_v53  ;;  %v1171_v7 = vor.u32 %v1170_v30, %v1169_v25  ;;  %vm1172_vm15 = vcmp.lt.s32.totalorder %v1153_v61, 1 }
 0x100   :  { %vm1175_vm0 = vcmp.lt.s32.totalorder %v1153_v61, 4  ;;  %vm1174_vm1 = vcmp.lt.s32.totalorder %v1153_v61, 3  ;;  %v1180_v59 = vsel %vm1172_vm15, %v1159_v29, %v1162_v49  ;;  %vm343_vm2 = vcmp.lt.s32.totalorder %v5403_v1, 4 }
 0x101   :  { %v1177_v33 = vsel %vm1175_vm0, %v1165_v11, 2102212464  ;;  %v1181_v34 = vsel %vm1175_vm0, %v1168_v63, 920167782  ;;  %vm1173_vm3 = vcmp.lt.s32.totalorder %v1153_v61, 2  ;;  %v1184_v5 = vsel %vm1172_vm15, %v1162_v49, %v1165_v11 }
 0x102   :  { %v1182_v0 = vsel %vm1174_vm1, %v1165_v11, %v1181_v34  ;;  %v1188_v2 = vshll.u32 %v1148_v40, 8  ;;  %v5571_v20 = vadd.s32 %v1095_v57, %v1091_v23  ;;  %v1176_v28 = vsel %vm1172_vm15, %v1156_v21, %v1159_v29 }
 0x103   :  { %v1183_v22 = vsel %vm1173_vm3, %v1180_v59, %v1182_v0  ;;  %v1185_v47 = vsel %vm1175_vm0, %v1171_v7, 1326507024  ;;  %v1178_v53 = vsel %vm1174_vm1, %v1162_v49, %v1177_v33  ;;  %v598_v58 = vcvt.s32.f32 %v5532_v9 }
 0x104   :  { %v1186_v30 = vsel %vm1174_vm1, %v1168_v63, %v1185_v47  ;;  %v5574_v25 = vmul.u32.u64.low %v1188_v2, %v1183_v22  ;;  %v5575_v14 = vmul.u32.u64.high %v1188_v2, %v1183_v22, %v5574_v25  ;;  %v5580_v18 = vand.u32 31, %v5539_v35 }
 0x105   :  { %v4143_v11 = vmin.u32 %v998_v27, %v5543_v41  ;;  %v1187_v57 = vsel %vm1173_vm3, %v1184_v5, %v1186_v30  ;;  %vm518_vm4 = vcmp.lt.s32.totalorder %v5157_v12, 0  ;;  %v884_v23 = vadd.s32 %v5308_v32, %v5299_v42 }
 0x106   :  { %v906_v40 = vshll.u32 %v905_v4, 23  ;;  %v5587_v63 = vmul.u32.u64.low %v1188_v2, %v1187_v57  ;;  %v5588_v49 = vmul.u32.u64.high %v1188_v2, %v1187_v57, %v5587_v63  ;;  %v5592_v29 = vor.u32 %v5500_v44, %v5442_v3 }
 0x107   :  { %v599_v9 = vmul.f32 %v598_v58, %v596_v55  ;;  %v1097_v21 = vadd.s32 536870912, %v5571_v20  ;;  %v1179_v27 = vsel %vm1173_vm3, %v1176_v28, %v1178_v53  ;;  %v339_v7 = vor.u32 %v5514_v15, %v5448_v43 }
 0x108   :  { %v5599_v33 = vsub.s32 32, %v5536_v52  ;;  %v902_v42 = vshrl.u32 %v884_v23, %v900_v50  ;;  %v1198_v32 = vadd.s32 1, %v5575_v14  ;;  %v5604_v4 = vor.u32 %v5518_v56, %v5469_v48 }
 0x109   :  { %v443_v3 = vor.u32 %v5526_v13, %v5483_v36  ;;  %v7182_v55 = vand.u32 2147483647, %v5157_v12  ;;  %v5615_v43 = vsub.s32 32, %v5580_v18  ;;  %v1000_v15 = vclz %v4143_v11 }
 0x10a   :  { %vm447_vm6 = vcmp.lt.s32.totalorder %v5405_v46, 4  ;;  %v901_v61 = vshll.u32 %v5378_v17, %v5522_v45  ;;  %v907_v48 = vor.u32 4788187, %v906_v40  ;;  %v1195_v56 = vmul.u32 %v1188_v2, %v1179_v27 }
 0x10b   :  { %vm5610_vm5 = vcmp.le.f32.partialorder %v7182_v55, 0.7853982  ;;  %vm1197_vm7 = vc.u32 %v5588_v49, %v5574_v25  ;;  %v5625_v36 = vsel %vm343_vm2, %v5592_v29, 920167782  ;;  %v600_v13 = vxor.u32 2147483648, %v599_v9 }
 0x10c   :  { %v5627_v50 = vshrl.u32 %v1097_v21, 30  ;;  %v1199_v59 = vsel %vm1197_vm7, %v1198_v32, %v5575_v14  ;;  %v5631_v34 = vshrl.u32 %v5502_v26, 5  ;;  %v647_v17 = vshrl.u32 %v7167_v38, %v5599_v33 }
 0x10d   :  { %v903_v45 = vor.u32 %v902_v42, %v901_v61  ;;  %v1200_v0 = vadd.s32 %v1199_v59, %v1195_v56  ;;  %v646_v5 = vshll.u32 %v7179_v16, %v5536_v52  ;;  %v650_v2 = vshrl.u32 %v7168_v8, %v5599_v33 }
 0x10e   :  { %v751_v28 = vshrl.u32 %v7167_v38, %v5615_v43  ;;  %v4144_v22 = vadd.s32 4294967294, %v1000_v15  ;;  %v649_v47 = vshll.u32 %v7167_v38, %v5536_v52  ;;  %v754_v26 = vshrl.u32 %v7168_v8, %v5615_v43 }
 0x10f   :  { %v908_v53 = vand.u32 2147483647, %v907_v48  ;;  %v1201_v30 = vadd.s32 536870912, %v1200_v0  ;;  %v601_v14 = vsel %vm518_vm4, %v600_v13, %v599_v9  ;;  %v5648_v58 = vshrl.u32 %v5539_v35, 5  ;;  %v5698_v13 = vpop.permute.xlu1 %142 }
 0x110   :  { %v750_v11 = vshll.u32 %v7179_v16, %v5580_v18  ;;  %v1099_v57 = vshll.u32 %v5627_v50, 30  ;;  %v5653_v23 = vor.u32 %v647_v17, %v646_v5  ;;  %v753_v40 = vshll.u32 %v7167_v38, %v5580_v18  ;;  %7185 = vst [vmem:[#allocation33_spill] sm:$0xff] %v5698_v13 }
 0x111   :  { %v910_v63 = vcvt.s32.f32 %v903_v45  ;;  %v5657_v8 = vshrl.u32 %v1201_v30, 30  ;;  %v5661_v21 = vsel %vm343_vm2, %v339_v7, 1326507024  ;;  %v651_v9 = vor.u32 %v650_v2, %v649_v47 }
 0x112   :  { %v5663_v35 = vor.u32 %v751_v28, %v750_v11  ;;  %vm830_vm8 = vcmp.lt.s32.totalorder %v5225_v62, 0  ;;  %vm4145_vm9 = vcmp.lt.s32.totalorder %v4144_v22, 0  ;;  %v604_v27 = vsel %vm5610_vm5, %v5157_v12, %v601_v14  ;;  %v7187_v11 = vld [vmem:[#allocation27_spill] sm:$0xff] }
 0x113   :  { %v755_v42 = vor.u32 %v754_v26, %v753_v40  ;;  %v911_v32 = vmul.f32 %v910_v63, %v908_v53  ;;  %v1203_v38 = vshll.u32 %v5657_v8, 30  ;;  %v453_v55 = vsel %vm447_vm6, %v5604_v4, 920167782 }
 0x114   :  { %v457_v7 = vsel %vm447_vm6, %v443_v3, 1326507024  ;;  %vm655_vm10 = vcmp.lt.s32.totalorder %v5631_v34, 4  ;;  %v5677_v15 = vsub.s32 %v5571_v20, %v1099_v57  ;;  %vm759_vm11 = vcmp.lt.s32.totalorder %v5648_v58, 4 }
 0x115   :  { %v5682_v61 = vsel %vm655_vm10, %v5653_v23, 920167782  ;;  %v5685_v48 = vsel %vm4145_vm9, 0, %v4144_v22  ;;  %v5687_v56 = vsub.s32 %v1200_v0, %v1203_v38  ;;  %4631 = vcosq.f32 %v604_v27 }
 0x116   :  { %v5691_v3 = vsel %vm655_vm10, %v651_v9, 1326507024  ;;  %v5696_v20 = vsel %vm759_vm11, %v5663_v35, 920167782  ;;  %v430_v59 = vshrl.u32 %v7176_v19, %v5465_v6  ;;  %4633 = vsinq.f32 %v604_v27 }
 0x117   :  { %v5704_v17 = vsel %vm759_vm11, %v755_v42, 1326507024  ;;  %v912_v45 = vxor.u32 2147483648, %v911_v32  ;;  %v1206_v0 = vsub.s32 0, %v5687_v56  ;;  %v1008_v5 = vsub.s32 4294967266, %v5685_v48 }
 0x118   :  { %v1102_v2 = vsub.s32 0, %v5677_v15  ;;  %v7186_v28 = vand.u32 2147483647, %v5262_v31  ;;  %v429_v47 = vshll.u32 %v7178_v60, %v5407_v51  ;;  %v183_v53 = vmul.f32 %v5076_v24, %v5698_v13 }
 0x119   :  { %v4151_v26 = vmin.u32 %v1206_v0, %v5687_v56  ;;  %v432_v30 = vshll.u32 %v7176_v19, %v5407_v51  ;;  %v433_v14 = vshrl.u32 %v7177_v37, %v5465_v6  ;;  %v988_v57 = vadd.s32 %v7187_v11, %v5376_v39 }
 0x11a   :  { %v419_v22 = vand.u32 8388607, %v7186_v28  ;;  %v431_v40 = vor.u32 %v430_v59, %v429_v47  ;;  %v435_v63 = vshll.u32 %v7177_v37, %v5407_v51  ;;  %v436_v9 = vshrl.u32 %v7179_v16, %v5465_v6 }
 0x11b   :  { %v7188_v27 = vand.u32 2147483647, %v5225_v62  ;;  %v913_v42 = vsel %vm830_vm8, %v912_v45, %v911_v32  ;;  %v1004_v38 = vsub.s32 32, %v5685_v48  ;;  %v1208_v0 = vclz %v4151_v26 }
 0x11c   :  { %v434_v39 = vor.u32 %v433_v14, %v432_v30  ;;  %v5735_v59 = vadd.s32 127, %v1008_v5  ;;  %v4147_v51 = vmin.u32 %v1102_v2, %v5677_v15  ;;  %v420_v28 = vor.u32 8388608, %v419_v22 }
 0x11d   :  { %vm5728_vm12 = vcmp.le.f32.partialorder %v7188_v27, 0.7853982  ;;  %v437_v47 = vor.u32 %v436_v9, %v435_v63  ;;  %v4152_v11 = vadd.s32 4294967294, %v1208_v0  ;;  %v428_v27 = vshrl.u32 %v7178_v60, %v5465_v6 }
 0x11e   :  { %vm444_vm13 = vcmp.lt.s32.totalorder %v5405_v46, 1  ;;  %vm446_vm14 = vcmp.lt.s32.totalorder %v5405_v46, 3  ;;  %vm445_vm15 = vcmp.lt.s32.totalorder %v5405_v46, 2  ;;  %v1196_v2 = vadd.s32 %v5574_v25, %v5588_v49 }
 0x11f   :  { %v449_v32 = vsel %vm447_vm6, %v437_v47, 2102212464  ;;  %v452_v45 = vsel %vm444_vm13, %v431_v40, %v434_v39  ;;  %v454_v5 = vsel %vm446_vm14, %v437_v47, %v453_v55  ;;  %vm4153_vm0 = vcmp.lt.s32.totalorder %v4152_v11, 0  ;;  %v5751_v26 = vpop.eup %4631 }
 0x120   :  { %v455_v6 = vsel %vm445_vm15, %v452_v45, %v454_v5  ;;  %v456_v22 = vsel %vm444_vm13, %v434_v39, %v437_v47  ;;  %v1211_v30 = vsel %vm4153_vm0, 0, %v4152_v11  ;;  %v448_v14 = vsel %vm444_vm13, %v428_v27, %v431_v40  ;;  %v5756_v0 = vpop.eup %4633 }
 0x121   :  { %v458_v63 = vsel %vm446_vm14, %v5604_v4, %v457_v7  ;;  %v460_v9 = vshll.u32 %v420_v28, 8  ;;  %v1212_v55 = vsub.s32 32, %v1211_v30  ;;  %v1216_v13 = vsub.s32 4294967266, %v1211_v30 }
 0x122   :  { %v450_v25 = vsel %vm446_vm14, %v434_v39, %v449_v32  ;;  %v459_v49 = vsel %vm445_vm15, %v456_v22, %v458_v63  ;;  %v1104_v27 = vclz %v4147_v51  ;;  %v1213_v4 = vshll.u32 %v5687_v56, %v1211_v30  ;;  %v7191_v32 = vld [vmem:[#allocation29_spill] sm:$0xff] }
 0x123   :  { %v5762_v47 = vmul.u32.u64.low %v460_v9, %v459_v49  ;;  %v5763_v45 = vmul.u32.u64.high %v460_v9, %v459_v49, %v5762_v47  ;;  %v5765_v11 = vmul.u32.u64.low %v460_v9, %v455_v6  ;;  %v5766_v40 = vmul.u32.u64.high %v460_v9, %v455_v6, %v5765_v11  ;;  %v5796_v49 = vpop.permute.xlu0 %209 }
 0x124   :  { %v1214_v7 = vshrl.u32 %v1196_v2, %v1212_v55  ;;  %v1217_v28 = vadd.s32 127, %v1216_v13  ;;  %v916_v5 = vsel %vm5728_vm12, %v5225_v62, %v913_v42  ;;  %v5775_v39 = vadd.s32 %v5494_v10, %v5491_v54  ;;  %v7192_v2 = vld [vmem:[#allocation24_spill] sm:$0xff] }
 0x125   :  { %v195_v22 = vadd.f32 %v183_v53, %v7191_v32  ;;  %v451_v6 = vsel %vm445_vm15, %v448_v14, %v450_v25  ;;  %v1005_v51 = vshll.u32 %v5543_v41, %v5685_v48  ;;  %v724_v13 = vand.u32 2147483647, %v7192_v2 }
 0x126   :  { %v1215_v63 = vor.u32 %v1214_v7, %v1213_v4  ;;  %v1218_v56 = vshll.u32 %v1217_v28, 23  ;;  %v1006_v30 = vshrl.u32 %v988_v57, %v1004_v38  ;;  %vm469_vm1 = vc.u32 %v5763_v45, %v5765_v11 }
 0x127   :  { %v470_v42 = vadd.s32 1, %v5766_v40  ;;  %v742_v54 = vshrl.u32 %v7176_v19, %v5615_v43  ;;  %v1010_v10 = vshll.u32 %v5735_v59, 23  ;;  %v4148_v46 = vadd.s32 4294967294, %v1104_v27 }
 0x128   :  { %v1219_v53 = vor.u32 4788187, %v1218_v56  ;;  %v467_v14 = vmul.u32 %v460_v9, %v451_v6  ;;  %v741_v48 = vshll.u32 %v7178_v60, %v5580_v18  ;;  %v744_v57 = vshll.u32 %v7176_v19, %v5580_v18  ;;  %v7193_v9 = vld [vmem:[#allocation28_spill] sm:$0xff] }
 0x129   :  { %v471_v41 = vsel %vm469_vm1, %v470_v42, %v5766_v40  ;;  %v745_v38 = vshrl.u32 %v7177_v37, %v5615_v43  ;;  %v1222_v25 = vcvt.s32.f32 %v1215_v63  ;;  %v731_v59 = vand.u32 8388607, %v724_v13  ;;  %v7194_v63 = vld [vmem:[#allocation15_spill] sm:$0xff] }
 0x12a   :  { %v1220_v55 = vand.u32 2147483647, %v1219_v53  ;;  %v472_v47 = vadd.s32 %v471_v41, %v467_v14  ;;  %vm1142_vm3 = vcmp.lt.s32.totalorder %v7193_v9, 0  ;;  %v743_v40 = vor.u32 %v742_v54, %v741_v48 }
 0x12b   :  { %v746_v27 = vor.u32 %v745_v38, %v744_v57  ;;  %v747_v4 = vshll.u32 %v7177_v37, %v5580_v18  ;;  %v748_v7 = vshrl.u32 %v7179_v16, %v5615_v43  ;;  %4635 = vcosq.f32 %v916_v5 }
 0x12c   :  { %v5805_v28 = vor.u32 %v1006_v30, %v1005_v51  ;;  %v1223_v32 = vmul.f32 %v1222_v25, %v1220_v55  ;;  %v473_v6 = vadd.s32 536870912, %v472_v47  ;;  %4637 = vsinq.f32 %v916_v5 }
 0x12d   :  { %vm4149_vm6 = vcmp.lt.s32.totalorder %v4148_v46, 0  ;;  %v250_v56 = vmul.f32 %v7194_v63, %v5796_v49  ;;  %v749_v42 = vor.u32 %v748_v7, %v747_v4  ;;  %v5809_v53 = vor.u32 4788187, %v1010_v10 }
 0x12e   :  { %v5811_v54 = vshrl.u32 %v473_v6, 30  ;;  %vm756_vm7 = vcmp.lt.s32.totalorder %v5648_v58, 1  ;;  %vm758_vm9 = vcmp.lt.s32.totalorder %v5648_v58, 3  ;;  %v7195_v18 = vand.u32 2147483647, %v7193_v9  ;;  %v5848_v6 = vpop.permute.xlu1 %284 }
 0x12f   :  { %v732_v5 = vor.u32 8388608, %v731_v59  ;;  %v764_v30 = vsel %vm756_vm7, %v743_v40, %v746_v27  ;;  %v766_v10 = vsel %vm758_vm9, %v749_v42, %v5696_v20  ;;  %v768_v14 = vsel %vm756_vm7, %v746_v27, %v749_v42 }
 0x130   :  { %vm5817_vm13 = vcmp.le.f32.partialorder %v7195_v18, 0.7853982  ;;  %v1014_v41 = vcvt.s32.f32 %v5805_v28  ;;  %v5829_v48 = vsel %vm4149_vm6, 0, %v4148_v46  ;;  %v1224_v57 = vxor.u32 2147483648, %v1223_v32 }
 0x131   :  { %v475_v38 = vshll.u32 %v5811_v54, 30  ;;  %v740_v55 = vshrl.u32 %v7178_v60, %v5615_v43  ;;  %vm757_vm14 = vcmp.lt.s32.totalorder %v5648_v58, 2  ;;  %v761_v25 = vsel %vm759_vm11, %v749_v42, 2102212464 }
 0x132   :  { %v770_v20 = vsel %vm758_vm9, %v5663_v35, %v5704_v17  ;;  %v262_v59 = vadd.f32 %v250_v56, %v195_v22  ;;  %v767_v46 = vsel %vm757_vm14, %v764_v30, %v766_v10  ;;  %v1108_v43 = vsub.s32 32, %v5829_v48 }
 0x133   :  { %v5841_v4 = vsub.s32 %v472_v47, %v475_v38  ;;  %v771_v7 = vsel %vm757_vm14, %v768_v14, %v770_v20  ;;  %v1226_v63 = vsub.s32 4, %v5657_v8  ;;  %v760_v42 = vsel %vm756_vm7, %v740_v55, %v743_v40  ;;  %v7198_v47 = vld [vmem:[#allocation21_spill] sm:$0xff] }
 0x134   :  { %v772_v18 = vshll.u32 %v732_v5, 8  ;;  %v1225_v35 = vsel %vm1142_vm3, %v1224_v57, %v1223_v32  ;;  %v762_v22 = vsel %vm758_vm9, %v746_v27, %v761_v25  ;;  %v602_v56 = vsub.s32 4, %v7198_v47 }
 0x135   :  { %v478_v17 = vsub.s32 0, %v5841_v4  ;;  %v5866_v20 = vpop.eup %4635  ;;  %v1012_v40 = vand.u32 2147483647, %v5809_v53  ;;  %v5870_v32 = vadd.f32 %v5848_v6, %v262_v59  ;;  %v1227_v55 = vsel %vm1142_vm3, %v1226_v63, %v5657_v8  ;;  %v7199_v59 = vld [vmem:[#allocation25_spill] sm:$0xff] }
 0x136   :  { %v5859_v30 = vmul.u32.u64.low %v772_v18, %v771_v7  ;;  %v5860_v10 = vmul.u32.u64.high %v772_v18, %v771_v7, %v5859_v30  ;;  %v5862_v14 = vmul.u32.u64.low %v772_v18, %v767_v46  ;;  %v5863_v38 = vmul.u32.u64.high %v772_v18, %v767_v46, %v5862_v14  ;;  %v5876_v57 = vpop.eup %4637 }
 0x137   :  { %v4123_v5 = vmin.u32 %v478_v17, %v5841_v4  ;;  %v603_v27 = vsel %vm518_vm4, %v602_v56, %v7198_v47  ;;  %v763_v25 = vsel %vm757_vm14, %v760_v42, %v762_v22  ;;  %v914_v7 = vsub.s32 4, %v7199_v59 }
 0x138   :  { %v605_v46 = vsel %vm5610_vm5, 0, %v603_v27  ;;  %v1109_v17 = vshll.u32 %v5677_v15, %v5829_v48  ;;  %v1112_v30 = vsub.s32 4294967266, %v5829_v48  ;;  %v1228_v47 = vsel %vm5817_vm13, %v7193_v9, %v1225_v35 }
 0x139   :  { %v480_v56 = vclz %v4123_v5  ;;  %v1110_v8 = vshrl.u32 %v5775_v39, %v1108_v43  ;;  %vm781_vm4 = vc.u32 %v5860_v10, %v5862_v14  ;;  %v782_v44 = vadd.s32 1, %v5863_v38 }
 0x13a   :  { %v609_v58 = vadd.s32 3, %v605_v46  ;;  %v1229_v63 = vsel %vm5817_vm13, 0, %v1227_v55  ;;  %v779_v15 = vmul.u32 %v772_v18, %v763_v25  ;;  %v915_v48 = vsel %vm830_vm8, %v914_v7, %v7199_v59 }
 0x13b   :  { %v4124_v42 = vadd.s32 4294967294, %v480_v56  ;;  %4639 = vcosq.f32 %v1228_v47  ;;  %v783_v35 = vsel %vm781_vm4, %v782_v44, %v5863_v38  ;;  %v917_v39 = vsel %vm5728_vm12, 0, %v915_v48 }
 0x13c   :  { %v610_v22 = vand.u32 3, %v609_v58  ;;  %v5904_v43 = vadd.s32 127, %v1112_v30  ;;  %4641 = vsinq.f32 %v1228_v47  ;;  %v784_v5 = vadd.s32 %v783_v35, %v779_v15 }
 0x13d   :  { %vm4125_vm5 = vcmp.lt.s32.totalorder %v4124_v42, 0  ;;  %v613_v27 = vxor.u32 2147483648, %v5756_v0  ;;  %v616_v18 = vxor.u32 2147483648, %v5751_v26  ;;  %v921_v55 = vadd.s32 3, %v917_v39  ;;  %v7200_v39 = vld [vmem:[#allocation19_spill] sm:$0xff] }
 0x13e   :  { %v483_v51 = vsel %vm4125_vm5, 0, %v4124_v42  ;;  %v1233_v25 = vadd.s32 3, %v1229_v63  ;;  %v468_v46 = vadd.s32 %v5765_v11, %v5763_v45  ;;  %v785_v7 = vadd.s32 536870912, %v784_v5 }
 0x13f   :  { %v484_v38 = vsub.s32 32, %v483_v51  ;;  %v488_v59 = vsub.s32 4294967266, %v483_v51  ;;  %vm612_vm8 = vcmp.eq.s32.totalorder %v610_v22, 0  ;;  %v925_v24 = vxor.u32 2147483648, %v5876_v57 }
 0x140   :  { %v928_v30 = vxor.u32 2147483648, %v5866_v20  ;;  %v485_v47 = vshll.u32 %v5841_v4, %v483_v51  ;;  %vm615_vm11 = vcmp.eq.s32.totalorder %v610_v22, 2  ;;  %v5913_v58 = vshrl.u32 %v785_v7, 30 }
 0x141   :  { %v486_v56 = vshrl.u32 %v468_v46, %v484_v38  ;;  %v489_v44 = vadd.s32 127, %v488_v59  ;;  %v614_v63 = vsel %vm612_vm8, %v5751_v26, %v613_v27  ;;  %v617_v42 = vsel %vm615_vm11, %v616_v18, %v5756_v0 }
 0x142   :  { %v922_v45 = vand.u32 3, %v921_v55  ;;  %v5917_v11 = vor.u32 %v1110_v8, %v1109_v17  ;;  %v5919_v15 = vand.u32 3, %v1233_v25  ;;  %vm414_vm12 = vcmp.lt.s32.totalorder %v5262_v31, 0 }
 0x143   :  { %v487_v48 = vor.u32 %v486_v56, %v485_v47  ;;  %v490_v35 = vshll.u32 %v489_v44, 23  ;;  %v787_v4 = vshll.u32 %v5913_v58, 30  ;;  %vm608_vm15 = vweird.f32 %v5157_v12  ;;  %v7205_v12 = vld [vmem:[#allocation30_spill] sm:$0xff] }
 0x144   :  { %vm611_vm0 = vcmp.lt.s32.totalorder %v610_v22, 2  ;;  %v308_v51 = vand.u32 2147483647, %v7200_v39  ;;  %vm924_vm1 = vcmp.eq.s32.totalorder %v922_v45, 0  ;;  %vm927_vm3 = vcmp.eq.s32.totalorder %v922_v45, 2 }
 0x145   :  { %v491_v46 = vor.u32 4788187, %v490_v35  ;;  %v618_v26 = vsel %vm611_vm0, %v614_v63, %v617_v42  ;;  %v4640_v0 = vpop.eup %4639  ;;  %v7201_v17 = vand.u32 2147483647, %v5262_v31  ;;  %v5931_v27 = vsub.s32 %v784_v5, %v787_v4  ;;  %v7204_v63 = vld [vmem:[#allocation31_spill] sm:$0xff] }
 0x146   :  { %vm923_vm7 = vcmp.lt.s32.totalorder %v922_v45, 2  ;;  %v926_v18 = vsel %vm924_vm1, %v5866_v20, %v925_v24  ;;  %v929_v22 = vsel %vm927_vm3, %v928_v30, %v5876_v57  ;;  %v4642_v55 = vpop.eup %4641  ;;  %v494_v38 = vcvt.s32.f32 %v487_v48 }
 0x147   :  { %vm5927_vm6 = vcmp.le.f32.partialorder %v7201_v17, 0.7853982  ;;  %v492_v25 = vand.u32 2147483647, %v491_v46  ;;  %vm920_vm9 = vweird.f32 %v5225_v62  ;;  %v930_v59 = vsel %vm923_vm7, %v926_v18, %v929_v22 }
 0x148   :  { %v498_v7 = vsub.s32 4, %v5811_v54  ;;  %v790_v47 = vsub.s32 0, %v5931_v27  ;;  %v619_v56 = vsel %vm608_vm15, nan, %v618_v26  ;;  %v931_v5 = vsel %vm920_vm9, nan, %v930_v59 }
 0x149   :  { %vm1236_vm13 = vcmp.eq.s32.totalorder %v5919_v15, 0  ;;  %v1240_v44 = vxor.u32 2147483648, %v4640_v0  ;;  %v495_v20 = vmul.f32 %v494_v38, %v492_v25  ;;  %v5941_v24 = vpack.c.bf16 %v931_v5, %v619_v56 }
 0x14a   :  { %v1237_v57 = vxor.u32 2147483648, %v4642_v55  ;;  %v4135_v30 = vmin.u32 %v790_v47, %v5931_v27  ;;  %v315_v62 = vand.u32 8388607, %v308_v51  ;;  %v326_v42 = vshrl.u32 %v7176_v19, %v7204_v63 }
 0x14b   :  { %v496_v45 = vxor.u32 2147483648, %v495_v20  ;;  %4321 = vmatprep.subr.bf16.mxu1 %v5941_v24  ;;  %v325_v48 = vshll.u32 %v7178_v60, %v7205_v12  ;;  %v328_v35 = vshll.u32 %v7176_v19, %v7205_v12  ;;  %v329_v4 = vshrl.u32 %v7177_v37, %v7204_v63 }
 0x14c   :  { %vm1239_vm14 = vcmp.eq.s32.totalorder %v5919_v15, 2  ;;  %v5959_v46 = vsel %vm414_vm12, %v498_v7, %v5811_v54  ;;  %v780_v26 = vadd.s32 %v5862_v14, %v5860_v10  ;;  %v792_v17 = vclz %v4135_v30  ;;  %4322 = vmatpush3.bf16.msra.mxu1 %v5941_v24 }
 0x14d   :  { %v1241_v18 = vsel %vm1239_vm14, %v1240_v44, %v4642_v55  ;;  %v497_v22 = vsel %vm414_vm12, %v496_v45, %v495_v20  ;;  %v327_v25 = vor.u32 %v326_v42, %v325_v48  ;;  %v330_v38 = vor.u32 %v329_v4, %v328_v35 }
 0x14e   :  { %vm1235_vm4 = vcmp.lt.s32.totalorder %v5919_v15, 2  ;;  %v4136_v59 = vadd.s32 4294967294, %v792_v17  ;;  %v316_v47 = vor.u32 8388608, %v315_v62  ;;  %v331_v54 = vshll.u32 %v7177_v37, %v7205_v12 }
 0x14f   :  { %v332_v7 = vshrl.u32 %v7179_v16, %v7204_v63  ;;  %v1238_v10 = vsel %vm1236_vm13, %v4640_v0, %v1237_v57  ;;  %v500_v14 = vsel %vm5927_vm6, %v5262_v31, %v497_v22  ;;  %v324_v55 = vshrl.u32 %v7178_v60, %v7204_v63 }
 0x150   :  { %vm340_vm5 = vcmp.lt.s32.totalorder %v5403_v1, 1  ;;  %vm4137_vm8 = vcmp.lt.s32.totalorder %v4136_v59, 0  ;;  %vm341_vm11 = vcmp.lt.s32.totalorder %v5403_v1, 2  ;;  %vm342_vm12 = vcmp.lt.s32.totalorder %v5403_v1, 3 }
 0x151   :  { %v333_v56 = vor.u32 %v332_v7, %v331_v54  ;;  %v795_v5 = vsel %vm4137_vm8, 0, %v4136_v59  ;;  %v344_v44 = vsel %vm340_vm5, %v324_v55, %v327_v25  ;;  %v348_v0 = vsel %vm340_vm5, %v327_v25, %v330_v38 }
 0x152   :  { %v354_v20 = vsel %vm342_vm12, %v5592_v29, %v5661_v21  ;;  %v796_v57 = vsub.s32 32, %v795_v5  ;;  %v800_v30 = vsub.s32 4294967266, %v795_v5  ;;  %v356_v63 = vshll.u32 %v316_v47, 8  ;;  %v7206_v21 = vld [vmem:[#allocation20_spill] sm:$0xff] }
 0x153   :  { %v345_v62 = vsel %vm343_vm2, %v333_v56, 2102212464  ;;  %v797_v42 = vshll.u32 %v5931_v27, %v795_v5  ;;  %v350_v12 = vsel %vm342_vm12, %v333_v56, %v5625_v36  ;;  %v352_v48 = vsel %vm340_vm5, %v330_v38, %v333_v56 }
 0x154   :  { %v346_v45 = vsel %vm342_vm12, %v330_v38, %v345_v62  ;;  %vm1232_vm15 = vweird.f32 %v7193_v9  ;;  %v798_v35 = vshrl.u32 %v780_v26, %v796_v57  ;;  %v801_v4 = vadd.s32 127, %v800_v30 }
 0x155   :  { %v351_v29 = vsel %vm341_vm11, %v348_v0, %v350_v12  ;;  %v620_v17 = vand.u32 2147483647, %v7206_v21  ;;  %v347_v22 = vsel %vm341_vm11, %v344_v44, %v346_v45  ;;  %v355_v27 = vsel %vm341_vm11, %v352_v48, %v354_v20 }
 0x156   :  { %v6001_v25 = vmul.u32.u64.low %v356_v63, %v351_v29  ;;  %v6002_v36 = vmul.u32.u64.high %v356_v63, %v351_v29, %v6001_v25  ;;  %v799_v38 = vor.u32 %v798_v35, %v797_v42  ;;  %v802_v59 = vshll.u32 %v801_v4, 23 }
 0x157   :  { %v6005_v47 = vmul.u32.u64.low %v356_v63, %v355_v27  ;;  %v6006_v26 = vmul.u32.u64.high %v356_v63, %v355_v27, %v6005_v47  ;;  %v1242_v54 = vsel %vm1235_vm4, %v1238_v10, %v1241_v18  ;;  %v501_v7 = vsel %vm5927_vm6, 0, %v5959_v46 }
 0x158   :  { %vm726_vm2 = vcmp.lt.s32.totalorder %v7192_v2, 0  ;;  %v810_v1 = vsub.s32 4, %v5913_v58  ;;  %4643 = vcosq.f32 %v500_v14  ;;  %v803_v55 = vor.u32 4788187, %v802_v59 }
 0x159   :  { %v363_v56 = vmul.u32 %v356_v63, %v347_v22  ;;  %v638_v5 = vshrl.u32 %v7176_v19, %v5599_v33  ;;  %v806_v44 = vcvt.s32.f32 %v799_v38  ;;  %v366_v0 = vadd.s32 1, %v6002_v36 }
 0x15a   :  { %v627_v15 = vand.u32 8388607, %v620_v17  ;;  %v641_v8 = vshrl.u32 %v7177_v37, %v5599_v33  ;;  %v804_v46 = vand.u32 2147483647, %v803_v55  ;;  %vm365_vm0 = vc.u32 %v6006_v26, %v6001_v25 }
 0x15b   :  { %v637_v18 = vshll.u32 %v7178_v60, %v5536_v52  ;;  %v640_v10 = vshll.u32 %v7176_v19, %v5536_v52  ;;  %4645 = vsinq.f32 %v500_v14  ;;  %vm6030_vm1 = vcmp.le.f32.partialorder %v724_v13, 0.7853982 }
 0x15c   :  { %v811_v57 = vsel %vm726_vm2, %v810_v1, %v5913_v58  ;;  %v367_v30 = vsel %vm365_vm0, %v366_v0, %v6002_v36  ;;  %v807_v62 = vmul.f32 %v806_v44, %v804_v46  ;;  %v6040_v19 = vsel %vm1232_vm15, nan, %v1242_v54 }
 0x15d   :  { %v368_v63 = vadd.s32 %v367_v30, %v363_v56  ;;  %v639_v42 = vor.u32 %v638_v5, %v637_v18  ;;  %v642_v45 = vor.u32 %v641_v8, %v640_v10  ;;  %v505_v14 = vadd.s32 3, %v501_v7  ;;  %v6090_v56 = vld [vmem:[%s7065_s6] sm:$0xff]  }
 0x15e   :  { %v643_v13 = vshll.u32 %v7177_v37, %v5536_v52  ;;  %v644_v12 = vshrl.u32 %v7179_v16, %v5599_v33  ;;  %v808_v48 = vxor.u32 2147483648, %v807_v62  ;;  %v813_v58 = vsel %vm6030_vm1, 0, %v811_v57 }
 0x15f   :  { %v369_v35 = vadd.s32 536870912, %v368_v63  ;;  %v628_v4 = vor.u32 8388608, %v627_v15  ;;  %v636_v29 = vshrl.u32 %v7178_v60, %v5599_v33  ;;  %vm652_vm3 = vcmp.lt.s32.totalorder %v5631_v34, 1 }
 0x160   :  { %v645_v22 = vor.u32 %v644_v12, %v643_v13  ;;  %vm654_vm6 = vcmp.lt.s32.totalorder %v5631_v34, 3  ;;  %v809_v52 = vsel %vm726_vm2, %v808_v48, %v807_v62  ;;  %v660_v16 = vsel %vm652_vm3, %v639_v42, %v642_v45 }
 0x161   :  { %v6054_v37 = vshrl.u32 %v369_v35, 30  ;;  %v666_v9 = vsel %vm654_vm6, %v5653_v23, %v5691_v3  ;;  %v812_v60 = vsel %vm6030_vm1, %v7192_v2, %v809_v52  ;;  %vm653_vm7 = vcmp.lt.s32.totalorder %v5631_v34, 2 }
 0x162   :  { %v657_v33 = vsel %vm655_vm10, %v645_v22, 2102212464  ;;  %v662_v27 = vsel %vm654_vm6, %v645_v22, %v5682_v61  ;;  %v664_v36 = vsel %vm652_vm3, %v642_v45, %v645_v22  ;;  %v4644_v38 = vpop.eup %4643  ;;  %4647 = vcosq.f32 %v812_v60 }
 0x163   :  { %v371_v59 = vshll.u32 %v6054_v37, 30  ;;  %v668_v23 = vshll.u32 %v628_v4, 8  ;;  %4649 = vsinq.f32 %v812_v60  ;;  %v656_v3 = vsel %vm652_vm3, %v636_v29, %v639_v42 }
 0x164   :  { %v663_v47 = vsel %vm653_vm7, %v660_v16, %v662_v27  ;;  %v667_v61 = vsel %vm653_vm7, %v664_v36, %v666_v9  ;;  %v658_v7 = vsel %vm654_vm6, %v642_v45, %v657_v33  ;;  %v1114_v44 = vshll.u32 %v5904_v43, 23  ;;  %v6120_v33 = vld [vmem:[%s7065_s6 + $0x8] sm:$0xff]  }
 0x165   :  { %v6080_v54 = vsub.s32 %v368_v63, %v371_v59  ;;  %v6084_v1 = vmul.u32.u64.low %v668_v23, %v667_v61  ;;  %v6085_v55 = vmul.u32.u64.high %v668_v23, %v667_v61, %v6084_v1  ;;  %v4646_v5 = vpop.eup %4645  ;;  %v817_v0 = vadd.s32 3, %v813_v58  ;;  %v6126_v59 = vld [vmem:[%s7065_s6 + $0x10] sm:$0xff]  }
 0x166   :  { %v6093_v15 = vmul.u32.u64.low %v668_v23, %v663_v47  ;;  %v6094_v8 = vmul.u32.u64.high %v668_v23, %v663_v47, %v6093_v15  ;;  %v1581_v46 = vpack.c.bf16 %v5870_v32, %v6040_v19  ;;  %v506_v18 = vand.u32 3, %v505_v14 }
 0x167   :  { %v374_v10 = vsub.s32 0, %v6080_v54  ;;  %vm1759_vm10 = vcmask 1044480   ;;  %v512_v20 = vxor.u32 2147483648, %v4644_v38  ;;  %v659_v57 = vsel %vm653_vm7, %v656_v3, %v658_v7 }
 0x168   :  { %vm1734_vm9 = vcmask 220160   ;;  %v509_v30 = vxor.u32 2147483648, %v4646_v5  ;;  %vm677_vm13 = vc.u32 %v6085_v55, %v6093_v15  ;;  %vm1760_vm14 = vcmask 1045504  }
 0x169   :  { %v4119_v43 = vmin.u32 %v374_v10, %v6080_v54  ;;  %4325 = vmatprep.mubr.msk.bf16.mxu1 %vm1734_vm9, %v6090_v56  ;;  %v1115_v32 = vor.u32 4788187, %v1114_v44  ;;  %v818_v62 = vand.u32 3, %v817_v0  ;;  %v678_v63 = vadd.s32 1, %v6094_v8 }
 0x16a   :  { %v4736_v42 = vmov 65535   ;;  %v1118_v34 = vcvt.s32.f32 %v5917_v11  ;;  %vm511_vm4 = vcmp.eq.s32.totalorder %v506_v18, 2  ;;  %v675_v14 = vmul.u32 %v668_v23, %v659_v57 }
 0x16b   :  { %v1761_v45 = vsel %vm1759_vm10, 4294967295, %v4736_v42  ;;  %v376_v19 = vclz %v4119_v43  ;;  %vm508_vm5 = vcmp.eq.s32.totalorder %v506_v18, 0  ;;  %v513_v13 = vsel %vm511_vm4, %v512_v20, %v4646_v5 }
 0x16c   :  { %v679_v12 = vsel %vm677_vm13, %v678_v63, %v6094_v8  ;;  %v6111_v48 = vsel %vm1760_vm14, %v1761_v45, 0  ;;  %v4648_v58 = vpop.eup %4647  ;;  %v510_v35 = vsel %vm508_vm5, %v4644_v38, %v509_v30  ;;  %v1116_v16 = vand.u32 2147483647, %v1115_v32  ;;  %v6156_v32 = vld [vmem:[%s7065_s6 + $0x20] sm:$0xff]  }
 0x16d   :  { %v4120_v4 = vadd.s32 4294967294, %v376_v19  ;;  %v680_v29 = vadd.s32 %v679_v12, %v675_v14  ;;  %v6114_v22 = vand.u32 %v6111_v48, %v1581_v46  ;;  %v4650_v52 = vpop.eup %4649  ;;  %vm507_vm8 = vcmp.lt.s32.totalorder %v506_v18, 2 }
 0x16e   :  { %vm819_vm11 = vcmp.lt.s32.totalorder %v818_v62, 2  ;;  %v824_v11 = vxor.u32 2147483648, %v4648_v58  ;;  %v821_v9 = vxor.u32 2147483648, %v4650_v52  ;;  %vm823_vm12 = vcmp.eq.s32.totalorder %v818_v62, 2 }
 0x16f   :  { %vm4121_vm15 = vcmp.lt.s32.totalorder %v4120_v4, 0  ;;  %v681_v60 = vadd.s32 536870912, %v680_v29  ;;  %4323 = vmatprep.subr.bf16.mxu1 %v6114_v22  ;;  %v514_v27 = vsel %vm507_vm8, %v510_v35, %v513_v13  ;;  %vm820_vm2 = vcmp.eq.s32.totalorder %v818_v62, 0  ;;  %v7209_v62 = vld [vmem:[#allocation23_spill] sm:$0xff]  ;;  %v6180_v35 = vld [vmem:[%s7065_s6 + $0x28] sm:$0xff]  }
 0x170   :  { %v825_v36 = vsel %vm823_vm12, %v824_v11, %v4650_v52  ;;  %v379_v38 = vsel %vm4121_vm15, 0, %v4120_v4  ;;  %4324 = vmatpush3.bf16.msra.mxu1 %v6114_v22  ;;  %v822_v23 = vsel %vm820_vm2, %v4648_v58, %v821_v9  ;;  %v364_v3 = vadd.s32 %v6001_v25, %v6006_v26  ;;  %v7223_v13 = vld [vmem:[#allocation33_spill] sm:$0xff] }
 0x171   :  { %v380_v47 = vsub.s32 32, %v379_v38  ;;  %v384_v61 = vsub.s32 4294967266, %v379_v38  ;;  %vm504_vm0 = vweird.f32 %v5262_v31  ;;  %vm816_vm1 = vweird.f32 %v7192_v2 }
 0x172   :  { %v826_v7 = vsel %vm819_vm11, %v822_v23, %v825_v36  ;;  %v6133_v1 = vshrl.u32 %v681_v60, 30  ;;  %v515_v5 = vsel %vm504_vm0, nan, %v514_v27  ;;  %v1119_v46 = vmul.f32 %v1118_v34, %v1116_v16  ;;  %v7210_v34 = vld [vmem:[#allocation22_spill] sm:$0xff]  ;;  %v7217_v23 = vld [vmem:[#allocation32_spill] sm:$0xff] }
 0x173   :  { %v827_v44 = vsel %vm816_vm1, nan, %v826_v7  ;;  %v382_v0 = vshrl.u32 %v364_v3, %v380_v47  ;;  %v385_v8 = vadd.s32 127, %v384_v61  ;;  %4326 = vmatmul.mubr.msk.bf16.vlgmr.msra.gmra.mrb[0].mxu1 %vm1734_vm9, %v6120_v33  ;;  %v381_v25 = vshll.u32 %v6080_v54, %v379_v38  ;;  %v6151_v54 = vld [vmem:[%s7065_s6 + $0x18] sm:$0xff]   ;;  %v6191_v16 = vld [vmem:[%s7065_s6 + $0x30] sm:$0xff]  }
 0x174   :  { %v6137_v18 = vpack.c.bf16 %v827_v44, %v515_v5  ;;  %v683_v31 = vshll.u32 %v6133_v1, 30  ;;  %4329 = vmatprep.mubr.msk.bf16.mxu1 %vm1734_vm9, %v6126_v59  ;;  %v1015_v26 = vmul.f32 %v1014_v41, %v1012_v40  ;;  %v1120_v30 = vxor.u32 2147483648, %v1119_v46 }
 0x175   :  { %v386_v2 = vshll.u32 %v385_v8, 23  ;;  %v383_v10 = vor.u32 %v382_v0, %v381_v25  ;;  %vm1038_vm3 = vcmp.lt.s32.totalorder %v7209_v62, 0  ;;  %vm934_vm6 = vcmp.lt.s32.totalorder %v7210_v34, 0 }
 0x176   :  { %1772 = vmatprep.subr.bf16.mxu0 %v6137_v18  ;;  %v684_v20 = vsub.s32 %v680_v29, %v683_v31  ;;  %v1016_v28 = vxor.u32 2147483648, %v1015_v26  ;;  %v1121_v63 = vsel %vm1038_vm3, %v1120_v30, %v1119_v46  ;;  %v7211_v14 = vand.u32 2147483647, %v7209_v62  ;;  %v6222_v46 = vld [vmem:[%s7065_s6 + $0x38] sm:$0xff]  }
 0x177   :  { %v387_v57 = vor.u32 4788187, %v386_v2  ;;  %v390_v41 = vcvt.s32.f32 %v383_v10  ;;  %v7214_v4 = vand.u32 2147483647, %v7210_v34  ;;  %v1122_v9 = vsub.s32 4, %v5627_v50 }
 0x178   :  { %v686_v43 = vsub.s32 0, %v684_v20  ;;  %v1017_v19 = vsel %vm934_vm6, %v1016_v28, %v1015_v26  ;;  %vm6170_vm7 = vcmp.le.f32.partialorder %v7211_v14, 0.7853982  ;;  %v676_v27 = vadd.s32 %v6093_v15, %v6085_v55 }
 0x179   :  { %v388_v53 = vand.u32 2147483647, %v387_v57  ;;  %v1124_v58 = vsel %vm6170_vm7, %v7209_v62, %v1121_v63  ;;  %vm6184_vm13 = vcmp.le.f32.partialorder %v7214_v4, 0.7853982  ;;  %v1018_v3 = vsub.s32 4, %v7217_v23 }
 0x17a   :  { %v4131_v40 = vmin.u32 %v686_v43, %v684_v20  ;;  %v1020_v11 = vsel %vm6184_vm13, %v7210_v34, %v1017_v19  ;;  %4651 = vcosq.f32 %v1124_v58  ;;  %vm310_vm4 = vcmp.lt.s32.totalorder %v7200_v39, 0  ;;  %v7222_v19 = vld [vmem:[#allocation14_spill] sm:$0xff] }
 0x17b   :  { %4330 = vmatmul.mubr.msk.bf16.gmra.mrb[4].mxu1 %vm1734_vm9, %v6151_v54  ;;  %v391_v42 = vmul.f32 %v390_v41, %v388_v53  ;;  %4653 = vsinq.f32 %v1124_v58  ;;  %v1123_v55 = vsel %vm1038_vm3, %v1122_v9, %v5627_v50  ;;  %vm6212_vm5 = vcmp.le.f32.partialorder %v308_v51, 0.7853982 }
 0x17c   :  { %v688_v45 = vclz %v4131_v40  ;;  %4333 = vmatprep.mubr.msk.bf16.mxu1 %vm1734_vm9, %v6156_v32  ;;  %4655 = vsinq.f32 %v1020_v11  ;;  %v1019_v50 = vsel %vm934_vm6, %v1018_v3, %v7217_v23  ;;  %v1125_v51 = vsel %vm6170_vm7, 0, %v1123_v55  ;;  %v7228_v3 = vld [vmem:[#allocation17_spill] sm:$0xff] }
 0x17d   :  { %v392_v52 = vxor.u32 2147483648, %v391_v42  ;;  %4657 = vcosq.f32 %v1020_v11  ;;  %v394_v31 = vsub.s32 4, %v6054_v37  ;;  %v1021_v10 = vsel %vm6184_vm13, 0, %v1019_v50 }
 0x17e   :  { %v4132_v12 = vadd.s32 4294967294, %v688_v45  ;;  %v706_v43 = vsub.s32 4, %v6133_v1  ;;  %v7220_v53 = vmov 0   ;;  %v1025_v40 = vadd.s32 3, %v1021_v10  ;;  %v7221_v45 = vld [vmem:[#allocation26_spill] sm:$0xff] }
 0x17f   :  { %v393_v47 = vsel %vm310_vm4, %v392_v52, %v391_v42  ;;  %v395_v41 = vsel %vm310_vm4, %v394_v31, %v6054_v37  ;;  %v126_v14 = vmul.f32 %v7222_v19, %v7221_v45  ;;  %vm622_vm8 = vcmp.lt.s32.totalorder %v7206_v21, 0  ;;  %v7230_v31 = vld [vmem:[#allocation13_spill] sm:$0xff] }
 0x180   :  { %vm4133_vm14 = vcmp.lt.s32.totalorder %v4132_v12, 0  ;;  %v396_v8 = vsel %vm6212_vm5, %v7200_v39, %v393_v47  ;;  %v397_v52 = vsel %vm6212_vm5, 0, %v395_v41  ;;  %vm6248_vm11 = vcmp.le.f32.partialorder %v620_v17, 0.7853982 }
 0x181   :  { %v691_v60 = vsel %vm4133_vm14, 0, %v4132_v12  ;;  %4659 = vcosq.f32 %v396_v8  ;;  %v7224_v12 = vld [vmem:[#allocation16_spill] sm:$0xff]  ;;  %v707_v9 = vsel %vm622_vm8, %v706_v43, %v6133_v1  ;;  %v127_v47 = vmul.f32 %v7228_v3, %v7221_v45 }
 0x182   :  { %v692_v36 = vsub.s32 32, %v691_v60  ;;  %v696_v38 = vsub.s32 4294967266, %v691_v60  ;;  %v693_v61 = vshll.u32 %v684_v20, %v691_v60  ;;  %v1129_v20 = vadd.s32 3, %v1125_v51  ;;  %v7227_v60 = vld [vmem:[#allocation12_spill] sm:$0xff] }
 0x183   :  { %4334 = vmatmul.mubr.msk.bf16.gmra.mrb[8].mxu1 %vm1734_vm9, %v6180_v35  ;;  %4661 = vsinq.f32 %v396_v8  ;;  %v182_v58 = vmul.f32 %v7224_v12, %v7223_v13  ;;  %v709_v1 = vsel %vm6248_vm11, 0, %v707_v9  ;;  %vm1128_vm6 = vweird.f32 %v7209_v62 }
 0x184   :  { %v694_v7 = vshrl.u32 %v676_v27, %v692_v36  ;;  %v697_v5 = vadd.s32 127, %v696_v38  ;;  %4337 = vmatprep.mubr.msk.bf16.mxu1 %vm1734_vm9, %v6191_v16  ;;  %v4652_v57 = vpop.eup %4651  ;;  %v1130_v4 = vand.u32 3, %v1129_v20  ;;  %v181_v27 = vmul.f32 %v7227_v60, %v7223_v13 }
 0x185   :  { %v4654_v28 = vpop.eup %4653  ;;  %v1136_v38 = vxor.u32 2147483648, %v4652_v57  ;;  %v194_v15 = vadd.f32 %v182_v58, %v127_v47  ;;  %vm1024_vm14 = vweird.f32 %v7210_v34 }
 0x186   :  { %v695_v44 = vor.u32 %v694_v7, %v693_v61  ;;  %v698_v0 = vshll.u32 %v697_v5, 23  ;;  %v4656_v42 = vpop.eup %4655  ;;  %v1133_v36 = vxor.u32 2147483648, %v4654_v28  ;;  %v1026_v61 = vand.u32 3, %v1025_v40 }
 0x187   :  { %v4658_v29 = vpop.eup %4657  ;;  %v1029_v17 = vxor.u32 2147483648, %v4656_v42  ;;  %v401_v5 = vadd.s32 3, %v397_v52  ;;  %vm1132_vm12 = vcmp.eq.s32.totalorder %v1130_v4, 0  ;;  %vm1135_vm15 = vcmp.eq.s32.totalorder %v1130_v4, 2 }
 0x188   :  { %v699_v25 = vor.u32 4788187, %v698_v0  ;;  %v702_v26 = vcvt.s32.f32 %v695_v44  ;;  %v1032_v7 = vxor.u32 2147483648, %v4658_v29  ;;  %v7229_v44 = vld [vmem:[#allocation18_spill] sm:$0xff]  ;;  %v193_v50 = vadd.f32 %v181_v27, %v126_v14 }
 0x189   :  { %v249_v0 = vmul.f32 %v7229_v44, %v5796_v49  ;;  %v1134_v51 = vsel %vm1132_vm12, %v4652_v57, %v1133_v36  ;;  %vm1028_vm2 = vcmp.eq.s32.totalorder %v1026_v61, 0  ;;  %vm1031_vm0 = vcmp.eq.s32.totalorder %v1026_v61, 2 }
 0x18a   :  { %v700_v2 = vand.u32 2147483647, %v699_v25  ;;  %v1137_v25 = vsel %vm1135_vm15, %v1136_v38, %v4654_v28  ;;  %v1030_v10 = vsel %vm1028_vm2, %v4658_v29, %v1029_v17  ;;  %v1033_v20 = vsel %vm1031_vm0, %v1032_v7, %v4656_v42 }
 0x18b   :  { %4338 = vmatmul.mubr.msk.bf16.gmra.mrb[12].mxu1 %vm1734_vm9, %v6222_v46  ;;  %v4660_v55 = vpop.eup %4659  ;;  %vm1131_vm1 = vcmp.lt.s32.totalorder %v1130_v4, 2  ;;  %v261_v43 = vadd.f32 %v249_v0, %v194_v15  ;;  %vm1027_vm3 = vcmp.lt.s32.totalorder %v1026_v61, 2  ;;  %vm400_vm12 = vweird.f32 %v7200_v39  ;;  %v6309_v39 = vld [vmem:[%s7067_s8] sm:$0xff]  }
 0x18c   :  { %v703_v30 = vmul.f32 %v702_v26, %v700_v2  ;;  %2246 = vmatprep.mubr.bf16.mxu1 %v7220_v53  ;;  %v248_v2 = vmul.f32 %v7230_v31, %v5796_v49  ;;  %v713_v26 = vadd.s32 3, %v709_v1  ;;  %v1138_v41 = vsel %vm1131_vm1, %v1134_v51, %v1137_v25 }
 0x18d   :  { %v4662_v8 = vpop.eup %4661  ;;  %v1034_v45 = vsel %vm1027_vm3, %v1030_v10, %v1033_v20  ;;  %v1139_v19 = vsel %vm1128_vm6, nan, %v1138_v41  ;;  %v297_v14 = vadd.f32 %v5848_v6, %v261_v43  ;;  %vm712_vm15 = vweird.f32 %v7206_v21 }
 0x18e   :  { %v704_v63 = vxor.u32 2147483648, %v703_v30  ;;  %v405_v40 = vxor.u32 2147483648, %v4662_v8  ;;  %v714_v57 = vand.u32 3, %v713_v26  ;;  %v260_v28 = vadd.f32 %v248_v2, %v193_v50 }
 0x18f   :  { %v1035_v58 = vsel %vm1024_vm14, nan, %v1034_v45  ;;  %v1580_v29 = vpack.c.bf16 %v297_v14, %v1139_v19 }
 0x190   :  { %v705_v11 = vsel %vm622_vm8, %v704_v63, %v703_v30  ;;  %v402_v30 = vand.u32 3, %v401_v5  ;;  %v408_v63 = vxor.u32 2147483648, %v4660_v55  ;;  %vm719_vm5 = vcmp.eq.s32.totalorder %v714_v57, 2 }
 0x191   :  { %v708_v23 = vsel %vm6248_vm11, %v7206_v21, %v705_v11  ;;  %v296_v62 = vadd.f32 %v5848_v6, %v260_v28  ;;  %vm716_vm8 = vcmp.eq.s32.totalorder %v714_v57, 0  ;;  %vm715_vm11 = vcmp.lt.s32.totalorder %v714_v57, 2  ;;  %v6312_v21 = vpop.permute.xlu1 %1616 }
 0x192   :  { %4663 = vcosq.f32 %v708_v23  ;;  %vm404_vm7 = vcmp.eq.s32.totalorder %v402_v30, 0  ;;  %vm407_vm13 = vcmp.eq.s32.totalorder %v402_v30, 2  ;;  %vm403_vm4 = vcmp.lt.s32.totalorder %v402_v30, 2 }
 0x193   :  { %4665 = vsinq.f32 %v708_v23  ;;  %v406_v42 = vsel %vm404_vm7, %v4660_v55, %v405_v40  ;;  %v409_v13 = vsel %vm407_vm13, %v408_v63, %v4662_v8  ;;  %v1579_v60 = vpack.c.bf16 %v296_v62, %v1035_v58 }
 0x194   :  { %v410_v37 = vsel %vm403_vm4, %v406_v42, %v409_v13  ;;  %v6273_v38 = vand.u32 %v6111_v48, %v1580_v29 }
 0x195   :  { %v411_v27 = vsel %vm400_vm12, nan, %v410_v37  ;;  %v6279_v6 = vand.u32 %v6111_v48, %v1579_v60  ;;  %v6316_v48 = vpop.permute.xlu0 %1621 }
 0x19c   :  { %v4664_v49 = vpop.eup %4663 }
 0x19d   :  { %v4666_v12 = vpop.eup %4665  ;;  %v720_v4 = vxor.u32 2147483648, %v4664_v49 }
 0x19e   :  { %v717_v52 = vxor.u32 2147483648, %v4666_v12 }
 0x19f   :  { %v721_v11 = vsel %vm719_vm5, %v720_v4, %v4666_v12 }
 0x1a0   :  { %v718_v9 = vsel %vm716_vm8, %v4664_v49, %v717_v52 }
 0x1a1   :  { %v722_v34 = vsel %vm715_vm11, %v718_v9, %v721_v11 }
 0x1a2   :  { %v723_v36 = vsel %vm712_vm15, nan, %v722_v34 }
 0x1a3   :  { %v6275_v23 = vpack.c.bf16 %v723_v36, %v411_v27 }
 0x1a5   :  { %1773 = vmatpush1.bf16.msra.mxu0 %v6275_v23 }
 0x1a6   :  { %1774 = vmatprep.subr.bf16.mxu0 %v6273_v38 }
 0x1a9   :  { %1775 = vmatpush1.bf16.msra.mxu0 %v6279_v6 }
 0x1ac   :  { %4174 = vmatmul.mubr.msk.bf16.vlgmr.msra.gmra.mrb[0].mxu0 %vm1734_vm9, %v6090_v56  ;;  %v6314_v56 = vpop.permute.xlu1 %1626 }
 0x1ad   :  { %1814 = vmatprep.mubr.bf16.mxu0 %v7220_v53 }
 0x1b4   :  { %4175 = vmatmul.mubr.msk.bf16.gmra.mrb[4].mxu0 %vm1734_vm9, %v6120_v33  ;;  %v6318_v33 = vpop.permute.xlu1 %1631 }
 0x1b5   :  { %1824 = vmatprep.mubr.bf16.mxu0 %v7220_v53 }
 0x1bc   :  { %4176 = vmatmul.mubr.msk.bf16.gmra.mrb[8].mxu0 %vm1734_vm9, %v6126_v59  ;;  %v6320_v59 = vpop.permute.xlu0 %1636 }
 0x1bd   :  { %1834 = vmatprep.mubr.bf16.mxu0 %v7220_v53 }
 0x1c4   :  { %4177 = vmatmul.mubr.msk.bf16.gmra.mrb[12].mxu0 %vm1734_vm9, %v6151_v54  ;;  %v6322_v54 = vpop.permute.xlu1 %1641 }
 0x1c5   :  { %1844 = vmatprep.mubr.bf16.mxu0 %v7220_v53 }
 0x1c8   :  { %v6327_v3 = vpop.permute.xlu1 %1651 }
 0x1cc   :  { %4178 = vmatmul.mubr.msk.bf16.gmra.mrb[16].mxu0 %vm1734_vm9, %v6156_v32  ;;  %v6324_v32 = vpop.permute.xlu0 %1646  ;;  %v6334_v50 = vpop.permute.xlu1 %1661 }
 0x1cd   :  { %1854 = vmatprep.mubr.bf16.mxu0 %v7220_v53 }
 0x1d0   :  { %v6332_v15 = vpop.permute.xlu0 %1656  ;;  %v6342_v57 = vpop.permute.xlu1 %1671 }
 0x1d4   :  { %4179 = vmatmul.mubr.msk.bf16.gmra.mrb[20].mxu0 %vm1734_vm9, %v6180_v35  ;;  %v6339_v41 = vpop.permute.xlu0 %1666  ;;  %v6349_v37 = vpop.permute.xlu1 %1681 }
 0x1d5   :  { %1864 = vmatprep.mubr.bf16.mxu0 %v7220_v53 }
 0x1d8   :  { %v6345_v12 = vpop.permute.xlu0 %1676 }
 0x1dc   :  { %4180 = vmatmul.mubr.msk.bf16.gmra.mrb[24].mxu0 %vm1734_vm9, %v6191_v16  ;;  %v6352_v36 = vpop.permute.xlu0 %1686 }
 0x1dd   :  { %1874 = vmatprep.mubr.bf16.mxu0 %v7220_v53 }
 0x1e4   :  { %4181 = vmatmul.mubr.msk.bf16.gmra.mrb[28].mxu0 %vm1734_vm9, %v6222_v46 }
 0x1e5   :  { %4357 = vmatprep.mubr.bf16.mxu0 %v6309_v39 }
 0x246   :  { %v4327_v35 = vpop.f32.mrb[0].mxu1 }
 0x247   :  { %v1928_v16 = vadd.f32 %v4327_v35, %v6314_v56  ;;  %v1919_v46 = vpop.f32.mrb[1].mxu1 }
 0x248   :  { %v1920_v47 = vadd.f32 %v1919_v46, %v6312_v21  ;;  %v4328_v61 = vpop.f32.mrb[2].mxu1 }
 0x249   :  { %v1931_v17 = vadd.f32 %v4328_v61, %v6318_v33  ;;  %v1922_v7 = vpop.f32.mrb[3].mxu1  ;;  %v1990_v1 = vmax.f32 %v1928_v16, 0.0  ;;  %v6355_v61 = vpop.permute.xlu1 %1691 }
 0x24a   :  { %v1923_v5 = vadd.f32 %v1922_v7, %v6316_v48  ;;  %v1984_v44 = vmax.f32 %v1920_v47, 0.0 }
 0x24b   :  { %v1993_v55 = vmax.f32 %v1931_v17, 0.0 }
 0x24c   :  { %v1987_v0 = vmax.f32 %v1923_v5, 0.0 }
 0x24d   :  { %v2035_v8 = vpack.c.bf16 %v1993_v55, %v1990_v1 }
 0x24e   :  { %v2032_v51 = vpack.c.bf16 %v1987_v0, %v1984_v44  ;;  %v4331_v25 = vpop.f32.mrb[4].mxu1 }
 0x24f   :  { %v1944_v31 = vadd.f32 %v4331_v25, %v6324_v32  ;;  %v1935_v2 = vpop.f32.mrb[5].mxu1 }
 0x250   :  { %v1936_v26 = vadd.f32 %v1935_v2, %v6320_v59  ;;  %v4332_v10 = vpop.f32.mrb[6].mxu1  ;;  %4341 = vmatprep.subr.bf16.mxu0 %v2032_v51  ;;  %v6363_v2 = vld [vmem:[%s7067_s8 + $0x8] sm:$0xff]  }
 0x251   :  { %v2002_v20 = vmax.f32 %v1944_v31, 0.0  ;;  %v1947_v30 = vadd.f32 %v4332_v10, %v6327_v3  ;;  %v1938_v43 = vpop.f32.mrb[7].mxu1  ;;  %4342 = vmatpush3.bf16.msra.mxu0 %v2032_v51  ;;  %v6375_v10 = vld [vmem:[%s7067_s8 + $0x18] sm:$0xff]  }
 0x252   :  { %v1996_v40 = vmax.f32 %v1936_v26, 0.0  ;;  %v1939_v63 = vadd.f32 %v1938_v43, %v6322_v54  ;;  %4343 = vmatprep.subr.bf16.mxu0 %v2035_v8  ;;  %v6368_v26 = vld [vmem:[%s7067_s8 + $0x10] sm:$0xff]  }
 0x253   :  { %v2005_v45 = vmax.f32 %v1947_v30, 0.0  ;;  %v6387_v30 = vld [vmem:[%s7067_s8 + $0x28] sm:$0xff]   ;;  %v6392_v43 = vld [vmem:[%s7067_s8 + $0x30] sm:$0xff]  }
 0x254   :  { %v1999_v28 = vmax.f32 %v1939_v63, 0.0 }
 0x255   :  { %v2041_v19 = vpack.c.bf16 %v2005_v45, %v2002_v20  ;;  %4344 = vmatpush3.bf16.msra.mxu0 %v2035_v8  ;;  %v6380_v20 = vld [vmem:[%s7067_s8 + $0x20] sm:$0xff]  }
 0x256   :  { %v2038_v49 = vpack.c.bf16 %v1999_v28, %v1996_v40  ;;  %v4335_v14 = vpop.f32.mrb[8].mxu1 }
 0x257   :  { %v1960_v42 = vadd.f32 %v4335_v14, %v6339_v41  ;;  %v1951_v13 = vpop.f32.mrb[9].mxu1 }
 0x258   :  { %v1952_v58 = vadd.f32 %v1951_v13, %v6332_v15  ;;  %v4336_v4 = vpop.f32.mrb[10].mxu1  ;;  %4345 = vmatprep.subr.bf16.mxu0 %v2038_v49 }
 0x259   :  { %v2014_v29 = vmax.f32 %v1960_v42, 0.0  ;;  %v1963_v52 = vadd.f32 %v4336_v4, %v6342_v57  ;;  %v1954_v62 = vpop.f32.mrb[11].mxu1  ;;  %4346 = vmatpush3.bf16.msra.mxu0 %v2038_v49  ;;  %v6403_v4 = vld [vmem:[%s7067_s8 + $0x38] sm:$0xff]  }
 0x25a   :  { %v2008_v11 = vmax.f32 %v1952_v58, 0.0  ;;  %v1955_v9 = vadd.f32 %v1954_v62, %v6334_v50  ;;  %4347 = vmatprep.subr.bf16.mxu0 %v2041_v19 }
 0x25b   :  { %v2017_v60 = vmax.f32 %v1963_v52, 0.0 }
 0x25c   :  { %v2011_v34 = vmax.f32 %v1955_v9, 0.0 }
 0x25d   :  { %v2047_v27 = vpack.c.bf16 %v2017_v60, %v2014_v29  ;;  %4348 = vmatpush3.bf16.msra.mxu0 %v2041_v19 }
 0x25e   :  { %v2044_v35 = vpack.c.bf16 %v2011_v34, %v2008_v11  ;;  %v4339_v16 = vpop.f32.mrb[12].mxu1 }
 0x25f   :  { %v1976_v46 = vadd.f32 %v4339_v16, %v6352_v36  ;;  %v1967_v47 = vpop.f32.mrb[13].mxu1 }
 0x260   :  { %v1968_v17 = vadd.f32 %v1967_v47, %v6345_v12  ;;  %v4340_v7 = vpop.f32.mrb[14].mxu1  ;;  %4349 = vmatprep.subr.bf16.mxu0 %v2044_v35 }
 0x261   :  { %v2026_v5 = vmax.f32 %v1976_v46, 0.0  ;;  %v1979_v1 = vadd.f32 %v4340_v7, %v6355_v61  ;;  %v1970_v55 = vpop.f32.mrb[15].mxu1  ;;  %4350 = vmatpush3.bf16.msra.mxu0 %v2044_v35 }
 0x262   :  { %v2020_v44 = vmax.f32 %v1968_v17, 0.0  ;;  %v1971_v0 = vadd.f32 %v1970_v55, %v6349_v37  ;;  %4351 = vmatprep.subr.bf16.mxu0 %v2047_v27 }
 0x263   :  { %v2029_v8 = vmax.f32 %v1979_v1, 0.0 }
 0x264   :  { %v2023_v51 = vmax.f32 %v1971_v0, 0.0 }
 0x265   :  { %v2053_v25 = vpack.c.bf16 %v2029_v8, %v2026_v5  ;;  %4352 = vmatpush3.bf16.msra.mxu0 %v2047_v27 }
 0x266   :  { %v2050_v31 = vpack.c.bf16 %v2023_v51, %v2020_v44 }
 0x268   :  { %4353 = vmatprep.subr.bf16.mxu0 %v2050_v31 }
 0x269   :  { %4354 = vmatpush3.bf16.msra.mxu0 %v2050_v31 }
 0x26a   :  { %4355 = vmatprep.subr.bf16.mxu0 %v2053_v25 }
 0x26d   :  { %4356 = vmatpush3.bf16.msra.mxu0 %v2053_v25 }
 0x270   :  { %4358 = vmatmul.mubr.bf16.vlgmr.msra.gmra.mrb[32].mxu0 %v6363_v2 }
 0x271   :  { %4361 = vmatprep.mubr.bf16.mxu0 %v6368_v26 }
 0x278   :  { %4362 = vmatmul.mubr.bf16.gmra.mrb[36].mxu0 %v6375_v10 }
 0x279   :  { %4365 = vmatprep.mubr.bf16.mxu0 %v6380_v20 }
 0x27f   :  { %v1806_v40 = vpop.f32.mrb[0].mxu0 }
 0x280   :  { %v1807_v63 = vadd.f32 %v1806_v40, %v6312_v21  ;;  %v1808_v45 = vpop.f32.mrb[1].mxu0  ;;  %4366 = vmatmul.mubr.bf16.gmra.mrb[40].mxu0 %v6387_v30 }
 0x281   :  { %v1809_v28 = vadd.f32 %v1808_v45, %v6312_v21  ;;  %v1810_v19 = vpop.f32.mrb[2].mxu0  ;;  %4369 = vmatprep.mubr.bf16.mxu0 %v6392_v43 }
 0x282   :  { %v1811_v49 = vadd.f32 %v1810_v19, %v6316_v48  ;;  %v1812_v14 = vpop.f32.mrb[3].mxu0  ;;  %v1982_v13 = vmax.f32 %v1807_v63, 0.0 }
 0x283   :  { %v1813_v42 = vadd.f32 %v1812_v14, %v6316_v48  ;;  %v1983_v29 = vmax.f32 %v1809_v28, 0.0 }
 0x284   :  { %v1985_v58 = vmax.f32 %v1811_v49, 0.0 }
 0x285   :  { %v1986_v52 = vmax.f32 %v1813_v42, 0.0 }
 0x286   :  { %v2030_v62 = vpack.c.bf16 %v1985_v58, %v1982_v13 }
 0x287   :  { %v2031_v11 = vpack.c.bf16 %v1986_v52, %v1983_v29  ;;  %v1816_v21 = vpop.f32.mrb[4].mxu0 }
 0x288   :  { %v1817_v9 = vadd.f32 %v1816_v21, %v6314_v56  ;;  %v1818_v60 = vpop.f32.mrb[5].mxu0  ;;  %4370 = vmatmul.mubr.bf16.gmra.mrb[44].mxu0 %v6403_v4 }
 0x289   :  { %v1819_v34 = vadd.f32 %v1818_v60, %v6314_v56  ;;  %v1820_v48 = vpop.f32.mrb[6].mxu0  ;;  %2214 = vmatprep.subr.bf16.mxu1 %v2031_v11  ;;  %2688 = vmatprep.mubr.bf16.mxu0 %v7220_v53 }
 0x28a   :  { %v1821_v27 = vadd.f32 %v1820_v48, %v6318_v33  ;;  %v1822_v35 = vpop.f32.mrb[7].mxu0  ;;  %2215 = vmatpush1.bf16.msra.mxu1 %v2030_v62  ;;  %v1988_v46 = vmax.f32 %v1817_v9, 0.0 }
 0x28b   :  { %v1823_v16 = vadd.f32 %v1822_v35, %v6318_v33  ;;  %v1989_v17 = vmax.f32 %v1819_v34, 0.0 }
 0x28c   :  { %v1991_v47 = vmax.f32 %v1821_v27, 0.0 }
 0x28d   :  { %v1992_v7 = vmax.f32 %v1823_v16, 0.0 }
 0x28e   :  { %v2033_v5 = vpack.c.bf16 %v1991_v47, %v1988_v46 }
 0x28f   :  { %v2034_v1 = vpack.c.bf16 %v1992_v7, %v1989_v17  ;;  %v1826_v55 = vpop.f32.mrb[8].mxu0 }
 0x290   :  { %v1827_v44 = vadd.f32 %v1826_v55, %v6320_v59  ;;  %v1828_v56 = vpop.f32.mrb[9].mxu0 }
 0x291   :  { %v1829_v0 = vadd.f32 %v1828_v56, %v6320_v59  ;;  %v1830_v8 = vpop.f32.mrb[10].mxu0  ;;  %2216 = vmatprep.subr.bf16.mxu1 %v2034_v1 }
 0x292   :  { %v1831_v51 = vadd.f32 %v1830_v8, %v6322_v54  ;;  %v1832_v25 = vpop.f32.mrb[11].mxu0  ;;  %2217 = vmatpush1.bf16.msra.mxu1 %v2033_v5  ;;  %v1994_v31 = vmax.f32 %v1827_v44, 0.0 }
 0x293   :  { %v1833_v33 = vadd.f32 %v1832_v25, %v6322_v54  ;;  %v1995_v63 = vmax.f32 %v1829_v0, 0.0 }
 0x294   :  { %v1997_v40 = vmax.f32 %v1831_v51, 0.0 }
 0x295   :  { %v1998_v45 = vmax.f32 %v1833_v33, 0.0 }
 0x296   :  { %v2036_v28 = vpack.c.bf16 %v1997_v40, %v1994_v31 }
 0x297   :  { %v2037_v19 = vpack.c.bf16 %v1998_v45, %v1995_v63  ;;  %v1836_v49 = vpop.f32.mrb[12].mxu0 }
 0x298   :  { %v1837_v14 = vadd.f32 %v1836_v49, %v6324_v32  ;;  %v1838_v42 = vpop.f32.mrb[13].mxu0 }
 0x299   :  { %v1839_v59 = vadd.f32 %v1838_v42, %v6324_v32  ;;  %v1840_v13 = vpop.f32.mrb[14].mxu0  ;;  %2218 = vmatprep.subr.bf16.mxu1 %v2037_v19 }
 0x29a   :  { %v1841_v58 = vadd.f32 %v1840_v13, %v6327_v3  ;;  %v1842_v29 = vpop.f32.mrb[15].mxu0  ;;  %2219 = vmatpush1.bf16.msra.mxu1 %v2036_v28  ;;  %v2000_v52 = vmax.f32 %v1837_v14, 0.0 }
 0x29b   :  { %v1843_v54 = vadd.f32 %v1842_v29, %v6327_v3  ;;  %v2001_v11 = vmax.f32 %v1839_v59, 0.0 }
 0x29c   :  { %v2003_v62 = vmax.f32 %v1841_v58, 0.0 }
 0x29d   :  { %v2004_v21 = vmax.f32 %v1843_v54, 0.0 }
 0x29e   :  { %v2039_v9 = vpack.c.bf16 %v2003_v62, %v2000_v52 }
 0x29f   :  { %v2040_v60 = vpack.c.bf16 %v2004_v21, %v2001_v11  ;;  %v1846_v34 = vpop.f32.mrb[16].mxu0 }
 0x2a0   :  { %v1847_v48 = vadd.f32 %v1846_v34, %v6332_v15  ;;  %v1848_v27 = vpop.f32.mrb[17].mxu0 }
 0x2a1   :  { %v1849_v32 = vadd.f32 %v1848_v27, %v6332_v15  ;;  %v1850_v35 = vpop.f32.mrb[18].mxu0  ;;  %2220 = vmatprep.subr.bf16.mxu1 %v2040_v60 }
 0x2a2   :  { %v1851_v16 = vadd.f32 %v1850_v35, %v6334_v50  ;;  %v1852_v46 = vpop.f32.mrb[19].mxu0  ;;  %2221 = vmatpush1.bf16.msra.mxu1 %v2039_v9  ;;  %v2006_v47 = vmax.f32 %v1847_v48, 0.0 }
 0x2a3   :  { %v1853_v3 = vadd.f32 %v1852_v46, %v6334_v50  ;;  %v2007_v7 = vmax.f32 %v1849_v32, 0.0 }
 0x2a4   :  { %v2009_v17 = vmax.f32 %v1851_v16, 0.0 }
 0x2a5   :  { %v2010_v5 = vmax.f32 %v1853_v3, 0.0 }
 0x2a6   :  { %v2042_v1 = vpack.c.bf16 %v2009_v17, %v2006_v47 }
 0x2a7   :  { %v2043_v55 = vpack.c.bf16 %v2010_v5, %v2007_v7  ;;  %v1856_v44 = vpop.f32.mrb[20].mxu0 }
 0x2a8   :  { %v1857_v56 = vadd.f32 %v1856_v44, %v6339_v41  ;;  %v1858_v0 = vpop.f32.mrb[21].mxu0 }
 0x2a9   :  { %v1859_v15 = vadd.f32 %v1858_v0, %v6339_v41  ;;  %v1860_v8 = vpop.f32.mrb[22].mxu0  ;;  %2222 = vmatprep.subr.bf16.mxu1 %v2043_v55 }
 0x2aa   :  { %v1861_v51 = vadd.f32 %v1860_v8, %v6342_v57  ;;  %v1862_v25 = vpop.f32.mrb[23].mxu0  ;;  %2223 = vmatpush1.bf16.msra.mxu1 %v2042_v1  ;;  %v2012_v33 = vmax.f32 %v1857_v56, 0.0 }
 0x2ab   :  { %v1863_v50 = vadd.f32 %v1862_v25, %v6342_v57  ;;  %v2013_v40 = vmax.f32 %v1859_v15, 0.0 }
 0x2ac   :  { %v2015_v31 = vmax.f32 %v1861_v51, 0.0 }
 0x2ad   :  { %v2016_v63 = vmax.f32 %v1863_v50, 0.0 }
 0x2ae   :  { %v2045_v45 = vpack.c.bf16 %v2015_v31, %v2012_v33 }
 0x2af   :  { %v2046_v28 = vpack.c.bf16 %v2016_v63, %v2013_v40  ;;  %v1866_v19 = vpop.f32.mrb[24].mxu0 }
 0x2b0   :  { %v1867_v49 = vadd.f32 %v1866_v19, %v6345_v12  ;;  %v1868_v14 = vpop.f32.mrb[25].mxu0 }
 0x2b1   :  { %v1869_v41 = vadd.f32 %v1868_v14, %v6345_v12  ;;  %v1870_v42 = vpop.f32.mrb[26].mxu0  ;;  %2224 = vmatprep.subr.bf16.mxu1 %v2046_v28 }
 0x2b2   :  { %v1871_v59 = vadd.f32 %v1870_v42, %v6349_v37  ;;  %v1872_v13 = vpop.f32.mrb[27].mxu0  ;;  %2225 = vmatpush1.bf16.msra.mxu1 %v2045_v45  ;;  %v2018_v58 = vmax.f32 %v1867_v49, 0.0 }
 0x2b3   :  { %v1873_v57 = vadd.f32 %v1872_v13, %v6349_v37  ;;  %v2019_v54 = vmax.f32 %v1869_v41, 0.0 }
 0x2b4   :  { %v2021_v29 = vmax.f32 %v1871_v59, 0.0 }
 0x2b5   :  { %v2022_v52 = vmax.f32 %v1873_v57, 0.0 }
 0x2b6   :  { %v2048_v62 = vpack.c.bf16 %v2021_v29, %v2018_v58 }
 0x2b7   :  { %v2049_v11 = vpack.c.bf16 %v2022_v52, %v2019_v54  ;;  %v1876_v21 = vpop.f32.mrb[28].mxu0 }
 0x2b8   :  { %v1877_v9 = vadd.f32 %v1876_v21, %v6352_v36  ;;  %v1878_v60 = vpop.f32.mrb[29].mxu0 }
 0x2b9   :  { %v1879_v12 = vadd.f32 %v1878_v60, %v6352_v36  ;;  %v1880_v34 = vpop.f32.mrb[30].mxu0  ;;  %2226 = vmatprep.subr.bf16.mxu1 %v2049_v11  ;;  %v6456_v36 = vpop.permute.xlu0 %2088 }
 0x2ba   :  { %v1881_v48 = vadd.f32 %v1880_v34, %v6355_v61  ;;  %v1882_v27 = vpop.f32.mrb[31].mxu0  ;;  %2227 = vmatpush1.bf16.msra.mxu1 %v2048_v62  ;;  %v2024_v32 = vmax.f32 %v1877_v9, 0.0 }
 0x2bb   :  { %v1883_v37 = vadd.f32 %v1882_v27, %v6355_v61  ;;  %v2025_v16 = vmax.f32 %v1879_v12, 0.0  ;;  %v6458_v61 = vpop.permute.xlu1 %2093 }
 0x2bc   :  { %v2027_v35 = vmax.f32 %v1881_v48, 0.0 }
 0x2bd   :  { %v2028_v46 = vmax.f32 %v1883_v37, 0.0 }
 0x2be   :  { %v2051_v3 = vpack.c.bf16 %v2027_v35, %v2024_v32 }
 0x2bf   :  { %v2052_v47 = vpack.c.bf16 %v2028_v46, %v2025_v16 }
 0x2c1   :  { %2228 = vmatprep.subr.bf16.mxu1 %v2052_v47 }
 0x2c2   :  { %2229 = vmatpush1.bf16.msra.mxu1 %v2051_v3 }
 0x2c5   :  { %2247 = vmatmul.mubr.bf16.vlgmr.msra.gmra.mrb[16].mxu1 %v6309_v39  ;;  %v6453_v39 = vld [vmem:[%s7069_s10] sm:$0xff]  }
 0x2c6   :  { %2256 = vmatprep.mubr.bf16.mxu1 %v7220_v53 }
 0x2cd   :  { %2257 = vmatmul.mubr.bf16.gmra.mrb[20].mxu1 %v6363_v2  ;;  %v6460_v2 = vpop.permute.xlu0 %2098 }
 0x2ce   :  { %2266 = vmatprep.mubr.bf16.mxu1 %v7220_v53 }
 0x2d5   :  { %2267 = vmatmul.mubr.bf16.gmra.mrb[24].mxu1 %v6368_v26  ;;  %v6462_v26 = vpop.permute.xlu1 %2103 }
 0x2d6   :  { %2276 = vmatprep.mubr.bf16.mxu1 %v7220_v53 }
 0x2dd   :  { %2277 = vmatmul.mubr.bf16.gmra.mrb[28].mxu1 %v6375_v10  ;;  %v6464_v10 = vpop.permute.xlu0 %2108 }
 0x2de   :  { %2286 = vmatprep.mubr.bf16.mxu1 %v7220_v53 }
 0x2e5   :  { %2287 = vmatmul.mubr.bf16.gmra.mrb[32].mxu1 %v6380_v20  ;;  %v6466_v20 = vpop.permute.xlu1 %2113 }
 0x2e6   :  { %2296 = vmatprep.mubr.bf16.mxu1 %v7220_v53 }
 0x2e9   :  { %v6471_v7 = vpop.permute.xlu1 %2123 }
 0x2ed   :  { %2297 = vmatmul.mubr.bf16.gmra.mrb[36].mxu1 %v6387_v30  ;;  %v6468_v30 = vpop.permute.xlu0 %2118  ;;  %v6478_v33 = vpop.permute.xlu1 %2133 }
 0x2ee   :  { %2306 = vmatprep.mubr.bf16.mxu1 %v7220_v53 }
 0x2f1   :  { %v6476_v8 = vpop.permute.xlu0 %2128  ;;  %v6486_v57 = vpop.permute.xlu1 %2143 }
 0x2f5   :  { %2307 = vmatmul.mubr.bf16.gmra.mrb[40].mxu1 %v6392_v43  ;;  %v6483_v41 = vpop.permute.xlu0 %2138  ;;  %v6493_v27 = vpop.permute.xlu1 %2153 }
 0x2f6   :  { %2316 = vmatprep.mubr.bf16.mxu1 %v7220_v53 }
 0x2f9   :  { %v6489_v9 = vpop.permute.xlu0 %2148 }
 0x2fd   :  { %2317 = vmatmul.mubr.bf16.gmra.mrb[44].mxu1 %v6403_v4  ;;  %v6496_v47 = vpop.permute.xlu0 %2158 }
 0x2fe   :  { %4389 = vmatprep.mubr.bf16.mxu1 %v6453_v39 }
 0x343   :  { %v4359_v43 = vpop.f32.mrb[32].mxu0 }
 0x344   :  { %v2370_v4 = vadd.f32 %v4359_v43, %v6460_v2  ;;  %v2361_v17 = vpop.f32.mrb[33].mxu0 }
 0x345   :  { %v2362_v5 = vadd.f32 %v2361_v17, %v6456_v36  ;;  %v4360_v1 = vpop.f32.mrb[34].mxu0 }
 0x346   :  { %v2373_v55 = vadd.f32 %v4360_v1, %v6462_v26  ;;  %v2364_v44 = vpop.f32.mrb[35].mxu0  ;;  %v2432_v0 = vmax.f32 %v2370_v4, 0.0  ;;  %v6499_v1 = vpop.permute.xlu1 %2163 }
 0x347   :  { %v2365_v56 = vadd.f32 %v2364_v44, %v6458_v61  ;;  %v2426_v51 = vmax.f32 %v2362_v5, 0.0 }
 0x348   :  { %v2435_v15 = vmax.f32 %v2373_v55, 0.0 }
 0x349   :  { %v2429_v25 = vmax.f32 %v2365_v56, 0.0 }
 0x34a   :  { %v2477_v50 = vpack.c.bf16 %v2435_v15, %v2432_v0 }
 0x34b   :  { %v2474_v31 = vpack.c.bf16 %v2429_v25, %v2426_v51  ;;  %v4363_v40 = vpop.f32.mrb[36].mxu0 }
 0x34c   :  { %v2386_v63 = vadd.f32 %v4363_v40, %v6468_v30  ;;  %v2377_v45 = vpop.f32.mrb[37].mxu0 }
 0x34d   :  { %v2378_v28 = vadd.f32 %v2377_v45, %v6464_v10  ;;  %v4364_v19 = vpop.f32.mrb[38].mxu0  ;;  %4373 = vmatprep.subr.bf16.mxu1 %v2474_v31  ;;  %v6507_v45 = vld [vmem:[%s7069_s10 + $0x8] sm:$0xff]  }
 0x34e   :  { %v2389_v49 = vadd.f32 %v4364_v19, %v6471_v7  ;;  %v2380_v14 = vpop.f32.mrb[39].mxu0  ;;  %4374 = vmatpush3.bf16.msra.mxu1 %v2474_v31  ;;  %v2444_v59 = vmax.f32 %v2386_v63, 0.0  ;;  %v6522_v19 = vld [vmem:[%s7069_s10 + $0x18] sm:$0xff]  }
 0x34f   :  { %v2381_v42 = vadd.f32 %v2380_v14, %v6466_v20  ;;  %4375 = vmatprep.subr.bf16.mxu1 %v2477_v50  ;;  %v2438_v58 = vmax.f32 %v2378_v28, 0.0  ;;  %v6512_v28 = vld [vmem:[%s7069_s10 + $0x10] sm:$0xff]  }
 0x350   :  { %v2447_v13 = vmax.f32 %v2389_v49, 0.0  ;;  %v6528_v49 = vld [vmem:[%s7069_s10 + $0x20] sm:$0xff]  }
 0x351   :  { %v2441_v29 = vmax.f32 %v2381_v42, 0.0 }
 0x352   :  { %v2483_v54 = vpack.c.bf16 %v2447_v13, %v2444_v59  ;;  %4376 = vmatpush3.bf16.msra.mxu1 %v2477_v50 }
 0x353   :  { %v2480_v52 = vpack.c.bf16 %v2441_v29, %v2438_v58  ;;  %v4367_v62 = vpop.f32.mrb[40].mxu0 }
 0x354   :  { %v2402_v11 = vadd.f32 %v4367_v62, %v6483_v41  ;;  %v2393_v21 = vpop.f32.mrb[41].mxu0 }
 0x355   :  { %v2394_v60 = vadd.f32 %v2393_v21, %v6476_v8  ;;  %v4368_v12 = vpop.f32.mrb[42].mxu0  ;;  %4377 = vmatprep.subr.bf16.mxu1 %v2480_v52 }
 0x356   :  { %v2405_v34 = vadd.f32 %v4368_v12, %v6486_v57  ;;  %v2396_v48 = vpop.f32.mrb[43].mxu0  ;;  %4378 = vmatpush3.bf16.msra.mxu1 %v2480_v52  ;;  %v2456_v32 = vmax.f32 %v2402_v11, 0.0 }
 0x357   :  { %v2397_v37 = vadd.f32 %v2396_v48, %v6478_v33  ;;  %4379 = vmatprep.subr.bf16.mxu1 %v2483_v54  ;;  %v2450_v16 = vmax.f32 %v2394_v60, 0.0 }
 0x358   :  { %v2459_v35 = vmax.f32 %v2405_v34, 0.0 }
 0x359   :  { %v2453_v46 = vmax.f32 %v2397_v37, 0.0 }
 0x35a   :  { %v2489_v3 = vpack.c.bf16 %v2459_v35, %v2456_v32  ;;  %4380 = vmatpush3.bf16.msra.mxu1 %v2483_v54 }
 0x35b   :  { %v2486_v43 = vpack.c.bf16 %v2453_v46, %v2450_v16  ;;  %v4371_v4 = vpop.f32.mrb[44].mxu0 }
 0x35c   :  { %v2418_v17 = vadd.f32 %v4371_v4, %v6496_v47  ;;  %v2409_v5 = vpop.f32.mrb[45].mxu0 }
 0x35d   :  { %v2410_v55 = vadd.f32 %v2409_v5, %v6489_v9  ;;  %v4372_v44 = vpop.f32.mrb[46].mxu0  ;;  %4381 = vmatprep.subr.bf16.mxu1 %v2486_v43 }
 0x35e   :  { %v2421_v56 = vadd.f32 %v4372_v44, %v6499_v1  ;;  %v2412_v0 = vpop.f32.mrb[47].mxu0  ;;  %4382 = vmatpush3.bf16.msra.mxu1 %v2486_v43  ;;  %v2468_v51 = vmax.f32 %v2418_v17, 0.0 }
 0x35f   :  { %v2413_v15 = vadd.f32 %v2412_v0, %v6493_v27  ;;  %4383 = vmatprep.subr.bf16.mxu1 %v2489_v3  ;;  %v2462_v50 = vmax.f32 %v2410_v55, 0.0 }
 0x360   :  { %v2471_v25 = vmax.f32 %v2421_v56, 0.0 }
 0x361   :  { %v2465_v31 = vmax.f32 %v2413_v15, 0.0 }
 0x362   :  { %v2495_v40 = vpack.c.bf16 %v2471_v25, %v2468_v51  ;;  %4384 = vmatpush3.bf16.msra.mxu1 %v2489_v3 }
 0x363   :  { %v2492_v63 = vpack.c.bf16 %v2465_v31, %v2462_v50 }
 0x365   :  { %4385 = vmatprep.subr.bf16.mxu1 %v2492_v63 }
 0x366   :  { %4386 = vmatpush3.bf16.msra.mxu1 %v2492_v63 }
 0x367   :  { %4387 = vmatprep.subr.bf16.mxu1 %v2495_v40 }
 0x36a   :  { %4388 = vmatpush3.bf16.msra.mxu1 %v2495_v40 }
 0x36b   :  { %3034 = vmatprep.subr.bf16.mxu1 %v6137_v18  ;;  %v6535_v18 = vld [vmem:[%s7069_s10 + $0x28] sm:$0xff]  }
 0x36d   :  { %4390 = vmatmul.mubr.bf16.vlgmr.msra.gmra.mrb[48].mxu1 %v6507_v45 }
 0x36e   :  { %3035 = vmatpush1.bf16.msra.mxu1 %v6275_v23  ;;  %4393 = vmatprep.mubr.bf16.mxu1 %v6512_v28  ;;  %v6547_v23 = vld [vmem:[%s7069_s10 + $0x38] sm:$0xff]  }
 0x36f   :  { %3036 = vmatprep.subr.bf16.mxu1 %v6273_v38  ;;  %v6540_v38 = vld [vmem:[%s7069_s10 + $0x30] sm:$0xff]  }
 0x372   :  { %3037 = vmatpush1.bf16.msra.mxu1 %v6279_v6 }
 0x375   :  { %4394 = vmatmul.mubr.bf16.gmra.mrb[52].mxu1 %v6522_v19 }
 0x376   :  { %4397 = vmatprep.mubr.bf16.mxu1 %v6528_v49 }
 0x37d   :  { %4398 = vmatmul.mubr.bf16.gmra.mrb[56].mxu1 %v6535_v18 }
 0x37e   :  { %4401 = vmatprep.mubr.bf16.mxu1 %v6540_v38 }
 0x385   :  { %4402 = vmatmul.mubr.bf16.gmra.mrb[60].mxu1 %v6547_v23 }
 0x386   :  { %3066 = vmatprep.mubr.bf16.mxu1 %v7220_v53 }
 0x398   :  { %v2248_v6 = vpop.f32.mrb[16].mxu1 }
 0x399   :  { %v2249_v14 = vadd.f32 %v2248_v6, %v6456_v36  ;;  %v2250_v42 = vpop.f32.mrb[17].mxu1 }
 0x39a   :  { %v2251_v59 = vadd.f32 %v2250_v42, %v6456_v36  ;;  %v2252_v13 = vpop.f32.mrb[18].mxu1 }
 0x39b   :  { %v2253_v58 = vadd.f32 %v2252_v13, %v6458_v61  ;;  %v2254_v29 = vpop.f32.mrb[19].mxu1  ;;  %v2424_v52 = vmax.f32 %v2249_v14, 0.0 }
 0x39c   :  { %v2255_v54 = vadd.f32 %v2254_v29, %v6458_v61  ;;  %v2425_v11 = vmax.f32 %v2251_v59, 0.0 }
 0x39d   :  { %v2427_v62 = vmax.f32 %v2253_v58, 0.0 }
 0x39e   :  { %v2428_v21 = vmax.f32 %v2255_v54, 0.0 }
 0x39f   :  { %v2472_v60 = vpack.c.bf16 %v2427_v62, %v2424_v52 }
 0x3a0   :  { %v2473_v12 = vpack.c.bf16 %v2428_v21, %v2425_v11  ;;  %v2258_v34 = vpop.f32.mrb[20].mxu1 }
 0x3a1   :  { %v2259_v48 = vadd.f32 %v2258_v34, %v6460_v2  ;;  %v2260_v37 = vpop.f32.mrb[21].mxu1 }
 0x3a2   :  { %v2261_v32 = vadd.f32 %v2260_v37, %v6460_v2  ;;  %v2262_v35 = vpop.f32.mrb[22].mxu1  ;;  %2656 = vmatprep.subr.bf16.mxu0 %v2473_v12 }
 0x3a3   :  { %v2263_v36 = vadd.f32 %v2262_v35, %v6462_v26  ;;  %v2264_v16 = vpop.f32.mrb[23].mxu1  ;;  %2657 = vmatpush1.bf16.msra.mxu0 %v2472_v60  ;;  %v2430_v46 = vmax.f32 %v2259_v48, 0.0 }
 0x3a4   :  { %v2265_v61 = vadd.f32 %v2264_v16, %v6462_v26  ;;  %v2431_v43 = vmax.f32 %v2261_v32, 0.0 }
 0x3a5   :  { %v2433_v3 = vmax.f32 %v2263_v36, 0.0 }
 0x3a6   :  { %v2434_v4 = vmax.f32 %v2265_v61, 0.0 }
 0x3a7   :  { %v2475_v17 = vpack.c.bf16 %v2433_v3, %v2430_v46 }
 0x3a8   :  { %v2476_v5 = vpack.c.bf16 %v2434_v4, %v2431_v43  ;;  %v2268_v55 = vpop.f32.mrb[24].mxu1 }
 0x3a9   :  { %v2269_v44 = vadd.f32 %v2268_v55, %v6464_v10  ;;  %v2270_v56 = vpop.f32.mrb[25].mxu1 }
 0x3aa   :  { %v2271_v2 = vadd.f32 %v2270_v56, %v6464_v10  ;;  %v2272_v0 = vpop.f32.mrb[26].mxu1  ;;  %2658 = vmatprep.subr.bf16.mxu0 %v2476_v5 }
 0x3ab   :  { %v2273_v15 = vadd.f32 %v2272_v0, %v6466_v20  ;;  %v2274_v51 = vpop.f32.mrb[27].mxu1  ;;  %2659 = vmatpush1.bf16.msra.mxu0 %v2475_v17  ;;  %v2436_v25 = vmax.f32 %v2269_v44, 0.0 }
 0x3ac   :  { %v2275_v26 = vadd.f32 %v2274_v51, %v6466_v20  ;;  %v2437_v31 = vmax.f32 %v2271_v2, 0.0 }
 0x3ad   :  { %v2439_v50 = vmax.f32 %v2273_v15, 0.0 }
 0x3ae   :  { %v2440_v40 = vmax.f32 %v2275_v26, 0.0 }
 0x3af   :  { %v2478_v63 = vpack.c.bf16 %v2439_v50, %v2436_v25 }
 0x3b0   :  { %v2479_v6 = vpack.c.bf16 %v2440_v40, %v2437_v31  ;;  %v2278_v14 = vpop.f32.mrb[28].mxu1 }
 0x3b1   :  { %v2279_v42 = vadd.f32 %v2278_v14, %v6468_v30  ;;  %v2280_v59 = vpop.f32.mrb[29].mxu1 }
 0x3b2   :  { %v2281_v10 = vadd.f32 %v2280_v59, %v6468_v30  ;;  %v2282_v13 = vpop.f32.mrb[30].mxu1  ;;  %2660 = vmatprep.subr.bf16.mxu0 %v2479_v6 }
 0x3b3   :  { %v2283_v58 = vadd.f32 %v2282_v13, %v6471_v7  ;;  %v2284_v29 = vpop.f32.mrb[31].mxu1  ;;  %2661 = vmatpush1.bf16.msra.mxu0 %v2478_v63  ;;  %v2442_v54 = vmax.f32 %v2279_v42, 0.0  ;;  %v6582_v42 = vld [vmem:[%s7072_s13] sm:$0xff]  }
 0x3b4   :  { %v2285_v20 = vadd.f32 %v2284_v29, %v6471_v7  ;;  %v2443_v62 = vmax.f32 %v2281_v10, 0.0  ;;  %4214 = vmatmul.mubr.msk.bf16.vlgmr.msra.gmra.mrb[64].mxu1 %vm1734_vm9, %v6582_v42 }
 0x3b5   :  { %v2445_v52 = vmax.f32 %v2283_v58, 0.0  ;;  %3076 = vmatprep.mubr.bf16.mxu1 %v7220_v53 }
 0x3b6   :  { %v2446_v11 = vmax.f32 %v2285_v20, 0.0 }
 0x3b7   :  { %v2481_v21 = vpack.c.bf16 %v2445_v52, %v2442_v54 }
 0x3b8   :  { %v2482_v60 = vpack.c.bf16 %v2446_v11, %v2443_v62  ;;  %v2288_v12 = vpop.f32.mrb[32].mxu1 }
 0x3b9   :  { %v2289_v34 = vadd.f32 %v2288_v12, %v6476_v8  ;;  %v2290_v48 = vpop.f32.mrb[33].mxu1  ;;  %v4615_v12 = vld [vmem:[%s7072_s13 + $0x8] sm:$0xff]  }
 0x3ba   :  { %v2291_v30 = vadd.f32 %v2290_v48, %v6476_v8  ;;  %v2292_v37 = vpop.f32.mrb[34].mxu1  ;;  %2662 = vmatprep.subr.bf16.mxu0 %v2482_v60 }
 0x3bb   :  { %v2293_v32 = vadd.f32 %v2292_v37, %v6478_v33  ;;  %v2294_v35 = vpop.f32.mrb[35].mxu1  ;;  %2663 = vmatpush1.bf16.msra.mxu0 %v2481_v21  ;;  %v2448_v36 = vmax.f32 %v2289_v34, 0.0 }
 0x3bc   :  { %v2295_v7 = vadd.f32 %v2294_v35, %v6478_v33  ;;  %v2449_v61 = vmax.f32 %v2291_v30, 0.0  ;;  %4215 = vmatmul.mubr.msk.bf16.gmra.mrb[68].mxu1 %vm1734_vm9, %v4615_v12  ;;  %v4617_v35 = vld [vmem:[%s7072_s13 + $0x18] sm:$0xff]  }
 0x3bd   :  { %v2451_v16 = vmax.f32 %v2293_v32, 0.0  ;;  %3086 = vmatprep.mubr.bf16.mxu1 %v7220_v53 }
 0x3be   :  { %v2452_v46 = vmax.f32 %v2295_v7, 0.0 }
 0x3bf   :  { %v2484_v3 = vpack.c.bf16 %v2451_v16, %v2448_v36 }
 0x3c0   :  { %v2485_v43 = vpack.c.bf16 %v2452_v46, %v2449_v61  ;;  %v2298_v4 = vpop.f32.mrb[36].mxu1 }
 0x3c1   :  { %v2299_v17 = vadd.f32 %v2298_v4, %v6483_v41  ;;  %v2300_v5 = vpop.f32.mrb[37].mxu1 }
 0x3c2   :  { %v2301_v8 = vadd.f32 %v2300_v5, %v6483_v41  ;;  %v2302_v55 = vpop.f32.mrb[38].mxu1  ;;  %2664 = vmatprep.subr.bf16.mxu0 %v2485_v43 }
 0x3c3   :  { %v2303_v44 = vadd.f32 %v2302_v55, %v6486_v57  ;;  %v2304_v56 = vpop.f32.mrb[39].mxu1  ;;  %2665 = vmatpush1.bf16.msra.mxu0 %v2484_v3  ;;  %v2454_v2 = vmax.f32 %v2299_v17, 0.0 }
 0x3c4   :  { %v2305_v33 = vadd.f32 %v2304_v56, %v6486_v57  ;;  %v2455_v15 = vmax.f32 %v2301_v8, 0.0 }
 0x3c5   :  { %v2457_v0 = vmax.f32 %v2303_v44, 0.0 }
 0x3c6   :  { %v2458_v51 = vmax.f32 %v2305_v33, 0.0 }
 0x3c7   :  { %v2487_v26 = vpack.c.bf16 %v2457_v0, %v2454_v2 }
 0x3c8   :  { %v2488_v25 = vpack.c.bf16 %v2458_v51, %v2455_v15  ;;  %v2308_v50 = vpop.f32.mrb[40].mxu1 }
 0x3c9   :  { %v2309_v31 = vadd.f32 %v2308_v50, %v6489_v9  ;;  %v2310_v40 = vpop.f32.mrb[41].mxu1 }
 0x3ca   :  { %v2311_v41 = vadd.f32 %v2310_v40, %v6489_v9  ;;  %v2312_v63 = vpop.f32.mrb[42].mxu1  ;;  %2666 = vmatprep.subr.bf16.mxu0 %v2488_v25 }
 0x3cb   :  { %v2313_v6 = vadd.f32 %v2312_v63, %v6493_v27  ;;  %v2314_v14 = vpop.f32.mrb[43].mxu1  ;;  %2667 = vmatpush1.bf16.msra.mxu0 %v2487_v26  ;;  %v2460_v59 = vmax.f32 %v2309_v31, 0.0 }
 0x3cc   :  { %v2315_v57 = vadd.f32 %v2314_v14, %v6493_v27  ;;  %v2461_v13 = vmax.f32 %v2311_v41, 0.0 }
 0x3cd   :  { %v2463_v10 = vmax.f32 %v2313_v6, 0.0 }
 0x3ce   :  { %v2464_v58 = vmax.f32 %v2315_v57, 0.0 }
 0x3cf   :  { %v2490_v9 = vpack.c.bf16 %v2463_v10, %v2460_v59 }
 0x3d0   :  { %v2491_v29 = vpack.c.bf16 %v2464_v58, %v2461_v13  ;;  %v2318_v20 = vpop.f32.mrb[44].mxu1 }
 0x3d1   :  { %v2319_v54 = vadd.f32 %v2318_v20, %v6496_v47  ;;  %v2320_v27 = vpop.f32.mrb[45].mxu1 }
 0x3d2   :  { %v2321_v52 = vadd.f32 %v2320_v27, %v6496_v47  ;;  %v2322_v62 = vpop.f32.mrb[46].mxu1  ;;  %2668 = vmatprep.subr.bf16.mxu0 %v2491_v29 }
 0x3d3   :  { %v2323_v11 = vadd.f32 %v2322_v62, %v6499_v1  ;;  %v2324_v21 = vpop.f32.mrb[47].mxu1  ;;  %2669 = vmatpush1.bf16.msra.mxu0 %v2490_v9  ;;  %v2466_v34 = vmax.f32 %v2319_v54, 0.0 }
 0x3d4   :  { %v2325_v60 = vadd.f32 %v2324_v21, %v6499_v1  ;;  %v2467_v30 = vmax.f32 %v2321_v52, 0.0  ;;  %v4616_v1 = vld [vmem:[%s7072_s13 + $0x10] sm:$0xff]  }
 0x3d5   :  { %v2469_v48 = vmax.f32 %v2323_v11, 0.0  ;;  %4216 = vmatmul.mubr.msk.bf16.gmra.mrb[72].mxu1 %vm1734_vm9, %v4616_v1 }
 0x3d6   :  { %v2470_v37 = vmax.f32 %v2325_v60, 0.0  ;;  %3096 = vmatprep.mubr.bf16.mxu1 %v7220_v53 }
 0x3d7   :  { %v2493_v32 = vpack.c.bf16 %v2469_v48, %v2466_v34 }
 0x3d8   :  { %v2494_v47 = vpack.c.bf16 %v2470_v37, %v2467_v30 }
 0x3da   :  { %2670 = vmatprep.subr.bf16.mxu0 %v2494_v47 }
 0x3db   :  { %2671 = vmatpush1.bf16.msra.mxu0 %v2493_v32 }
 0x3dc   :  { %4405 = vmatprep.subr.bf16.mxu0 %v5941_v24 }
 0x3dd   :  { %4217 = vmatmul.mubr.msk.bf16.gmra.mrb[76].mxu1 %vm1734_vm9, %v4617_v35 }
 0x3de   :  { %2689 = vmatmul.mubr.bf16.vlgmr.msra.gmra.mrb[48].mxu0 %v6453_v39  ;;  %3106 = vmatprep.mubr.bf16.mxu1 %v7220_v53  ;;  %v4620_v39 = vld [vmem:[%s7072_s13 + $0x30] sm:$0xff]  }
 0x3df   :  { %4406 = vmatpush3.bf16.msra.mxu0 %v5941_v24  ;;  %2698 = vmatprep.mubr.bf16.mxu0 %v7220_v53  ;;  %v4618_v24 = vld [vmem:[%s7072_s13 + $0x20] sm:$0xff]  }
 0x3e0   :  { %4407 = vmatprep.subr.bf16.mxu0 %v6114_v22 }
 0x3e3   :  { %4408 = vmatpush3.bf16.msra.mxu0 %v6114_v22  ;;  %v4619_v22 = vld [vmem:[%s7072_s13 + $0x28] sm:$0xff]  }
 0x3e5   :  { %4218 = vmatmul.mubr.msk.bf16.gmra.mrb[80].mxu1 %vm1734_vm9, %v4618_v24 }
 0x3e6   :  { %2699 = vmatmul.mubr.bf16.gmra.mrb[52].mxu0 %v6507_v45  ;;  %3116 = vmatprep.mubr.bf16.mxu1 %v7220_v53  ;;  %v4621_v45 = vld [vmem:[%s7072_s13 + $0x38] sm:$0xff]   ;;  %s4739_s13 = smov [#allocation4]  }
 0x3e7   :  { %2708 = vmatprep.mubr.bf16.mxu0 %v7220_v53  ;;  %s4101_s1 = sshll.u32 %s4739_s13, 4  ;;  %s4102_s1 = int_to_ptr.vmem [resolvable:$true] %s4101_s1 }
 0x3e8   :  { %s4679_s14 = scalar_lea.vmem %s4102_s1, 768  ;;  %p4684_p1 = scmp.lt.s32.totalorder %s4102_s1, %s4102_s1 }
 0x3e9   :  { %p4680_p0 = scmp.ne.s32.totalorder %s4102_s1, %s4679_s14  ;;  %p4685_p2 = scmp.lt.s32.totalorder %s4679_s14, %s4679_s14 }
 0x3eb   :  { %p4686_p3 = por %p4685_p2, %p4684_p1 }
 0x3ed   :  { %4219 = vmatmul.mubr.msk.bf16.gmra.mrb[84].mxu1 %vm1734_vm9, %v4619_v22  ;;  %p4687_p4 = pnand %p4686_p3, %p4680_p0 }
 0x3ee   :  { %2709 = vmatmul.mubr.bf16.gmra.mrb[56].mxu0 %v6512_v28  ;;  %3126 = vmatprep.mubr.bf16.mxu1 %v7220_v53  ;;  %v6651_v28 = vpop.permute.xlu0 %2530 }
 0x3ef   :  { %2718 = vmatprep.mubr.bf16.mxu0 %v7220_v53 }
 0x3f5   :  { %4220 = vmatmul.mubr.msk.bf16.gmra.mrb[88].mxu1 %vm1734_vm9, %v4620_v39 }
 0x3f6   :  { %2719 = vmatmul.mubr.bf16.gmra.mrb[60].mxu0 %v6522_v19  ;;  %3136 = vmatprep.mubr.bf16.mxu1 %v7220_v53  ;;  %v6655_v19 = vpop.permute.xlu1 %2535 }
 0x3f7   :  { %2728 = vmatprep.mubr.bf16.mxu0 %v7220_v53 }
 0x3fd   :  { %4221 = vmatmul.mubr.msk.bf16.gmra.mrb[92].mxu1 %vm1734_vm9, %v4621_v45 }
 0x3fe   :  { %2729 = vmatmul.mubr.bf16.gmra.mrb[64].mxu0 %v6528_v49  ;;  %3324 = vmatprep.mubr.bf16.mxu1 %v7220_v53  ;;  %v6660_v49 = vld [vmem:[%s7071_s12] sm:$0xff]  }
 0x3ff   :  { %2738 = vmatprep.mubr.bf16.mxu0 %v7220_v53 }
 0x406   :  { %2739 = vmatmul.mubr.bf16.gmra.mrb[68].mxu0 %v6535_v18  ;;  %v6662_v18 = vpop.permute.xlu0 %2540 }
 0x407   :  { %2748 = vmatprep.mubr.bf16.mxu0 %v7220_v53 }
 0x40e   :  { %2749 = vmatmul.mubr.bf16.gmra.mrb[72].mxu0 %v6540_v38  ;;  %v6664_v38 = vpop.permute.xlu1 %2545 }
 0x40f   :  { %2758 = vmatprep.mubr.bf16.mxu0 %v7220_v53 }
 0x412   :  { %v6670_v7 = vpop.permute.xlu1 %2555 }
 0x416   :  { %2759 = vmatmul.mubr.bf16.gmra.mrb[76].mxu0 %v6547_v23  ;;  %v6668_v23 = vpop.permute.xlu0 %2550  ;;  %v6675_v3 = vpop.permute.xlu1 %2565 }
 0x417   :  { %4409 = vmatprep.mubr.msk.bf16.mxu0 %vm1734_vm9, %v6582_v42 }
 0x41a   :  { %v6672_v36 = vpop.permute.xlu0 %2560  ;;  %v6682_v15 = vpop.permute.xlu1 %2575 }
 0x41e   :  { %4410 = vmatmul.mubr.msk.bf16.vlgmr.msra.gmra.mrb[80].mxu0 %vm1734_vm9, %v4615_v12  ;;  %v6680_v56 = vpop.permute.xlu0 %2570  ;;  %v6690_v59 = vpop.permute.xlu1 %2585 }
 0x41f   :  { %4413 = vmatprep.mubr.msk.bf16.mxu0 %vm1734_vm9, %v4616_v1 }
 0x422   :  { %v6687_v6 = vpop.permute.xlu0 %2580  ;;  %v6697_v60 = vpop.permute.xlu1 %2595 }
 0x426   :  { %4414 = vmatmul.mubr.msk.bf16.gmra.mrb[84].mxu0 %vm1734_vm9, %v4617_v35  ;;  %v6693_v27 = vpop.permute.xlu0 %2590 }
 0x427   :  { %4417 = vmatprep.mubr.msk.bf16.mxu0 %vm1734_vm9, %v4618_v24 }
 0x42a   :  { %v6700_v47 = vpop.permute.xlu0 %2600 }
 0x42e   :  { %4418 = vmatmul.mubr.msk.bf16.gmra.mrb[88].mxu0 %vm1734_vm9, %v4619_v22 }
 0x42f   :  { %4421 = vmatprep.mubr.msk.bf16.mxu0 %vm1734_vm9, %v4620_v39  ;;  %v6703_v39 = vpop.permute.xlu1 %2605 }
 0x436   :  { %4422 = vmatmul.mubr.msk.bf16.gmra.mrb[92].mxu0 %vm1734_vm9, %v4621_v45  ;;  %vm4738_vm9 = vmmov 0  }
 0x437   :  { %4441 = vmatprep.mubr.bf16.mxu0 %v6660_v49 }
 0x440   :  { %v4391_v16 = vpop.f32.mrb[48].mxu1 }
 0x441   :  { %v2812_v61 = vadd.f32 %v4391_v16, %v6662_v18  ;;  %v2803_v46 = vpop.f32.mrb[49].mxu1 }
 0x442   :  { %v2804_v43 = vadd.f32 %v2803_v46, %v6651_v28  ;;  %v4392_v4 = vpop.f32.mrb[50].mxu1 }
 0x443   :  { %v2815_v17 = vadd.f32 %v4392_v4, %v6664_v38  ;;  %v2806_v5 = vpop.f32.mrb[51].mxu1  ;;  %v2874_v55 = vmax.f32 %v2812_v61, 0.0 }
 0x444   :  { %v2807_v8 = vadd.f32 %v2806_v5, %v6655_v19  ;;  %v2868_v33 = vmax.f32 %v2804_v43, 0.0 }
 0x445   :  { %v2877_v44 = vmax.f32 %v2815_v17, 0.0 }
 0x446   :  { %v2871_v2 = vmax.f32 %v2807_v8, 0.0 }
 0x447   :  { %v2919_v0 = vpack.c.bf16 %v2877_v44, %v2874_v55 }
 0x448   :  { %v2916_v51 = vpack.c.bf16 %v2871_v2, %v2868_v33  ;;  %v4395_v26 = vpop.f32.mrb[52].mxu1  ;;  %v6711_v33 = vld [vmem:[%s7071_s12 + $0x8] sm:$0xff]   ;;  %v6716_v2 = vld [vmem:[%s7071_s12 + $0x10] sm:$0xff]  }
 0x449   :  { %v2828_v25 = vadd.f32 %v4395_v26, %v6672_v36  ;;  %v2819_v50 = vpop.f32.mrb[53].mxu1  ;;  %v6735_v26 = vld [vmem:[%s7071_s12 + $0x28] sm:$0xff]  }
 0x44a   :  { %v2820_v31 = vadd.f32 %v2819_v50, %v6668_v23  ;;  %v4396_v40 = vpop.f32.mrb[54].mxu1  ;;  %4425 = vmatprep.subr.bf16.mxu0 %v2916_v51  ;;  %v6747_v50 = vld [vmem:[%s7071_s12 + $0x38] sm:$0xff]  }
 0x44b   :  { %v2831_v41 = vadd.f32 %v4396_v40, %v6675_v3  ;;  %v2822_v63 = vpop.f32.mrb[55].mxu1  ;;  %4426 = vmatpush3.bf16.msra.mxu0 %v2916_v51  ;;  %v2886_v57 = vmax.f32 %v2828_v25, 0.0  ;;  %v6728_v51 = vld [vmem:[%s7071_s12 + $0x20] sm:$0xff]   ;;  %v6740_v25 = vld [vmem:[%s7071_s12 + $0x30] sm:$0xff]  }
 0x44c   :  { %v2823_v14 = vadd.f32 %v2822_v63, %v6670_v7  ;;  %4427 = vmatprep.subr.bf16.mxu0 %v2919_v0  ;;  %v2880_v10 = vmax.f32 %v2820_v31, 0.0 }
 0x44d   :  { %v2889_v42 = vmax.f32 %v2831_v41, 0.0 }
 0x44e   :  { %v2883_v13 = vmax.f32 %v2823_v14, 0.0 }
 0x44f   :  { %v2925_v58 = vpack.c.bf16 %v2889_v42, %v2886_v57  ;;  %4428 = vmatpush3.bf16.msra.mxu0 %v2919_v0  ;;  %v6723_v0 = vld [vmem:[%s7071_s12 + $0x18] sm:$0xff]  }
 0x450   :  { %v2922_v9 = vpack.c.bf16 %v2883_v13, %v2880_v10  ;;  %v4399_v29 = vpop.f32.mrb[56].mxu1 }
 0x451   :  { %v2844_v20 = vadd.f32 %v4399_v29, %v6687_v6  ;;  %v2835_v54 = vpop.f32.mrb[57].mxu1 }
 0x452   :  { %v2836_v52 = vadd.f32 %v2835_v54, %v6680_v56  ;;  %v4400_v62 = vpop.f32.mrb[58].mxu1  ;;  %4429 = vmatprep.subr.bf16.mxu0 %v2922_v9 }
 0x453   :  { %v2847_v11 = vadd.f32 %v4400_v62, %v6690_v59  ;;  %v2838_v21 = vpop.f32.mrb[59].mxu1  ;;  %4430 = vmatpush3.bf16.msra.mxu0 %v2922_v9  ;;  %v2898_v34 = vmax.f32 %v2844_v20, 0.0 }
 0x454   :  { %v2839_v12 = vadd.f32 %v2838_v21, %v6682_v15  ;;  %4431 = vmatprep.subr.bf16.mxu0 %v2925_v58  ;;  %v2892_v30 = vmax.f32 %v2836_v52, 0.0 }
 0x455   :  { %v2901_v48 = vmax.f32 %v2847_v11, 0.0 }
 0x456   :  { %v2895_v37 = vmax.f32 %v2839_v12, 0.0 }
 0x457   :  { %v2931_v32 = vpack.c.bf16 %v2901_v48, %v2898_v34  ;;  %4432 = vmatpush3.bf16.msra.mxu0 %v2925_v58 }
 0x458   :  { %v2928_v1 = vpack.c.bf16 %v2895_v37, %v2892_v30  ;;  %v4403_v35 = vpop.f32.mrb[60].mxu1 }
 0x459   :  { %v2860_v24 = vadd.f32 %v4403_v35, %v6700_v47  ;;  %v2851_v22 = vpop.f32.mrb[61].mxu1 }
 0x45a   :  { %v2852_v45 = vadd.f32 %v2851_v22, %v6693_v27  ;;  %v4404_v16 = vpop.f32.mrb[62].mxu1  ;;  %4433 = vmatprep.subr.bf16.mxu0 %v2928_v1 }
 0x45b   :  { %v2863_v61 = vadd.f32 %v4404_v16, %v6703_v39  ;;  %v2854_v46 = vpop.f32.mrb[63].mxu1  ;;  %4434 = vmatpush3.bf16.msra.mxu0 %v2928_v1  ;;  %v2910_v4 = vmax.f32 %v2860_v24, 0.0 }
 0x45c   :  { %v2855_v43 = vadd.f32 %v2854_v46, %v6697_v60  ;;  %4435 = vmatprep.subr.bf16.mxu0 %v2931_v32  ;;  %v2904_v5 = vmax.f32 %v2852_v45, 0.0 }
 0x45d   :  { %v2913_v17 = vmax.f32 %v2863_v61, 0.0 }
 0x45e   :  { %v2907_v8 = vmax.f32 %v2855_v43, 0.0 }
 0x45f   :  { %v2937_v55 = vpack.c.bf16 %v2913_v17, %v2910_v4  ;;  %4436 = vmatpush3.bf16.msra.mxu0 %v2931_v32 }
 0x460   :  { %v2934_v44 = vpack.c.bf16 %v2907_v8, %v2904_v5 }
 0x462   :  { %4437 = vmatprep.subr.bf16.mxu0 %v2934_v44 }
 0x463   :  { %4438 = vmatpush3.bf16.msra.mxu0 %v2934_v44 }
 0x464   :  { %4439 = vmatprep.subr.bf16.mxu0 %v2937_v55 }
 0x467   :  { %4440 = vmatpush3.bf16.msra.mxu0 %v2937_v55 }
 0x46a   :  { %4442 = vmatmul.mubr.bf16.vlgmr.msra.gmra.mrb[80].mxu0 %v6711_v33 }
 0x46b   :  { %4445 = vmatprep.mubr.bf16.mxu0 %v6716_v2 }
 0x472   :  { %4446 = vmatmul.mubr.bf16.gmra.mrb[84].mxu0 %v6723_v0 }
 0x473   :  { %4449 = vmatprep.mubr.bf16.mxu0 %v6728_v51 }
 0x47a   :  { %4450 = vmatmul.mubr.bf16.gmra.mrb[88].mxu0 %v6735_v26 }
 0x47b   :  { %4453 = vmatprep.mubr.bf16.mxu0 %v6740_v25 }
 0x482   :  { %4454 = vmatmul.mubr.bf16.gmra.mrb[92].mxu0 %v6747_v50 }
 0x483   :  { %3770 = vmatprep.mubr.bf16.mxu0 %v7220_v53 }
 0x4b1   :  { %v2690_v31 = vpop.f32.mrb[48].mxu0 }
 0x4b2   :  { %v2691_v40 = vadd.f32 %v2690_v31, %v6651_v28  ;;  %v2692_v41 = vpop.f32.mrb[49].mxu0 }
 0x4b3   :  { %v2693_v63 = vadd.f32 %v2692_v41, %v6651_v28  ;;  %v2694_v14 = vpop.f32.mrb[50].mxu0 }
 0x4b4   :  { %v2695_v57 = vadd.f32 %v2694_v14, %v6655_v19  ;;  %v2696_v42 = vpop.f32.mrb[51].mxu0  ;;  %v2866_v13 = vmax.f32 %v2691_v40, 0.0 }
 0x4b5   :  { %v2697_v10 = vadd.f32 %v2696_v42, %v6655_v19  ;;  %v2867_v9 = vmax.f32 %v2693_v63, 0.0 }
 0x4b6   :  { %v2869_v58 = vmax.f32 %v2695_v57, 0.0 }
 0x4b7   :  { %v2870_v29 = vmax.f32 %v2697_v10, 0.0 }
 0x4b8   :  { %v2914_v20 = vpack.c.bf16 %v2869_v58, %v2866_v13 }
 0x4b9   :  { %v2915_v54 = vpack.c.bf16 %v2870_v29, %v2867_v9  ;;  %v2700_v52 = vpop.f32.mrb[52].mxu0 }
 0x4ba   :  { %v2701_v62 = vadd.f32 %v2700_v52, %v6662_v18  ;;  %v2702_v11 = vpop.f32.mrb[53].mxu0 }
 0x4bb   :  { %v2703_v21 = vadd.f32 %v2702_v11, %v6662_v18  ;;  %v2704_v12 = vpop.f32.mrb[54].mxu0  ;;  %3292 = vmatprep.subr.bf16.mxu1 %v2915_v54 }
 0x4bc   :  { %v2705_v28 = vadd.f32 %v2704_v12, %v6664_v38  ;;  %v2706_v34 = vpop.f32.mrb[55].mxu0  ;;  %3293 = vmatpush1.bf16.msra.mxu1 %v2914_v20  ;;  %v2872_v48 = vmax.f32 %v2701_v62, 0.0 }
 0x4bd   :  { %v2707_v19 = vadd.f32 %v2706_v34, %v6664_v38  ;;  %v2873_v37 = vmax.f32 %v2703_v21, 0.0 }
 0x4be   :  { %v2875_v30 = vmax.f32 %v2705_v28, 0.0 }
 0x4bf   :  { %v2876_v32 = vmax.f32 %v2707_v19, 0.0 }
 0x4c0   :  { %v2917_v1 = vpack.c.bf16 %v2875_v30, %v2872_v48 }
 0x4c1   :  { %v2918_v35 = vpack.c.bf16 %v2876_v32, %v2873_v37  ;;  %v2710_v24 = vpop.f32.mrb[56].mxu0 }
 0x4c2   :  { %v2711_v22 = vadd.f32 %v2710_v24, %v6668_v23  ;;  %v2712_v45 = vpop.f32.mrb[57].mxu0 }
 0x4c3   :  { %v2713_v18 = vadd.f32 %v2712_v45, %v6668_v23  ;;  %v2714_v16 = vpop.f32.mrb[58].mxu0  ;;  %3294 = vmatprep.subr.bf16.mxu1 %v2918_v35 }
 0x4c4   :  { %v2715_v61 = vadd.f32 %v2714_v16, %v6670_v7  ;;  %v2716_v46 = vpop.f32.mrb[59].mxu0  ;;  %3295 = vmatpush1.bf16.msra.mxu1 %v2917_v1  ;;  %v2878_v43 = vmax.f32 %v2711_v22, 0.0 }
 0x4c5   :  { %v2717_v38 = vadd.f32 %v2716_v46, %v6670_v7  ;;  %v2879_v17 = vmax.f32 %v2713_v18, 0.0 }
 0x4c6   :  { %v2881_v4 = vmax.f32 %v2715_v61, 0.0 }
 0x4c7   :  { %v2882_v5 = vmax.f32 %v2717_v38, 0.0 }
 0x4c8   :  { %v2920_v8 = vpack.c.bf16 %v2881_v4, %v2878_v43 }
 0x4c9   :  { %v2921_v55 = vpack.c.bf16 %v2882_v5, %v2879_v17  ;;  %v2720_v44 = vpop.f32.mrb[60].mxu0 }
 0x4ca   :  { %v2721_v31 = vadd.f32 %v2720_v44, %v6672_v36  ;;  %v2722_v40 = vpop.f32.mrb[61].mxu0 }
 0x4cb   :  { %v2723_v23 = vadd.f32 %v2722_v40, %v6672_v36  ;;  %v2724_v41 = vpop.f32.mrb[62].mxu0  ;;  %3296 = vmatprep.subr.bf16.mxu1 %v2921_v55 }
 0x4cc   :  { %v2725_v63 = vadd.f32 %v2724_v41, %v6675_v3  ;;  %v2726_v14 = vpop.f32.mrb[63].mxu0  ;;  %3297 = vmatpush1.bf16.msra.mxu1 %v2920_v8  ;;  %v2884_v57 = vmax.f32 %v2721_v31, 0.0 }
 0x4cd   :  { %v2727_v7 = vadd.f32 %v2726_v14, %v6675_v3  ;;  %v2885_v10 = vmax.f32 %v2723_v23, 0.0 }
 0x4ce   :  { %v2887_v42 = vmax.f32 %v2725_v63, 0.0 }
 0x4cf   :  { %v2888_v13 = vmax.f32 %v2727_v7, 0.0 }
 0x4d0   :  { %v2923_v58 = vpack.c.bf16 %v2887_v42, %v2884_v57 }
 0x4d1   :  { %v2924_v9 = vpack.c.bf16 %v2888_v13, %v2885_v10  ;;  %v2730_v29 = vpop.f32.mrb[64].mxu0 }
 0x4d2   :  { %v2731_v20 = vadd.f32 %v2730_v29, %v6680_v56  ;;  %v2732_v54 = vpop.f32.mrb[65].mxu0 }
 0x4d3   :  { %v2733_v36 = vadd.f32 %v2732_v54, %v6680_v56  ;;  %v2734_v52 = vpop.f32.mrb[66].mxu0  ;;  %3298 = vmatprep.subr.bf16.mxu1 %v2924_v9 }
 0x4d4   :  { %v2735_v62 = vadd.f32 %v2734_v52, %v6682_v15  ;;  %v2736_v11 = vpop.f32.mrb[67].mxu0  ;;  %3299 = vmatpush1.bf16.msra.mxu1 %v2923_v58  ;;  %v2890_v21 = vmax.f32 %v2731_v20, 0.0 }
 0x4d5   :  { %v2737_v3 = vadd.f32 %v2736_v11, %v6682_v15  ;;  %v2891_v28 = vmax.f32 %v2733_v36, 0.0 }
 0x4d6   :  { %v2893_v12 = vmax.f32 %v2735_v62, 0.0 }
 0x4d7   :  { %v2894_v34 = vmax.f32 %v2737_v3, 0.0 }
 0x4d8   :  { %v2926_v19 = vpack.c.bf16 %v2893_v12, %v2890_v21 }
 0x4d9   :  { %v2927_v48 = vpack.c.bf16 %v2894_v34, %v2891_v28  ;;  %v2740_v30 = vpop.f32.mrb[68].mxu0 }
 0x4da   :  { %v2741_v37 = vadd.f32 %v2740_v30, %v6687_v6  ;;  %v2742_v32 = vpop.f32.mrb[69].mxu0 }
 0x4db   :  { %v2743_v56 = vadd.f32 %v2742_v32, %v6687_v6  ;;  %v2744_v1 = vpop.f32.mrb[70].mxu0  ;;  %3300 = vmatprep.subr.bf16.mxu1 %v2927_v48 }
 0x4dc   :  { %v2745_v35 = vadd.f32 %v2744_v1, %v6690_v59  ;;  %v2746_v24 = vpop.f32.mrb[71].mxu0  ;;  %3301 = vmatpush1.bf16.msra.mxu1 %v2926_v19  ;;  %v2896_v22 = vmax.f32 %v2741_v37, 0.0 }
 0x4dd   :  { %v2747_v15 = vadd.f32 %v2746_v24, %v6690_v59  ;;  %v2897_v18 = vmax.f32 %v2743_v56, 0.0 }
 0x4de   :  { %v2899_v45 = vmax.f32 %v2745_v35, 0.0 }
 0x4df   :  { %v2900_v16 = vmax.f32 %v2747_v15, 0.0 }
 0x4e0   :  { %v2929_v61 = vpack.c.bf16 %v2899_v45, %v2896_v22 }
 0x4e1   :  { %v2930_v46 = vpack.c.bf16 %v2900_v16, %v2897_v18  ;;  %v2750_v38 = vpop.f32.mrb[72].mxu0 }
 0x4e2   :  { %v2751_v43 = vadd.f32 %v2750_v38, %v6693_v27  ;;  %v2752_v4 = vpop.f32.mrb[73].mxu0 }
 0x4e3   :  { %v2753_v6 = vadd.f32 %v2752_v4, %v6693_v27  ;;  %v2754_v17 = vpop.f32.mrb[74].mxu0  ;;  %3302 = vmatprep.subr.bf16.mxu1 %v2930_v46 }
 0x4e4   :  { %v2755_v5 = vadd.f32 %v2754_v17, %v6697_v60  ;;  %v2756_v8 = vpop.f32.mrb[75].mxu0  ;;  %3303 = vmatpush1.bf16.msra.mxu1 %v2929_v61  ;;  %v2902_v55 = vmax.f32 %v2751_v43, 0.0 }
 0x4e5   :  { %v2757_v59 = vadd.f32 %v2756_v8, %v6697_v60  ;;  %v2903_v31 = vmax.f32 %v2753_v6, 0.0 }
 0x4e6   :  { %v2905_v44 = vmax.f32 %v2755_v5, 0.0 }
 0x4e7   :  { %v2906_v40 = vmax.f32 %v2757_v59, 0.0 }
 0x4e8   :  { %v2932_v23 = vpack.c.bf16 %v2905_v44, %v2902_v55 }
 0x4e9   :  { %v2933_v41 = vpack.c.bf16 %v2906_v40, %v2903_v31  ;;  %v2760_v63 = vpop.f32.mrb[76].mxu0 }
 0x4ea   :  { %v2761_v14 = vadd.f32 %v2760_v63, %v6700_v47  ;;  %v2762_v7 = vpop.f32.mrb[77].mxu0 }
 0x4eb   :  { %v2763_v27 = vadd.f32 %v2762_v7, %v6700_v47  ;;  %v2764_v57 = vpop.f32.mrb[78].mxu0  ;;  %3304 = vmatprep.subr.bf16.mxu1 %v2933_v41  ;;  %v6799_v47 = vpop.permute.xlu1 %3525 }
 0x4ec   :  { %v2765_v42 = vadd.f32 %v2764_v57, %v6703_v39  ;;  %v2766_v10 = vpop.f32.mrb[79].mxu0  ;;  %3305 = vmatpush1.bf16.msra.mxu1 %v2932_v23  ;;  %v2908_v13 = vmax.f32 %v2761_v14, 0.0 }
 0x4ed   :  { %v2767_v60 = vadd.f32 %v2766_v10, %v6703_v39  ;;  %v2909_v9 = vmax.f32 %v2763_v27, 0.0 }
 0x4ee   :  { %v2911_v58 = vmax.f32 %v2765_v42, 0.0 }
 0x4ef   :  { %v2912_v29 = vmax.f32 %v2767_v60, 0.0 }
 0x4f0   :  { %v2935_v20 = vpack.c.bf16 %v2911_v58, %v2908_v13 }
 0x4f1   :  { %v2936_v54 = vpack.c.bf16 %v2912_v29, %v2909_v9 }
 0x4f3   :  { %3306 = vmatprep.subr.bf16.mxu1 %v2936_v54 }
 0x4f4   :  { %3307 = vmatpush1.bf16.msra.mxu1 %v2935_v20 }
 0x4f7   :  { %3325 = vmatmul.mubr.bf16.vlgmr.msra.gmra.mrb[64].mxu1 %v6660_v49  ;;  %v6797_v49 = vpop.permute.xlu0 %3520 }
 0x4f8   :  { %3334 = vmatprep.mubr.bf16.mxu1 %v7220_v53 }
 0x4fb   :  { %v6802_v39 = vpop.permute.xlu0 %3530 }
 0x4ff   :  { %3335 = vmatmul.mubr.bf16.gmra.mrb[68].mxu1 %v6711_v33  ;;  %v6804_v33 = vpop.permute.xlu1 %3535 }
 0x500   :  { %3344 = vmatprep.mubr.bf16.mxu1 %v7220_v53 }
 0x507   :  { %3345 = vmatmul.mubr.bf16.gmra.mrb[72].mxu1 %v6716_v2  ;;  %v6806_v2 = vpop.permute.xlu0 %3540 }
 0x508   :  { %3354 = vmatprep.mubr.bf16.mxu1 %v7220_v53 }
 0x50f   :  { %3355 = vmatmul.mubr.bf16.gmra.mrb[76].mxu1 %v6723_v0  ;;  %v6808_v0 = vpop.permute.xlu1 %3545 }
 0x510   :  { %3364 = vmatprep.mubr.bf16.mxu1 %v7220_v53 }
 0x513   :  { %v6813_v52 = vpop.permute.xlu1 %3555 }
 0x517   :  { %3365 = vmatmul.mubr.bf16.gmra.mrb[80].mxu1 %v6728_v51  ;;  %v6810_v51 = vpop.permute.xlu0 %3550  ;;  %v6822_v37 = vpop.permute.xlu1 %3565 }
 0x518   :  { %3374 = vmatprep.mubr.bf16.mxu1 %v7220_v53 }
 0x51b   :  { %v6818_v34 = vpop.permute.xlu0 %3560  ;;  %v6832_v38 = vpop.permute.xlu1 %3575 }
 0x51f   :  { %3375 = vmatmul.mubr.bf16.gmra.mrb[84].mxu1 %v6735_v26  ;;  %v6829_v18 = vpop.permute.xlu0 %3570  ;;  %v6843_v41 = vpop.permute.xlu1 %3585 }
 0x520   :  { %3384 = vmatprep.mubr.bf16.mxu1 %v7220_v53 }
 0x523   :  { %v6839_v55 = vpop.permute.xlu0 %3580  ;;  %v6853_v29 = vpop.permute.xlu1 %3595 }
 0x527   :  { %3385 = vmatmul.mubr.bf16.gmra.mrb[88].mxu1 %v6740_v25  ;;  %v6848_v10 = vpop.permute.xlu0 %3590 }
 0x528   :  { %3394 = vmatprep.mubr.bf16.mxu1 %v7220_v53 }
 0x52f   :  { %3395 = vmatmul.mubr.bf16.gmra.mrb[92].mxu1 %v6747_v50 }
 0x53d   :  { %v4443_v26 = vpop.f32.mrb[80].mxu0 }
 0x53e   :  { %v3606_v25 = vadd.f32 %v4443_v26, %v6802_v39  ;;  %v3439_v36 = vpop.f32.mrb[81].mxu0 }
 0x53f   :  { %v3600_v62 = vadd.f32 %v6797_v49, %v3439_v36  ;;  %v4444_v11 = vpop.f32.mrb[82].mxu0 }
 0x540   :  { %v3609_v50 = vadd.f32 %v4444_v11, %v6804_v33  ;;  %v3442_v3 = vpop.f32.mrb[83].mxu0  ;;  %v3654_v12 = vmax.f32 %v3606_v25, 0.0 }
 0x541   :  { %v3603_v21 = vadd.f32 %v6799_v47, %v3442_v3  ;;  %v3648_v19 = vmax.f32 %v3600_v62, 0.0 }
 0x542   :  { %v3657_v28 = vmax.f32 %v3609_v50, 0.0 }
 0x543   :  { %v3651_v48 = vmax.f32 %v3603_v21, 0.0 }
 0x544   :  { %v6820_v30 = vpack.c.bf16 %v3657_v28, %v3654_v12  ;;  %v3721_v28 = vld [vmem:[%s7075_s16 + $0x8] sm:$0xf] }
 0x545   :  { %v6824_v32 = vpack.c.bf16 %v3651_v48, %v3648_v19  ;;  %v4447_v56 = vpop.f32.mrb[84].mxu0  ;;  %3729 = vperm.xlu1 %4588, %v3721_v28  }
 0x546   :  { %v3618_v1 = vadd.f32 %v4447_v56, %v6810_v51  ;;  %v3455_v35 = vpop.f32.mrb[85].mxu0 }
 0x547   :  { %v3612_v24 = vadd.f32 %v6806_v2, %v3455_v35  ;;  %v4448_v15 = vpop.f32.mrb[86].mxu0 }
 0x548   :  { %v3621_v22 = vadd.f32 %v4448_v15, %v6813_v52  ;;  %v3458_v45 = vpop.f32.mrb[87].mxu0  ;;  %v3666_v61 = vmax.f32 %v3618_v1, 0.0 }
 0x549   :  { %v3615_v16 = vadd.f32 %v6808_v0, %v3458_v45  ;;  %v3660_v43 = vmax.f32 %v3612_v24, 0.0 }
 0x54a   :  { %v3669_v46 = vmax.f32 %v3621_v22, 0.0 }
 0x54b   :  { %v3663_v4 = vmax.f32 %v3615_v16, 0.0 }
 0x54c   :  { %v6834_v6 = vpack.c.bf16 %v3669_v46, %v3666_v61 }
 0x54d   :  { %v6836_v17 = vpack.c.bf16 %v3663_v4, %v3660_v43  ;;  %v4451_v5 = vpop.f32.mrb[88].mxu0 }
 0x54e   :  { %v3630_v8 = vadd.f32 %v4451_v5, %v6829_v18  ;;  %v3471_v59 = vpop.f32.mrb[89].mxu0 }
 0x54f   :  { %v3624_v44 = vadd.f32 %v6818_v34, %v3471_v59  ;;  %v4452_v31 = vpop.f32.mrb[90].mxu0 }
 0x550   :  { %v3633_v40 = vadd.f32 %v4452_v31, %v6832_v38  ;;  %v3474_v23 = vpop.f32.mrb[91].mxu0  ;;  %v3678_v14 = vmax.f32 %v3630_v8, 0.0 }
 0x551   :  { %v3627_v63 = vadd.f32 %v6822_v37, %v3474_v23  ;;  %v3672_v27 = vmax.f32 %v3624_v44, 0.0 }
 0x552   :  { %v3681_v7 = vmax.f32 %v3633_v40, 0.0 }
 0x553   :  { %v3675_v57 = vmax.f32 %v3627_v63, 0.0 }
 0x554   :  { %v6846_v42 = vpack.c.bf16 %v3681_v7, %v3678_v14 }
 0x555   :  { %v6850_v60 = vpack.c.bf16 %v3675_v57, %v3672_v27  ;;  %v4455_v13 = vpop.f32.mrb[92].mxu0 }
 0x556   :  { %v3642_v58 = vadd.f32 %v4455_v13, %v6848_v10  ;;  %v3487_v9 = vpop.f32.mrb[93].mxu0 }
 0x557   :  { %v3636_v20 = vadd.f32 %v6839_v55, %v3487_v9  ;;  %v4456_v54 = vpop.f32.mrb[94].mxu0 }
 0x558   :  { %v3645_v26 = vadd.f32 %v4456_v54, %v6853_v29  ;;  %v3490_v25 = vpop.f32.mrb[95].mxu0  ;;  %v3690_v62 = vmax.f32 %v3642_v58, 0.0 }
 0x559   :  { %v3639_v36 = vadd.f32 %v6843_v41, %v3490_v25  ;;  %v3684_v50 = vmax.f32 %v3636_v20, 0.0 }
 0x55a   :  { %v3693_v11 = vmax.f32 %v3645_v26, 0.0 }
 0x55b   :  { %v3687_v3 = vmax.f32 %v3639_v36, 0.0 }
 0x55c   :  { %v6858_v21 = vpack.c.bf16 %v3693_v11, %v3690_v62 }
 0x55d   :  { %v6860_v12 = vpack.c.bf16 %v3687_v3, %v3684_v50 }
 0x5ca   :  { %v3326_v19 = vpop.f32.mrb[64].mxu1 }
 0x5cb   :  { %v3598_v48 = vadd.f32 %v6797_v49, %v3326_v19  ;;  %v3328_v56 = vpop.f32.mrb[65].mxu1 }
 0x5cc   :  { %v3599_v1 = vadd.f32 %v6797_v49, %v3328_v56  ;;  %v3330_v35 = vpop.f32.mrb[66].mxu1 }
 0x5cd   :  { %v3601_v24 = vadd.f32 %v6799_v47, %v3330_v35  ;;  %v3332_v15 = vpop.f32.mrb[67].mxu1  ;;  %v3646_v45 = vmax.f32 %v3598_v48, 0.0 }
 0x5ce   :  { %v3602_v22 = vadd.f32 %v6799_v47, %v3332_v15  ;;  %v3647_v61 = vmax.f32 %v3599_v1, 0.0 }
 0x5cf   :  { %v3649_v16 = vmax.f32 %v3601_v24, 0.0 }
 0x5d0   :  { %v3650_v46 = vmax.f32 %v3602_v22, 0.0 }
 0x5d1   :  { %v3694_v43 = vpack.c.bf16 %v3649_v16, %v3646_v45 }
 0x5d2   :  { %v3695_v4 = vpack.c.bf16 %v3650_v46, %v3647_v61  ;;  %v3336_v5 = vpop.f32.mrb[68].mxu1 }
 0x5d3   :  { %v3604_v8 = vadd.f32 %v6802_v39, %v3336_v5  ;;  %v3338_v59 = vpop.f32.mrb[69].mxu1 }
 0x5d4   :  { %v3605_v44 = vadd.f32 %v6802_v39, %v3338_v59  ;;  %v3340_v31 = vpop.f32.mrb[70].mxu1  ;;  %3738 = vmatprep.subr.bf16.mxu0 %v3695_v4 }
 0x5d5   :  { %v3607_v49 = vadd.f32 %v6804_v33, %v3340_v31  ;;  %v3342_v40 = vpop.f32.mrb[71].mxu1  ;;  %3739 = vmatpush1.bf16.msra.mxu0 %v3694_v43  ;;  %v3652_v23 = vmax.f32 %v3604_v8, 0.0 }
 0x5d6   :  { %v3608_v47 = vadd.f32 %v6804_v33, %v3342_v40  ;;  %v3653_v14 = vmax.f32 %v3605_v44, 0.0 }
 0x5d7   :  { %v3655_v63 = vmax.f32 %v3607_v49, 0.0 }
 0x5d8   :  { %v3656_v7 = vmax.f32 %v3608_v47, 0.0 }
 0x5d9   :  { %v3697_v27 = vpack.c.bf16 %v3655_v63, %v3652_v23 }
 0x5da   :  { %v3698_v57 = vpack.c.bf16 %v3656_v7, %v3653_v14  ;;  %v3346_v13 = vpop.f32.mrb[72].mxu1 }
 0x5db   :  { %v3610_v58 = vadd.f32 %v6806_v2, %v3346_v13  ;;  %v3348_v9 = vpop.f32.mrb[73].mxu1 }
 0x5dc   :  { %v3611_v39 = vadd.f32 %v6806_v2, %v3348_v9  ;;  %v3350_v20 = vpop.f32.mrb[74].mxu1  ;;  %3740 = vmatprep.subr.bf16.mxu0 %v3698_v57 }
 0x5dd   :  { %v3613_v54 = vadd.f32 %v6808_v0, %v3350_v20  ;;  %v3352_v26 = vpop.f32.mrb[75].mxu1  ;;  %3741 = vmatpush1.bf16.msra.mxu0 %v3697_v27  ;;  %v3658_v25 = vmax.f32 %v3610_v58, 0.0 }
 0x5de   :  { %v3614_v33 = vadd.f32 %v6808_v0, %v3352_v26  ;;  %v3659_v62 = vmax.f32 %v3611_v39, 0.0 }
 0x5df   :  { %v3661_v36 = vmax.f32 %v3613_v54, 0.0 }
 0x5e0   :  { %v3662_v11 = vmax.f32 %v3614_v33, 0.0 }
 0x5e1   :  { %v3700_v50 = vpack.c.bf16 %v3661_v36, %v3658_v25 }
 0x5e2   :  { %v3701_v3 = vpack.c.bf16 %v3662_v11, %v3659_v62  ;;  %v3356_v28 = vpop.f32.mrb[76].mxu1 }
 0x5e3   :  { %v3616_v19 = vadd.f32 %v6810_v51, %v3356_v28  ;;  %v3358_v48 = vpop.f32.mrb[77].mxu1 }
 0x5e4   :  { %v3617_v2 = vadd.f32 %v6810_v51, %v3358_v48  ;;  %v3360_v56 = vpop.f32.mrb[78].mxu1  ;;  %3742 = vmatprep.subr.bf16.mxu0 %v3701_v3 }
 0x5e5   :  { %v3619_v1 = vadd.f32 %v6813_v52, %v3360_v56  ;;  %v3362_v35 = vpop.f32.mrb[79].mxu1  ;;  %3743 = vmatpush1.bf16.msra.mxu0 %v3700_v50  ;;  %v3664_v24 = vmax.f32 %v3616_v19, 0.0 }
 0x5e6   :  { %v3620_v0 = vadd.f32 %v6813_v52, %v3362_v35  ;;  %v3665_v22 = vmax.f32 %v3617_v2, 0.0 }
 0x5e7   :  { %v3667_v15 = vmax.f32 %v3619_v1, 0.0 }
 0x5e8   :  { %v3668_v45 = vmax.f32 %v3620_v0, 0.0 }
 0x5e9   :  { %v3703_v16 = vpack.c.bf16 %v3667_v15, %v3664_v24 }
 0x5ea   :  { %v3704_v61 = vpack.c.bf16 %v3668_v45, %v3665_v22  ;;  %v3366_v46 = vpop.f32.mrb[80].mxu1 }
 0x5eb   :  { %v3622_v43 = vadd.f32 %v6818_v34, %v3366_v46  ;;  %v3368_v4 = vpop.f32.mrb[81].mxu1 }
 0x5ec   :  { %v3623_v51 = vadd.f32 %v6818_v34, %v3368_v4  ;;  %v3370_v5 = vpop.f32.mrb[82].mxu1  ;;  %3744 = vmatprep.subr.bf16.mxu0 %v3704_v61 }
 0x5ed   :  { %v3625_v8 = vadd.f32 %v6822_v37, %v3370_v5  ;;  %v3372_v59 = vpop.f32.mrb[83].mxu1  ;;  %3745 = vmatpush1.bf16.msra.mxu0 %v3703_v16  ;;  %v3670_v44 = vmax.f32 %v3622_v43, 0.0 }
 0x5ee   :  { %v3626_v52 = vadd.f32 %v6822_v37, %v3372_v59  ;;  %v3671_v49 = vmax.f32 %v3623_v51, 0.0  ;;  %v4630_v51 = vld [vmem:[%s7074_s15] sm:$0x3f]  }
 0x5ef   :  { %v3673_v31 = vmax.f32 %v3625_v8, 0.0 }
 0x5f0   :  { %v3674_v40 = vmax.f32 %v3626_v52, 0.0 }
 0x5f1   :  { %v3706_v47 = vpack.c.bf16 %v3673_v31, %v3670_v44 }
 0x5f2   :  { %v3707_v23 = vpack.c.bf16 %v3674_v40, %v3671_v49  ;;  %v3376_v63 = vpop.f32.mrb[84].mxu1 }
 0x5f3   :  { %v3628_v14 = vadd.f32 %v6829_v18, %v3376_v63  ;;  %v3378_v7 = vpop.f32.mrb[85].mxu1 }
 0x5f4   :  { %v3629_v34 = vadd.f32 %v6829_v18, %v3378_v7  ;;  %v3380_v27 = vpop.f32.mrb[86].mxu1  ;;  %3746 = vmatprep.subr.bf16.mxu0 %v3707_v23 }
 0x5f5   :  { %v3631_v57 = vadd.f32 %v6832_v38, %v3380_v27  ;;  %v3382_v13 = vpop.f32.mrb[87].mxu1  ;;  %3747 = vmatpush1.bf16.msra.mxu0 %v3706_v47  ;;  %v3676_v58 = vmax.f32 %v3628_v14, 0.0 }
 0x5f6   :  { %v3632_v37 = vadd.f32 %v6832_v38, %v3382_v13  ;;  %v3677_v39 = vmax.f32 %v3629_v34, 0.0  ;;  %v7239_v34 = vld [vmem:[#allocation8_spill] sm:$0xff] }
 0x5f7   :  { %v3679_v9 = vmax.f32 %v3631_v57, 0.0  ;;  %v7240_v27 = vsub.s32 5, %v7239_v34 }
 0x5f8   :  { %v3680_v20 = vmax.f32 %v3632_v37, 0.0 }
 0x5f9   :  { %v3709_v54 = vpack.c.bf16 %v3679_v9, %v3676_v58 }
 0x5fa   :  { %v3710_v26 = vpack.c.bf16 %v3680_v20, %v3677_v39  ;;  %v3386_v33 = vpop.f32.mrb[88].mxu1 }
 0x5fb   :  { %v3634_v25 = vadd.f32 %v6839_v55, %v3386_v33  ;;  %v3388_v36 = vpop.f32.mrb[89].mxu1 }
 0x5fc   :  { %v3635_v18 = vadd.f32 %v6839_v55, %v3388_v36  ;;  %v3390_v62 = vpop.f32.mrb[90].mxu1  ;;  %3748 = vmatprep.subr.bf16.mxu0 %v3710_v26  ;;  %v7242_v36 = vld [vmem:[#allocation10_spill] sm:$0xff] }
 0x5fd   :  { %v3637_v11 = vadd.f32 %v6843_v41, %v3390_v62  ;;  %v3392_v50 = vpop.f32.mrb[91].mxu1  ;;  %3749 = vmatpush1.bf16.msra.mxu0 %v3709_v54  ;;  %v3682_v3 = vmax.f32 %v3634_v25, 0.0  ;;  %v7241_v54 = vsub.s32 4, %v7239_v34 }
 0x5fe   :  { %v3638_v38 = vadd.f32 %v6843_v41, %v3392_v50  ;;  %v3683_v19 = vmax.f32 %v3635_v18, 0.0 }
 0x5ff   :  { %v3685_v28 = vmax.f32 %v3637_v11, 0.0  ;;  %v7243_v11 = vsub.s32 6, %v7239_v34 }
 0x600   :  { %v3686_v48 = vmax.f32 %v3638_v38, 0.0 }
 0x601   :  { %v3712_v2 = vpack.c.bf16 %v3685_v28, %v3682_v3 }
 0x602   :  { %v3713_v56 = vpack.c.bf16 %v3686_v48, %v3683_v19  ;;  %v3396_v1 = vpop.f32.mrb[92].mxu1 }
 0x603   :  { %v3640_v35 = vadd.f32 %v6848_v10, %v3396_v1  ;;  %v3398_v0 = vpop.f32.mrb[93].mxu1 }
 0x604   :  { %v3641_v55 = vadd.f32 %v6848_v10, %v3398_v0  ;;  %v3400_v24 = vpop.f32.mrb[94].mxu1  ;;  %3750 = vmatprep.subr.bf16.mxu0 %v3713_v56  ;;  %v4737_v10 = vmov 0.0  }
 0x605   :  { %v3643_v15 = vadd.f32 %v6853_v29, %v3400_v24  ;;  %v3402_v22 = vpop.f32.mrb[95].mxu1  ;;  %3751 = vmatpush1.bf16.msra.mxu0 %v3712_v2  ;;  %v3688_v45 = vmax.f32 %v3640_v35, 0.0 }
 0x606   :  { %v3644_v41 = vadd.f32 %v6853_v29, %v3402_v22  ;;  %v3689_v61 = vmax.f32 %v3641_v55, 0.0  ;;  %v6920_v29 = vpop.permute.xlu0 %3724 }
 0x607   :  { %v3691_v16 = vmax.f32 %v3643_v15, 0.0 }
 0x608   :  { %v3692_v46 = vmax.f32 %v3644_v41, 0.0 }
 0x609   :  { %v3715_v43 = vpack.c.bf16 %v3691_v16, %v3688_v45 }
 0x60a   :  { %v3716_v4 = vpack.c.bf16 %v3692_v46, %v3689_v61  ;;  %v6961_v35 = vpop.permute.xlu0 %3947 }
 0x60c   :  { %3752 = vmatprep.subr.bf16.mxu0 %v3716_v4 }
 0x60d   :  { %3753 = vmatpush1.bf16.msra.mxu0 %v3715_v43 }
 0x60e   :  { %4457 = vmatprep.subr.bf16.mxu0 %v4737_v10 }
 0x610   :  { %3771 = vmatmul.mubr.bf16.vlgmr.msra.gmra.mrb[96].mxu0 %v4630_v51 }
 0x611   :  { %4458 = vmatpush3.bf16.msra.mxu0 %v6824_v32  ;;  %4473 = vmatprep.mubr.msk.bf16.mxu0 %vm4738_vm9, %v4737_v10  ;;  %v6911_v32 = vpop.permute.xlu1 %3911 }
 0x612   :  { %4459 = vmatprep.subr.bf16.mxu0 %v4737_v10 }
 0x615   :  { %4460 = vmatpush3.bf16.msra.mxu0 %v6820_v30  ;;  %v3846_v30 = vld [vmem:[%s7231_s4] sm:$0x7] }
 0x616   :  { %4461 = vmatprep.subr.bf16.mxu0 %v4737_v10  ;;  %vm3847_vm2 = vcmp.gt.f32.partialorder %v3846_v30, 0.5 }
 0x619   :  { %4462 = vmatpush3.bf16.msra.mxu0 %v6836_v17  ;;  %v6916_v17 = vpop.permute.xlu1 %3984 }
 0x61a   :  { %4463 = vmatprep.subr.bf16.mxu0 %v4737_v10 }
 0x61d   :  { %4464 = vmatpush3.bf16.msra.mxu0 %v6834_v6  ;;  %v6914_v6 = vsel %vm3847_vm2, 1, %v7220_v53  ;;  %v6927_v59 = vpop.permute.xlu1 %3729 }
 0x61e   :  { %4465 = vmatprep.subr.bf16.mxu0 %v4737_v10 }
 0x621   :  { %4466 = vmatpush3.bf16.msra.mxu0 %v6850_v60 }
 0x622   :  { %4467 = vmatprep.subr.bf16.mxu0 %v4737_v10 }
 0x625   :  { %4468 = vmatpush3.bf16.msra.mxu0 %v6846_v42  ;;  %v7232_v42 = vld [vmem:[#allocation11_spill] sm:$0xff] }
 0x626   :  { %4469 = vmatprep.subr.bf16.mxu0 %v4737_v10  ;;  %v3852_v60 = vrot.slane %v6914_v6, %v7232_v42 }
 0x628   :  { %vm6931_vm0 = vcmp.eq.s32.totalorder %v3852_v60, 1 }
 0x629   :  { %4470 = vmatpush3.bf16.msra.mxu0 %v6860_v12  ;;  %v7234_v12 = vld [vmem:[#allocation9_spill] sm:$0xff] }
 0x62a   :  { %4471 = vmatprep.subr.bf16.mxu0 %v4737_v10  ;;  %v3856_v5 = vrot.slane %v6914_v6, %v7234_v12 }
 0x62c   :  { %vm6936_vm1 = vcmp.eq.s32.totalorder %v3856_v5, 1 }
 0x62d   :  { %4472 = vmatpush3.bf16.msra.mxu0 %v6858_v21  ;;  %v3906_v21 = vld [vmem:[%s7233_s20] sm:$0x77] }
 0x62e   :  { %v3953_v44 = vrot.slane %v3906_v21, %v7234_v12  ;;  %v3957_v57 = vrot.slane %v3906_v21, %v7240_v27  ;;  %v3919_v9 = vrot.slane %v3906_v21, %v7232_v42  ;;  %v3923_v26 = vrot.slane %v3906_v21, %v7241_v54 }
 0x62f   :  { %v3990_v18 = vrot.slane %v3906_v21, %v7242_v36  ;;  %v3994_v50 = vrot.slane %v3906_v21, %v7243_v11 }
 0x630   :  { %4474 = vmatmul.mubr.bf16.vlgmr.msra.gmra.mrb[100].mxu0 %v4630_v51  ;;  %v3968_v19 = vrot.slane %v3953_v44, %v7234_v12  ;;  %v3934_v48 = vrot.slane %v3919_v9, %v7232_v42  ;;  %v3972_v1 = vrot.slane %v3957_v57, %v7234_v12  ;;  %v3938_v0 = vrot.slane %v3923_v26, %v7232_v42 }
 0x631   :  { %v4005_v24 = vrot.slane %v3990_v18, %v7242_v36  ;;  %v4009_v22 = vrot.slane %v3994_v50, %v7242_v36 }
 0x632   :  { %v3977_v41 = vmul.f32 %v3968_v19, %v6961_v35  ;;  %v3943_v45 = vmul.f32 %v3934_v48, %v6911_v32  ;;  %v3978_v16 = vmul.f32 %v3972_v1, %v6961_v35  ;;  %v3944_v61 = vmul.f32 %v3938_v0, %v6911_v32 }
 0x633   :  { %v4014_v43 = vmul.f32 %v4005_v24, %v6916_v17  ;;  %v4015_v51 = vmul.f32 %v4009_v22, %v6916_v17 }
 0x634   :  { %v3980_v30 = vadd.f32 %v3977_v41, %v3943_v45  ;;  %v3981_v21 = vadd.f32 %v3978_v16, %v3944_v61 }
 0x636   :  { %v4017_v5 = vadd.f32 %v4014_v43, %v3980_v30 }
 0x6e3   :  { %v3772_v8 = vpop.f32.mrb[96].mxu0 }
 0x6e4   :  { %v3773_v53 = vadd.f32 %v3772_v8, %v6920_v29  ;;  %v3774_v52 = vpop.f32.mrb[97].mxu0  ;;  %v4018_v8 = vadd.f32 %v4015_v51, %v3981_v21 }
 0x6e5   :  { %v3775_v49 = vadd.f32 %v3774_v52, %v6920_v29  ;;  %v3776_v40 = vpop.f32.mrb[98].mxu0 }
 0x6e6   :  { %v4239_v47 = vmul.f32 -1.442695, %v3773_v53  ;;  %v3840_v23 = vmax.f32 %v3773_v53, 0.0  ;;  %v3777_v14 = vadd.f32 %v3776_v40, %v6927_v59  ;;  %v3778_v7 = vpop.f32.mrb[99].mxu0  ;;  %v4020_v53 = vmul.f32 4.0, %v4017_v5 }
 0x6e7   :  { %v4240_v13 = vmul.f32 -1.442695, %v3775_v49  ;;  %v3841_v37 = vmax.f32 %v3775_v49, 0.0  ;;  %v3779_v58 = vadd.f32 %v3778_v7, %v6927_v59  ;;  %v4021_v52 = vmul.f32 4.0, %v4018_v8 }
 0x6e8   :  { %4667 = vpow2.f32 %v4239_v47  ;;  %v3873_v39 = vsel %vm6931_vm0, %v3840_v23, 0.0  ;;  %v3843_v20 = vmax.f32 %v3777_v14, 0.0  ;;  %v4026_v44 = vrot.slane %v4020_v53, %v7232_v42 }
 0x6e9   :  { %4669 = vpow2.f32 %v4240_v13  ;;  %v3874_v33 = vsel %vm6936_vm1, %v3841_v37, 0.0  ;;  %v3844_v25 = vmax.f32 %v3779_v58, 0.0  ;;  %v3885_v38 = vrot.slane %v3873_v39, 3 }
 0x6ea   :  { %v3876_v62 = vsel %vm6931_vm0, %v3843_v20, 0.0  ;;  %v3888_v2 = vrot.slane %v3874_v33, 3  ;;  %v4056_v49 = vrot.slane %v4020_v53, %v7234_v12  ;;  %v4030_v47 = vrot.slane %v4021_v52, %v7232_v42 }
 0x6eb   :  { %v3886_v3 = vrot.slane %v3876_v62, 3  ;;  %v3877_v28 = vsel %vm6936_vm1, %v3844_v25, 0.0  ;;  %v4060_v23 = vrot.slane %v4021_v52, %v7234_v12  ;;  %v3860_v37 = vrot.slane %v6914_v6, %v7242_v36  ;;  %v3907_v25 = vld [vmem:[%s7233_s20 + $0x8] sm:$0x7] }
 0x6ec   :  { %v3889_v56 = vrot.slane %v3877_v28, 3  ;;  %v3998_v16 = vrot.slane %v3907_v25, %v7242_v36 }
 0x6ed   :  { %v3887_v55 = vsel %vm1759_vm10, %v3885_v38, %v3886_v3  ;;  %3903 = vst [vmem:[#allocation4 + $0x18] sm:$0x1] %v3886_v3  ;;  %vm6988_vm3 = vcmp.eq.s32.totalorder %v3860_v37, 1 }
 0x6ee   :  { %3900 = vst [vmem:[#allocation4] sm:$0xff] %v3887_v55  ;;  %v3890_v15 = vsel %vm1759_vm10, %v3888_v2, %v3889_v56  ;;  %3904 = vst [vmem:[#allocation4 + $0x20] sm:$0x1] %v3889_v56 }
 0x6ef   :  { %3901 = vst [vmem:[#allocation4 + $0x8] sm:$0xff] %v3890_v15  ;;  %v3927_v15 = vrot.slane %v3907_v25, %v7232_v42 }
 0x6f1   :  { %v3942_v61 = vrot.slane %v3927_v15, %v7232_v42 }
 0x6f2   :  { %v4668_v46 = vpop.eup %4667 }
 0x6f3   :  { %v4670_v4 = vpop.eup %4669  ;;  %v3831_v10 = vadd.f32 1.0, %v4668_v46  ;;  %v3945_v30 = vmul.f32 %v3942_v61, %v6911_v32 }
 0x6f4   :  { %v3832_v60 = vadd.f32 1.0, %v4670_v4  ;;  %v4013_v4 = vrot.slane %v3998_v16, %v7242_v36 }
 0x6f5   :  { %4671 = vrcp.f32 %v3831_v10 }
 0x6f6   :  { %4673 = vrcp.f32 %v3832_v60 }
 0x6ff   :  { %v4672_v40 = vpop.eup %4671 }
 0x700   :  { %v4674_v14 = vpop.eup %4673  ;;  %v4035_v7 = vmul.f32 %v4672_v40, %v4026_v44  ;;  %v4065_v34 = vmul.f32 %v4672_v40, %v4056_v49  ;;  %v3864_v27 = vsel %vm6931_vm0, %v4672_v40, 1.0 }
 0x701   :  { %v4036_v57 = vmul.f32 %v4674_v14, %v4030_v47  ;;  %v4066_v13 = vmul.f32 %v4674_v14, %v4060_v23  ;;  %v3865_v58 = vsel %vm6936_vm1, %v4674_v14, 1.0 }
 0x702   :  { %v4038_v9 = vmax.f32 %v4035_v7, 0.0  ;;  %v4068_v39 = vmax.f32 %v4065_v34, 0.0  ;;  %v3869_v20 = vcombine.low %v3864_v27, %v3865_v58 }
 0x703   :  { %v4039_v54 = vmax.f32 %v4036_v57, 0.0  ;;  %v4069_v26 = vmax.f32 %v4066_v13, 0.0  ;;  %v3815_v33 = vpop.f32.mrb[100].mxu0 }
 0x704   :  { %v4041_v18 = vmin.f32 %v4038_v9, 1.0  ;;  %v4071_v62 = vmin.f32 %v4068_v39, 1.0  ;;  %v3816_v11 = vadd.f32 %v3815_v33, %v6920_v29  ;;  %v4475_v50 = vpop.f32.mrb[101].mxu0  ;;  %3871 = vst [vmem:[#allocation2] sm:$0x77] %v3869_v20  ;;  %v3961_v29 = vrot.slane %v3907_v25, %v7234_v12 }
 0x705   :  { %v4042_v6 = vmin.f32 %v4039_v54, 1.0  ;;  %v4072_v38 = vmin.f32 %v4069_v26, 1.0  ;;  %v3818_v28 = vpop.f32.mrb[102].mxu0 }
 0x706   :  { %v4044_v19 = vsel %vm6931_vm0, %v4041_v18, 1.0  ;;  %v4074_v48 = vsel %vm6931_vm0, %v4071_v62, 1.0  ;;  %v4241_v2 = vmul.f32 -1.442695, %v3816_v11  ;;  %v3842_v56 = vmax.f32 %v3816_v11, 0.0  ;;  %v4476_v1 = vpop.f32.mrb[103].mxu0 }
 0x707   :  { %v4045_v0 = vsel %vm6936_vm1, %v4042_v6, 1.0  ;;  %v4075_v55 = vsel %vm6936_vm1, %v4072_v38, 1.0  ;;  %v3819_v24 = vadd.f32 %v3818_v28, %v6927_v59  ;;  %v3976_v63 = vrot.slane %v3961_v29, %v7234_v12 }
 0x708   :  { %v4049_v22 = vcombine.low %v4044_v19, %v4045_v0  ;;  %v4079_v41 = vcombine.low %v4074_v48, %v4075_v55  ;;  %4675 = vpow2.f32 %v4241_v2  ;;  %v3875_v31 = vsel %vm6988_vm3, %v3842_v56, 0.0 }
 0x709   :  { %v3845_v45 = vmax.f32 %v3819_v24, 0.0  ;;  %v3891_v46 = vrot.slane %v3875_v31, 3  ;;  %v3979_v10 = vmul.f32 %v3976_v63, %v6961_v35 }
 0x70a   :  { %4051 = vst [vmem:[%s7076_s17] sm:$0x77] %v4049_v22  ;;  %4242 = vst [vmem:[%s7076_s17 + $0xc] sm:$0x77] %v4079_v41 }
 0x70b   :  { %v3878_v59 = vsel %vm6988_vm3, %v3845_v45, 0.0 }
 0x70c   :  { %v3892_v43 = vrot.slane %v3878_v59, 3 }
 0x70e   :  { %v3893_v51 = vsel %vm1759_vm10, %v3891_v46, %v3892_v43  ;;  %3905 = vst [vmem:[#allocation4 + $0x28] sm:$0x1] %v3892_v43 }
 0x70f   :  { %3902 = vst [vmem:[#allocation4 + $0x10] sm:$0xff] %v3893_v51 }
 0x710   :  { %4690 = shalt.err (!%p4687_p4)
}
 0x711   :  { %s4691_s10 = scalar_lea.hbm %s7078_s19, 768 }
 0x712   :  { %p4692_p5 = scmp.ne.s32.totalorder %s7078_s19, %s4691_s10  ;;  %p4695_p6 = scmp.lt.u32.totalorder %s4691_s10, %s7078_s19 }
 0x714   :  { %p4697_p7 = pnand %p4695_p6, %p4692_p5 }
 0x716   :  { %4700 = shalt.err (!%p4697_p7)
}
 0x717   :  { %s4740_s7 = smov 384   ;;  %s4741_s28 = smov 24   ;;  %v4676_v32 = vpop.eup %4675  ;;  %v4016_v36 = vmul.f32 %v4013_v4, %v6916_v17  ;;  %v3982_v60 = vadd.f32 %v3979_v10, %v3945_v30 }
 0x718   :  { %4107 = dma.vmem_to_hbm [thread:$0]  %s4102_s1, 768, %s7078_s19, [#allocation5], %s4740_s7, %s4740_s7, %s4741_s28   ;;  %v3833_v35 = vadd.f32 1.0, %v4676_v32 }
 0x719   :  { %v4019_v21 = vadd.f32 %v4016_v36, %v3982_v60  ;;  %s4742_s16 = smov [#allocation2]  }
 0x71a   :  { %4677 = vrcp.f32 %v3833_v35  ;;  %s4092_s8 = sshll.u32 %s4742_s16, 4  ;;  %s4093_s8 = int_to_ptr.vmem [resolvable:$true] %s4092_s8 }
 0x71b   :  { %v4022_v5 = vmul.f32 4.0, %v4019_v21  ;;  %s4701_s19 = scalar_lea.vmem %s4093_s8, 192  ;;  %p4706_p9 = scmp.lt.s32.totalorder %s4093_s8, %s4093_s8 }
 0x71c   :  { %p4702_p8 = scmp.ne.s32.totalorder %s4093_s8, %s4701_s19  ;;  %p4707_p10 = scmp.lt.s32.totalorder %s4701_s19, %s4701_s19 }
 0x71d   :  { %v4034_v8 = vrot.slane %v4022_v5, %v7232_v42  ;;  %v4064_v53 = vrot.slane %v4022_v5, %v7234_v12 }
 0x71e   :  { %p4708_p11 = por %p4707_p10, %p4706_p9 }
 0x720   :  { %p4709_p12 = pnand %p4708_p11, %p4702_p8 }
 0x724   :  { %v4678_v52 = vpop.eup %4677 }
 0x725   :  { %v4037_v44 = vmul.f32 %v4678_v52, %v4034_v8  ;;  %v4067_v49 = vmul.f32 %v4678_v52, %v4064_v53  ;;  %v3866_v40 = vsel %vm6988_vm3, %v4678_v52, 1.0 }
 0x726   :  { %3872 = vst [vmem:[#allocation2 + $0x8] sm:$0x7] %v3866_v40 }
 0x727   :  { %v4040_v17 = vmax.f32 %v4037_v44, 0.0  ;;  %v4070_v47 = vmax.f32 %v4067_v49, 0.0 }
 0x728   :  { %4712 = shalt.err (!%p4709_p12)
}
 0x729   :  { %s4713_s4 = scalar_lea.hbm %s7077_s18, 192 }
 0x72a   :  { %p4714_p13 = scmp.ne.s32.totalorder %s7077_s18, %s4713_s4  ;;  %p4717_p0 = scmp.lt.u32.totalorder %s4713_s4, %s7077_s18 }
 0x72c   :  { %p4719_p1 = pnand %p4717_p0, %p4714_p13 }
 0x72e   :  { %4722 = shalt.err (!%p4719_p1)
}
 0x72f   :  { %4095 = dma.vmem_to_hbm [thread:$0]  %s4093_s8, 192, %s7077_s18, [#allocation3]   ;;  %v4043_v42 = vmin.f32 %v4040_v17, 1.0  ;;  %v4073_v12 = vmin.f32 %v4070_v47, 1.0 }
 0x731   :  { %v4046_v23 = vsel %vm6988_vm3, %v4043_v42, 1.0  ;;  %v4076_v14 = vsel %vm6988_vm3, %v4073_v12, 1.0 }
 0x732   :  { %4052 = vst [vmem:[%s7076_s17 + $0x8] sm:$0x7] %v4046_v23  ;;  %4243 = vst [vmem:[%s7076_s17 + $0x14] sm:$0x7] %v4076_v14 }
 0x733   :  { %4723 = dma.done.wait [#allocation3], 192  }
 0x734   :  { %4724 = vsyncadd [#allocation3], 4294967104 }
 0x735   :  { %4725 = dma.done.wait [#allocation5], 768  }
 0x736   :  { %4726 = vsyncadd [#allocation5], 4294966528 }
 0x737   :  { %4116 = vsyncpa [#allocation3], 1 }
 0x738   :  { %4117 = vsyncpa [#allocation5], 1 }

</bundles_post_ra>
